<compile_context>
chip_gen: v5e
topology: v5e:2x2
jax: 0.10.0
libtpu: 0.0.40
codegen_flags: <defaults>
</compile_context>

<pallas_src>
import jax
import jax.numpy as jnp
from jax import lax
from jax.experimental import pallas as pl
from jax.experimental.pallas import tpu as pltpu


# ----------------------------- fused Pallas kernel --------------------------


def _gru(x_all, mask_ref, wih_ref, whh_ref, bpre_ref, bhn_ref,
         h0, h_scr, xp_scr, hs_ref=None):
    """Masked GRU recurrence (torch gate order r, z, n), used twice.

    x_all:    [S*Bp, E]  flattened time-major embedded inputs
    mask_ref: [S, Bp, H] lane-dense validity mask (1.0 where t < length)
    wih_ref:  [E, 3H]    fused input->hidden weights
    whh_ref:  [H, 3H]    fused hidden->hidden weights
    bpre_ref: [1, 3H]    b_ih + [b_hr, b_hz, 0] (host-side prefused)
    bhn_ref:  [1, H]     hidden bias of the n gate (stays inside r * (...))
    h0:       [Bp, H]    initial hidden (traced value)
    h_scr:    [Bp, H]    VMEM scratch carrying the hidden state
    xp_scr:   [S, Bp, 3H] VMEM scratch holding the hoisted input projection
    hs_ref:   [S, Bp, H] (decoder only) per-step hidden, zero at padding
    """
    S, Bp, H = mask_ref.shape
    threeH = whh_ref.shape[1]

    # Hoist the whole input-side projection out of the recurrence (one MXU
    # matmul); biases for the r/z gates are already folded in host-side.
    xp_scr[...] = (jnp.dot(x_all, wih_ref[...],
                           preferred_element_type=jnp.float32)
                   + bpre_ref[...]).reshape(S, Bp, threeH)

    # Loop-invariant broadcast of the n-gate hidden bias.
    b_hn = jnp.broadcast_to(bhn_ref[...], (Bp, H))

    h_scr[...] = h0

    def step(t, carry):
        xp_t = xp_scr[t]                                          # [Bp, 3H]
        m_t = mask_ref[t]                                         # [Bp, H]
        h = h_scr[...]                                            # [Bp, H]
        # Single fused hidden-side matmul (N = 3H, lane-dense).
        hp = jnp.dot(h, whh_ref[...],
                     preferred_element_type=jnp.float32)          # [Bp, 3H]
        r = jax.nn.sigmoid(xp_t[:, :H] + hp[:, :H])
        zg = jax.nn.sigmoid(xp_t[:, H:2 * H] + hp[:, H:2 * H])
        n = jnp.tanh(xp_t[:, 2 * H:] + r * (hp[:, 2 * H:] + b_hn))
        h_new = h + (1.0 - zg) * (n - h)           # == (1-z)*n + z*h
        # packed-sequence semantics: freeze hidden past the sequence length
        h_scr[...] = h + m_t * (h_new - h)
        if hs_ref is not None:
            hs_ref[t] = m_t * h_new                # pad_packed pads with 0
        return carry

    lax.fori_loop(0, S, step, 0, unroll=True)


def cvae_kernel(x_ref, mask_ref, cond_ref, eps_ref,
                enc_wih_ref, enc_whh_ref, enc_bpre_ref, enc_bhn_ref,
                dec_wih_ref, dec_whh_ref, dec_bpre_ref, dec_bhn_ref,
                w_ml_ref, b_ml_ref, w_l2h_ref, b_l2h_ref,
                w_voc_ref, b_voc_ref,
                logp_ref, mean_ref, logv_ref, z_ref,
                h_scr, xp_scr, hs_scr):
    """Whole CVAE forward in one kernel (everything VMEM-resident)."""
    S, Bp, E = x_ref.shape
    H = enc_whh_ref.shape[0]
    L = mean_ref.shape[1]
    V = w_voc_ref.shape[1]

    x_all = x_ref[...].reshape(S * Bp, E)

    # ---------------- encoder GRU (only the final hidden is needed) ---------
    _gru(x_all, mask_ref, enc_wih_ref, enc_whh_ref, enc_bpre_ref, enc_bhn_ref,
         jnp.zeros((Bp, H), jnp.float32), h_scr, xp_scr, hs_ref=None)
    h_enc = h_scr[...]                                            # [Bp, H]

    # -------- latent: hidden2mean|hidden2logv fused, reparameterize, --------
    # -------- cat with conditions, latent2hidden                     --------
    ml = jnp.dot(h_enc, w_ml_ref[...],
                 preferred_element_type=jnp.float32) + b_ml_ref[...]
    mean = ml[:, :L]
    logv = ml[:, L:]
    z = eps_ref[...] * jnp.exp(0.5 * logv) + mean                 # [Bp, L]
    zc = jnp.concatenate([z, cond_ref[...]], axis=1)              # [Bp, L+3C]
    h_dec0 = (jnp.dot(zc, w_l2h_ref[...],
                      preferred_element_type=jnp.float32) + b_l2h_ref[...])
    mean_ref[...] = mean
    logv_ref[...] = logv
    z_ref[...] = zc

    # ---------------- decoder GRU (per-step hidden, zero at padding) --------
    _gru(x_all, mask_ref, dec_wih_ref, dec_whh_ref, dec_bpre_ref, dec_bhn_ref,
         h_dec0, h_scr, xp_scr, hs_ref=hs_scr)

    # ---------------- outputs2vocab + log_softmax (one big matmul) ----------
    hs_flat = hs_scr[...].reshape(S * Bp, H)
    logits = jnp.dot(hs_flat, w_voc_ref[...],
                     preferred_element_type=jnp.float32) + b_voc_ref[...]
    m = jnp.max(logits, axis=-1, keepdims=True)
    shifted = logits - m
    lse = jnp.log(jnp.sum(jnp.exp(shifted), axis=-1, keepdims=True))
    logp_ref[...] = (shifted - lse).reshape(S, Bp, V)


# ------------------------------ pallas_call glue ----------------------------


def _full_spec(a):
    nd = a.ndim
    return pl.BlockSpec(a.shape, lambda i, nd=nd: (0,) * nd)


def cvae_fused(x_tm, mask_tm, cond, eps,
               enc_wih, enc_whh, enc_bpre, enc_bhn,
               dec_wih, dec_whh, dec_bpre, dec_bhn,
               w_ml, b_ml, w_l2h, b_l2h, w_voc, b_voc):
    S, Bp, _ = x_tm.shape
    H = enc_whh.shape[0]
    L = w_ml.shape[1] // 2
    C3 = cond.shape[1]
    V = w_voc.shape[1]
    args = (x_tm, mask_tm, cond, eps,
            enc_wih, enc_whh, enc_bpre, enc_bhn,
            dec_wih, dec_whh, dec_bpre, dec_bhn,
            w_ml, b_ml, w_l2h, b_l2h, w_voc, b_voc)
    return pl.pallas_call(
        cvae_kernel,
        grid=(1,),
        in_specs=[_full_spec(a) for a in args],
        out_specs=(pl.BlockSpec((S, Bp, V), lambda i: (0, 0, 0)),
                   pl.BlockSpec((Bp, L), lambda i: (0, 0)),
                   pl.BlockSpec((Bp, L), lambda i: (0, 0)),
                   pl.BlockSpec((Bp, L + C3), lambda i: (0, 0))),
        out_shape=(jax.ShapeDtypeStruct((S, Bp, V), jnp.float32),
                   jax.ShapeDtypeStruct((Bp, L), jnp.float32),
                   jax.ShapeDtypeStruct((Bp, L), jnp.float32),
                   jax.ShapeDtypeStruct((Bp, L + C3), jnp.float32)),
        scratch_shapes=[pltpu.VMEM((Bp, H), jnp.float32),          # h carry
                        pltpu.VMEM((S, Bp, 3 * H), jnp.float32),   # hoisted xp
                        pltpu.VMEM((S, Bp, H), jnp.float32)],      # decoder hs
        compiler_params=pltpu.CompilerParams(
            dimension_semantics=("arbitrary",),
            vmem_limit_bytes=32 * 1024 * 1024),
    )(*args)


# ------------------------------ CVAE forward --------------------------------


def cvae_forward(params, batch_data, batch_length, z_key):
    tokens = batch_data['transcription']          # [B, S] int32
    lengths = batch_length['transcription']       # [B]   int32
    B, S = tokens.shape
    H = params['enc_whh'].shape[0]
    L = params['w_ml'].shape[1] // 2

    # Pad the batch to the f32 sublane quantum (unmasked vector ops, better
    # MXU row occupancy).  Padding rows get length 0 and are sliced off.
    Bp = max(8, ((B + 7) // 8) * 8)
    pad = Bp - B

    # --- sort by length, descending (torch.sort(..., descending=True)) ------
    sorted_idx = jnp.argsort(-lengths)
    sorted_lengths = lengths[sorted_idx]
    input_sequence = tokens[sorted_idx]                           # [B, S]

    # --- embedding lookup, time-major (XLA glue: one gather) ----------------
    # TODO(synk): folding this gather into the kernel (resident table +
    # jnp.take on token ids) would remove the last HBM intermediate.
    x_tm = params['embedding'][input_sequence.T]                  # [S, B, E]

    # --- condition embeddings in ORIGINAL batch order (matches the torch
    #     reference, which concatenates sorted z rows with original-order
    #     cond rows and never re-sorts mean/logv/z) ---------------------------
    domain_embed = params['domain_embedding'][batch_data['domain']]     # [B,C]
    intent_embed = params['intent_embedding'][batch_data['intent']]     # [B,C]
    slot_embed = params['slotkey_embedding'][batch_data['slotKey']].mean(axis=1)
    cond = jnp.concatenate([domain_embed, intent_embed, slot_embed], axis=1)

    eps = jax.random.normal(z_key, (B, L), dtype=jnp.float32)

    # --- pad batch dim ------------------------------------------------------
    lengths_p = jnp.pad(sorted_lengths, (0, pad)) if pad else sorted_lengths
    if pad:
        x_tm = jnp.pad(x_tm, ((0, 0), (0, pad), (0, 0)))
        cond = jnp.pad(cond, ((0, pad), (0, 0)))
        eps = jnp.pad(eps, ((0, pad), (0, 0)))

    # --- lane-dense packed-sequence validity mask, time-major ---------------
    mask_tm = jnp.broadcast_to(
        (jnp.arange(S)[:, None] < lengths_p[None, :]
         ).astype(jnp.float32)[:, :, None], (S, Bp, H))           # [S, Bp, H]

    # --- the entire forward in ONE pallas_call ------------------------------
    logp_tm, mean_p, logv_p, z_p = cvae_fused(
        x_tm, mask_tm, cond, eps,
        params['enc_wih'], params['enc_whh'],
        params['enc_bpre'], params['enc_bhn'],
        params['dec_wih'], params['dec_whh'],
        params['dec_bpre'], params['dec_bhn'],
        params['w_ml'], params['b_ml'],
        params['w_l2h'], params['b_l2h'],
        params['w_vocab'], params['b_vocab'])

    mean = mean_p[:B]
    logv = logv_p[:B]
    z_out = z_p[:B]          # returned in sorted order, as in the reference

    # [S,Bp,V] -> [B,S,V] (sorted order) -> restore original batch order
    reversed_idx = jnp.argsort(sorted_idx)
    logp = jnp.transpose(logp_tm[:, :B, :], (1, 0, 2))[reversed_idx]
    return logp, mean, logv, z_out


# ------------------------------ parameter init ------------------------------


def init_params(key, V_trans, V_dom, V_int, V_slot, E, H, L, C):
    ks = iter(jax.random.split(key, 32))

    def nrm(shape, scale=0.1):
        return scale * jax.random.normal(next(ks), shape, dtype=jnp.float32)

    def gru_params(E_in, H_):
        # fused per-side weights, torch.nn.GRU gate order (r, z, n) stacked
        # along the output (lane) axis.
        wih = nrm((E_in, 3 * H_))
        whh = nrm((H_, 3 * H_))
        bih = nrm((1, 3 * H_))
        bhh = nrm((1, 3 * H_))
        # Host-side bias prefusion (perf feedback): the r/z hidden biases are
        # added to the hoisted x@Wih term; only b_hn stays inside r * (...).
        b_pre = bih + jnp.concatenate(
            [bhh[:, :2 * H_], jnp.zeros((1, H_), jnp.float32)], axis=1)
        b_hn = bhh[:, 2 * H_:]
        return wih, whh, b_pre, b_hn

    enc_wih, enc_whh, enc_bpre, enc_bhn = gru_params(E, H)
    dec_wih, dec_whh, dec_bpre, dec_bhn = gru_params(E, H)

    return dict(
        embedding=nrm((V_trans, E)),
        domain_embedding=nrm((V_dom, C)),
        intent_embedding=nrm((V_int, C)),
        slotkey_embedding=nrm((V_slot, C)),
        enc_wih=enc_wih, enc_whh=enc_whh, enc_bpre=enc_bpre, enc_bhn=enc_bhn,
        dec_wih=dec_wih, dec_whh=dec_whh, dec_bpre=dec_bpre, dec_bhn=dec_bhn,
        # hidden2mean | hidden2logv fused along the output axis: [H, 2L]
        w_ml=nrm((H, 2 * L)), b_ml=nrm((1, 2 * L)),
        # latent2hidden on cat([z, cond]): [L + 3C, H]
        w_l2h=nrm((L + 3 * C, H)), b_l2h=nrm((1, H)),
        w_vocab=nrm((H, V_trans)), b_vocab=nrm((1, V_trans)),
    )


# ---------------------------------- main ------------------------------------


if __name__ == "__main__":
    # Small but lane-dense shapes consistent with the module's hyperparams.
    B, S = 4, 8
    V_TRANS, V_DOM, V_INT, V_SLOT = 256, 4, 5, 6
    E, H, L, C = 64, 128, 32, 32        # 3H=384, L+3C=128, V=256 lane-dense
    N_SLOT_KEYS = 3

    key = jax.random.PRNGKey(0)
    k_param, k_tok, k_dom, k_int, k_slot, k_z = jax.random.split(key, 6)

    params = init_params(k_param, V_TRANS, V_DOM, V_INT, V_SLOT, E, H, L, C)

    batch_data = {
        'transcription': jax.random.randint(k_tok, (B, S), 0, V_TRANS,
                                            dtype=jnp.int32),
        'domain': jax.random.randint(k_dom, (B,), 0, V_DOM, dtype=jnp.int32),
        'intent': jax.random.randint(k_int, (B,), 0, V_INT, dtype=jnp.int32),
        'slotKey': jax.random.randint(k_slot, (B, N_SLOT_KEYS), 0, V_SLOT,
                                      dtype=jnp.int32),
    }
    batch_length = {
        # ensure max length == S so pad_packed output keeps the full S dim
        'transcription': jnp.array([8, 5, 8, 3], dtype=jnp.int32),
    }

    logp, mean, logv, z = cvae_forward(params, batch_data, batch_length, k_z)
    jax.block_until_ready((logp, mean, logv, z))

    assert logp.shape == (B, S, V_TRANS)
    assert mean.shape == (B, L) and logv.shape == (B, L)
    assert z.shape == (B, L + 3 * C)
    # log_softmax rows must normalize
    row_sums = jnp.sum(jnp.exp(logp), axis=-1)
    assert bool(jnp.all(jnp.isfinite(logp)))
    assert bool(jnp.all(jnp.abs(row_sums - 1.0) < 1e-3))

    print("KERNEL_OK")
</pallas_src>

<mosaic_0001>
module attributes {stable_mosaic.version = 11 : i64} {
  func.func @cvae_kernel(%arg0: i32, %arg1: memref<8x8x64xf32, #tpu.memory_space<vmem>>, %arg2: memref<8x8x128xf32, #tpu.memory_space<vmem>>, %arg3: memref<8x96xf32, #tpu.memory_space<vmem>>, %arg4: memref<8x32xf32, #tpu.memory_space<vmem>>, %arg5: memref<64x384xf32, #tpu.memory_space<vmem>>, %arg6: memref<128x384xf32, #tpu.memory_space<vmem>>, %arg7: memref<1x384xf32, #tpu.memory_space<vmem>>, %arg8: memref<1x128xf32, #tpu.memory_space<vmem>>, %arg9: memref<64x384xf32, #tpu.memory_space<vmem>>, %arg10: memref<128x384xf32, #tpu.memory_space<vmem>>, %arg11: memref<1x384xf32, #tpu.memory_space<vmem>>, %arg12: memref<1x128xf32, #tpu.memory_space<vmem>>, %arg13: memref<128x64xf32, #tpu.memory_space<vmem>>, %arg14: memref<1x64xf32, #tpu.memory_space<vmem>>, %arg15: memref<128x128xf32, #tpu.memory_space<vmem>>, %arg16: memref<1x128xf32, #tpu.memory_space<vmem>>, %arg17: memref<128x256xf32, #tpu.memory_space<vmem>>, %arg18: memref<1x256xf32, #tpu.memory_space<vmem>>, %arg19: memref<8x8x256xf32, #tpu.memory_space<vmem>>, %arg20: memref<8x32xf32, #tpu.memory_space<vmem>>, %arg21: memref<8x32xf32, #tpu.memory_space<vmem>>, %arg22: memref<8x128xf32, #tpu.memory_space<vmem>>, %arg23: memref<8x128xf32, #tpu.memory_space<vmem>>, %arg24: memref<8x8x384xf32, #tpu.memory_space<vmem>>, %arg25: memref<8x8x128xf32, #tpu.memory_space<vmem>>) attributes {dimension_semantics = [#tpu.dimension_semantics<arbitrary>], iteration_bounds = array<i64: 1>, scalar_prefetch = 0 : i64, scratch_operands = 3 : i64, tpu.core_type = #tpu.core_type<tc>, window_params = [{pipeline_mode = #tpu.pipeline_mode<synchronous>, transform_indices = @transform_0, window_bounds = array<i64: 8, 8, 64>}, {pipeline_mode = #tpu.pipeline_mode<synchronous>, transform_indices = @transform_1, window_bounds = array<i64: 8, 8, 128>}, {pipeline_mode = #tpu.pipeline_mode<synchronous>, transform_indices = @transform_2, window_bounds = array<i64: 8, 96>}, {pipeline_mode = #tpu.pipeline_mode<synchronous>, transform_indices = @transform_3, window_bounds = array<i64: 8, 32>}, {pipeline_mode = #tpu.pipeline_mode<synchronous>, transform_indices = @transform_4, window_bounds = array<i64: 64, 384>}, {pipeline_mode = #tpu.pipeline_mode<synchronous>, transform_indices = @transform_5, window_bounds = array<i64: 128, 384>}, {pipeline_mode = #tpu.pipeline_mode<synchronous>, transform_indices = @transform_6, window_bounds = array<i64: 1, 384>}, {pipeline_mode = #tpu.pipeline_mode<synchronous>, transform_indices = @transform_7, window_bounds = array<i64: 1, 128>}, {pipeline_mode = #tpu.pipeline_mode<synchronous>, transform_indices = @transform_8, window_bounds = array<i64: 64, 384>}, {pipeline_mode = #tpu.pipeline_mode<synchronous>, transform_indices = @transform_9, window_bounds = array<i64: 128, 384>}, {pipeline_mode = #tpu.pipeline_mode<synchronous>, transform_indices = @transform_10, window_bounds = array<i64: 1, 384>}, {pipeline_mode = #tpu.pipeline_mode<synchronous>, transform_indices = @transform_11, window_bounds = array<i64: 1, 128>}, {pipeline_mode = #tpu.pipeline_mode<synchronous>, transform_indices = @transform_12, window_bounds = array<i64: 128, 64>}, {pipeline_mode = #tpu.pipeline_mode<synchronous>, transform_indices = @transform_13, window_bounds = array<i64: 1, 64>}, {pipeline_mode = #tpu.pipeline_mode<synchronous>, transform_indices = @transform_14, window_bounds = array<i64: 128, 128>}, {pipeline_mode = #tpu.pipeline_mode<synchronous>, transform_indices = @transform_15, window_bounds = array<i64: 1, 128>}, {pipeline_mode = #tpu.pipeline_mode<synchronous>, transform_indices = @transform_16, window_bounds = array<i64: 128, 256>}, {pipeline_mode = #tpu.pipeline_mode<synchronous>, transform_indices = @transform_17, window_bounds = array<i64: 1, 256>}, {pipeline_mode = #tpu.pipeline_mode<synchronous>, transform_indices = @transform_18, window_bounds = array<i64: 8, 8, 256>}, {pipeline_mode = #tpu.pipeline_mode<synchronous>, transform_indices = @transform_19, window_bounds = array<i64: 8, 32>}, {pipeline_mode = #tpu.pipeline_mode<synchronous>, transform_indices = @transform_20, window_bounds = array<i64: 8, 32>}, {pipeline_mode = #tpu.pipeline_mode<synchronous>, transform_indices = @transform_21, window_bounds = array<i64: 8, 128>}]} {
    %c0 = arith.constant 0 : index
    %c0_0 = arith.constant 0 : index
    %c0_1 = arith.constant 0 : index
    %0 = vector.load %arg1[%c0, %c0_0, %c0_1] : memref<8x8x64xf32, #tpu.memory_space<vmem>>, vector<8x8x64xf32>
    %1 = vector.shape_cast %0 : vector<8x8x64xf32> to vector<64x64xf32>
    %cst = arith.constant 0.000000e+00 : f32
    %2 = vector.broadcast %cst : f32 to vector<8x128xf32>
    %c0_2 = arith.constant 0 : index
    %c0_3 = arith.constant 0 : index
    %3 = vector.load %arg5[%c0_2, %c0_3] : memref<64x384xf32, #tpu.memory_space<vmem>>, vector<64x384xf32>
    %cst_4 = arith.constant dense<0.000000e+00> : vector<64x384xf32>
    %4 = tpu.matmul %1, %3, %cst_4 {dimension_numbers = #tpu.dot_dimension_numbers<[1], [0], [0], [1], [0, 0, 1, 1], [], []>} : vector<64x64xf32>, vector<64x384xf32>, vector<64x384xf32> -> vector<64x384xf32>
    %c0_5 = arith.constant 0 : index
    %c0_6 = arith.constant 0 : index
    %5 = vector.load %arg7[%c0_5, %c0_6] : memref<1x384xf32, #tpu.memory_space<vmem>>, vector<1x384xf32>
    %6 = vector.broadcast %5 : vector<1x384xf32> to vector<64x384xf32>
    %7 = arith.addf %4, %6 : vector<64x384xf32>
    %8 = vector.shape_cast %7 : vector<64x384xf32> to vector<8x8x384xf32>
    %c0_7 = arith.constant 0 : index
    %c0_8 = arith.constant 0 : index
    %c0_9 = arith.constant 0 : index
    %9 = vector.load %arg24[%c0_7, %c0_8, %c0_9] : memref<8x8x384xf32, #tpu.memory_space<vmem>>, vector<8x8x384xf32>
    tpu.vector_store %arg24[%c0_7, %c0_8, %c0_9], %8 {strides = array<i32>} : memref<8x8x384xf32, #tpu.memory_space<vmem>>, vector<8x8x384xf32>,
    %c0_10 = arith.constant 0 : index
    %c0_11 = arith.constant 0 : index
    %10 = vector.load %arg8[%c0_10, %c0_11] : memref<1x128xf32, #tpu.memory_space<vmem>>, vector<1x128xf32>
    %11 = vector.shape_cast %10 : vector<1x128xf32> to vector<1x128xf32>
    %12 = vector.broadcast %11 : vector<1x128xf32> to vector<8x128xf32>
    %c0_12 = arith.constant 0 : index
    %c0_13 = arith.constant 0 : index
    %13 = vector.load %arg23[%c0_12, %c0_13] : memref<8x128xf32, #tpu.memory_space<vmem>>, vector<8x128xf32>
    tpu.vector_store %arg23[%c0_12, %c0_13], %2 {strides = array<i32>} : memref<8x128xf32, #tpu.memory_space<vmem>>, vector<8x128xf32>,
    %c0_i32 = arith.constant 0 : i32
    %14 = arith.index_cast %c0_i32 : i32 to index
    %c0_14 = arith.constant 0 : index
    %c0_15 = arith.constant 0 : index
    %15 = vector.load %arg24[%14, %c0_14, %c0_15] : memref<8x8x384xf32, #tpu.memory_space<vmem>>, vector<1x8x384xf32>
    %16 = vector.shape_cast %15 : vector<1x8x384xf32> to vector<8x384xf32>
    %17 = arith.index_cast %c0_i32 : i32 to index
    %c0_16 = arith.constant 0 : index
    %c0_17 = arith.constant 0 : index
    %18 = vector.load %arg2[%17, %c0_16, %c0_17] : memref<8x8x128xf32, #tpu.memory_space<vmem>>, vector<1x8x128xf32>
    %19 = vector.shape_cast %18 : vector<1x8x128xf32> to vector<8x128xf32>
    %c0_18 = arith.constant 0 : index
    %c0_19 = arith.constant 0 : index
    %20 = vector.load %arg23[%c0_18, %c0_19] : memref<8x128xf32, #tpu.memory_space<vmem>>, vector<8x128xf32>
    %c0_20 = arith.constant 0 : index
    %c0_21 = arith.constant 0 : index
    %21 = vector.load %arg6[%c0_20, %c0_21] : memref<128x384xf32, #tpu.memory_space<vmem>>, vector<128x384xf32>
    %cst_22 = arith.constant dense<0.000000e+00> : vector<8x384xf32>
    %22 = tpu.matmul %20, %21, %cst_22 {dimension_numbers = #tpu.dot_dimension_numbers<[1], [0], [0], [1], [0, 0, 1, 1], [], []>} : vector<8x128xf32>, vector<128x384xf32>, vector<8x384xf32> -> vector<8x384xf32>
    %23 = vector.extract_strided_slice %16 {offsets = [0, 0], sizes = [8, 128], strides = [1, 1]} : vector<8x384xf32> to vector<8x128xf32>
    %24 = vector.extract_strided_slice %22 {offsets = [0, 0], sizes = [8, 128], strides = [1, 1]} : vector<8x384xf32> to vector<8x128xf32>
    %25 = arith.addf %23, %24 : vector<8x128xf32>
    %26 = arith.negf %25 : vector<8x128xf32>
    %27 = math.exp %26 : vector<8x128xf32>
    %cst_23 = arith.constant 1.000000e+00 : f32
    %28 = vector.broadcast %cst_23 : f32 to vector<8x128xf32>
    %29 = arith.addf %28, %27 : vector<8x128xf32>
    %30 = arith.divf %28, %29 : vector<8x128xf32>
    %31 = vector.extract_strided_slice %16 {offsets = [0, 128], sizes = [8, 128], strides = [1, 1]} : vector<8x384xf32> to vector<8x128xf32>
    %32 = vector.extract_strided_slice %22 {offsets = [0, 128], sizes = [8, 128], strides = [1, 1]} : vector<8x384xf32> to vector<8x128xf32>
    %33 = arith.addf %31, %32 : vector<8x128xf32>
    %34 = arith.negf %33 : vector<8x128xf32>
    %35 = math.exp %34 : vector<8x128xf32>
    %cst_24 = arith.constant 1.000000e+00 : f32
    %36 = vector.broadcast %cst_24 : f32 to vector<8x128xf32>
    %37 = arith.addf %36, %35 : vector<8x128xf32>
    %38 = arith.divf %36, %37 : vector<8x128xf32>
    %39 = vector.extract_strided_slice %16 {offsets = [0, 256], sizes = [8, 128], strides = [1, 1]} : vector<8x384xf32> to vector<8x128xf32>
    %40 = vector.extract_strided_slice %22 {offsets = [0, 256], sizes = [8, 128], strides = [1, 1]} : vector<8x384xf32> to vector<8x128xf32>
    %41 = arith.addf %40, %12 : vector<8x128xf32>
    %42 = arith.mulf %30, %41 : vector<8x128xf32>
    %43 = arith.addf %39, %42 : vector<8x128xf32>
    %44 = math.tanh %43 : vector<8x128xf32>
    %cst_25 = arith.constant 1.000000e+00 : f32
    %45 = vector.broadcast %cst_25 : f32 to vector<8x128xf32>
    %46 = arith.subf %45, %38 : vector<8x128xf32>
    %47 = arith.subf %44, %20 : vector<8x128xf32>
    %48 = arith.mulf %46, %47 : vector<8x128xf32>
    %49 = arith.addf %20, %48 : vector<8x128xf32>
    %50 = arith.subf %49, %20 : vector<8x128xf32>
    %51 = arith.mulf %19, %50 : vector<8x128xf32>
    %52 = arith.addf %20, %51 : vector<8x128xf32>
    %c0_26 = arith.constant 0 : index
    %c0_27 = arith.constant 0 : index
    %53 = vector.load %arg23[%c0_26, %c0_27] : memref<8x128xf32, #tpu.memory_space<vmem>>, vector<8x128xf32>
    tpu.vector_store %arg23[%c0_26, %c0_27], %52 {strides = array<i32>} : memref<8x128xf32, #tpu.memory_space<vmem>>, vector<8x128xf32>,
    %c1_i32 = arith.constant 1 : i32
    %54 = arith.index_cast %c1_i32 : i32 to index
    %c0_28 = arith.constant 0 : index
    %c0_29 = arith.constant 0 : index
    %55 = vector.load %arg24[%54, %c0_28, %c0_29] : memref<8x8x384xf32, #tpu.memory_space<vmem>>, vector<1x8x384xf32>
    %56 = vector.shape_cast %55 : vector<1x8x384xf32> to vector<8x384xf32>
    %57 = arith.index_cast %c1_i32 : i32 to index
    %c0_30 = arith.constant 0 : index
    %c0_31 = arith.constant 0 : index
    %58 = vector.load %arg2[%57, %c0_30, %c0_31] : memref<8x8x128xf32, #tpu.memory_space<vmem>>, vector<1x8x128xf32>
    %59 = vector.shape_cast %58 : vector<1x8x128xf32> to vector<8x128xf32>
    %c0_32 = arith.constant 0 : index
    %c0_33 = arith.constant 0 : index
    %60 = vector.load %arg23[%c0_32, %c0_33] : memref<8x128xf32, #tpu.memory_space<vmem>>, vector<8x128xf32>
    %c0_34 = arith.constant 0 : index
    %c0_35 = arith.constant 0 : index
    %61 = vector.load %arg6[%c0_34, %c0_35] : memref<128x384xf32, #tpu.memory_space<vmem>>, vector<128x384xf32>
    %cst_36 = arith.constant dense<0.000000e+00> : vector<8x384xf32>
    %62 = tpu.matmul %60, %61, %cst_36 {dimension_numbers = #tpu.dot_dimension_numbers<[1], [0], [0], [1], [0, 0, 1, 1], [], []>} : vector<8x128xf32>, vector<128x384xf32>, vector<8x384xf32> -> vector<8x384xf32>
    %63 = vector.extract_strided_slice %56 {offsets = [0, 0], sizes = [8, 128], strides = [1, 1]} : vector<8x384xf32> to vector<8x128xf32>
    %64 = vector.extract_strided_slice %62 {offsets = [0, 0], sizes = [8, 128], strides = [1, 1]} : vector<8x384xf32> to vector<8x128xf32>
    %65 = arith.addf %63, %64 : vector<8x128xf32>
    %66 = arith.negf %65 : vector<8x128xf32>
    %67 = math.exp %66 : vector<8x128xf32>
    %cst_37 = arith.constant 1.000000e+00 : f32
    %68 = vector.broadcast %cst_37 : f32 to vector<8x128xf32>
    %69 = arith.addf %68, %67 : vector<8x128xf32>
    %70 = arith.divf %68, %69 : vector<8x128xf32>
    %71 = vector.extract_strided_slice %56 {offsets = [0, 128], sizes = [8, 128], strides = [1, 1]} : vector<8x384xf32> to vector<8x128xf32>
    %72 = vector.extract_strided_slice %62 {offsets = [0, 128], sizes = [8, 128], strides = [1, 1]} : vector<8x384xf32> to vector<8x128xf32>
    %73 = arith.addf %71, %72 : vector<8x128xf32>
    %74 = arith.negf %73 : vector<8x128xf32>
    %75 = math.exp %74 : vector<8x128xf32>
    %cst_38 = arith.constant 1.000000e+00 : f32
    %76 = vector.broadcast %cst_38 : f32 to vector<8x128xf32>
    %77 = arith.addf %76, %75 : vector<8x128xf32>
    %78 = arith.divf %76, %77 : vector<8x128xf32>
    %79 = vector.extract_strided_slice %56 {offsets = [0, 256], sizes = [8, 128], strides = [1, 1]} : vector<8x384xf32> to vector<8x128xf32>
    %80 = vector.extract_strided_slice %62 {offsets = [0, 256], sizes = [8, 128], strides = [1, 1]} : vector<8x384xf32> to vector<8x128xf32>
    %81 = arith.addf %80, %12 : vector<8x128xf32>
    %82 = arith.mulf %70, %81 : vector<8x128xf32>
    %83 = arith.addf %79, %82 : vector<8x128xf32>
    %84 = math.tanh %83 : vector<8x128xf32>
    %cst_39 = arith.constant 1.000000e+00 : f32
    %85 = vector.broadcast %cst_39 : f32 to vector<8x128xf32>
    %86 = arith.subf %85, %78 : vector<8x128xf32>
    %87 = arith.subf %84, %60 : vector<8x128xf32>
    %88 = arith.mulf %86, %87 : vector<8x128xf32>
    %89 = arith.addf %60, %88 : vector<8x128xf32>
    %90 = arith.subf %89, %60 : vector<8x128xf32>
    %91 = arith.mulf %59, %90 : vector<8x128xf32>
    %92 = arith.addf %60, %91 : vector<8x128xf32>
    %c0_40 = arith.constant 0 : index
    %c0_41 = arith.constant 0 : index
    %93 = vector.load %arg23[%c0_40, %c0_41] : memref<8x128xf32, #tpu.memory_space<vmem>>, vector<8x128xf32>
    tpu.vector_store %arg23[%c0_40, %c0_41], %92 {strides = array<i32>} : memref<8x128xf32, #tpu.memory_space<vmem>>, vector<8x128xf32>,
    %c2_i32 = arith.constant 2 : i32
    %94 = arith.index_cast %c2_i32 : i32 to index
    %c0_42 = arith.constant 0 : index
    %c0_43 = arith.constant 0 : index
    %95 = vector.load %arg24[%94, %c0_42, %c0_43] : memref<8x8x384xf32, #tpu.memory_space<vmem>>, vector<1x8x384xf32>
    %96 = vector.shape_cast %95 : vector<1x8x384xf32> to vector<8x384xf32>
    %97 = arith.index_cast %c2_i32 : i32 to index
    %c0_44 = arith.constant 0 : index
    %c0_45 = arith.constant 0 : index
    %98 = vector.load %arg2[%97, %c0_44, %c0_45] : memref<8x8x128xf32, #tpu.memory_space<vmem>>, vector<1x8x128xf32>
    %99 = vector.shape_cast %98 : vector<1x8x128xf32> to vector<8x128xf32>
    %c0_46 = arith.constant 0 : index
    %c0_47 = arith.constant 0 : index
    %100 = vector.load %arg23[%c0_46, %c0_47] : memref<8x128xf32, #tpu.memory_space<vmem>>, vector<8x128xf32>
    %c0_48 = arith.constant 0 : index
    %c0_49 = arith.constant 0 : index
    %101 = vector.load %arg6[%c0_48, %c0_49] : memref<128x384xf32, #tpu.memory_space<vmem>>, vector<128x384xf32>
    %cst_50 = arith.constant dense<0.000000e+00> : vector<8x384xf32>
    %102 = tpu.matmul %100, %101, %cst_50 {dimension_numbers = #tpu.dot_dimension_numbers<[1], [0], [0], [1], [0, 0, 1, 1], [], []>} : vector<8x128xf32>, vector<128x384xf32>, vector<8x384xf32> -> vector<8x384xf32>
    %103 = vector.extract_strided_slice %96 {offsets = [0, 0], sizes = [8, 128], strides = [1, 1]} : vector<8x384xf32> to vector<8x128xf32>
    %104 = vector.extract_strided_slice %102 {offsets = [0, 0], sizes = [8, 128], strides = [1, 1]} : vector<8x384xf32> to vector<8x128xf32>
    %105 = arith.addf %103, %104 : vector<8x128xf32>
    %106 = arith.negf %105 : vector<8x128xf32>
    %107 = math.exp %106 : vector<8x128xf32>
    %cst_51 = arith.constant 1.000000e+00 : f32
    %108 = vector.broadcast %cst_51 : f32 to vector<8x128xf32>
    %109 = arith.addf %108, %107 : vector<8x128xf32>
    %110 = arith.divf %108, %109 : vector<8x128xf32>
    %111 = vector.extract_strided_slice %96 {offsets = [0, 128], sizes = [8, 128], strides = [1, 1]} : vector<8x384xf32> to vector<8x128xf32>
    %112 = vector.extract_strided_slice %102 {offsets = [0, 128], sizes = [8, 128], strides = [1, 1]} : vector<8x384xf32> to vector<8x128xf32>
    %113 = arith.addf %111, %112 : vector<8x128xf32>
    %114 = arith.negf %113 : vector<8x128xf32>
    %115 = math.exp %114 : vector<8x128xf32>
    %cst_52 = arith.constant 1.000000e+00 : f32
    %116 = vector.broadcast %cst_52 : f32 to vector<8x128xf32>
    %117 = arith.addf %116, %115 : vector<8x128xf32>
    %118 = arith.divf %116, %117 : vector<8x128xf32>
    %119 = vector.extract_strided_slice %96 {offsets = [0, 256], sizes = [8, 128], strides = [1, 1]} : vector<8x384xf32> to vector<8x128xf32>
    %120 = vector.extract_strided_slice %102 {offsets = [0, 256], sizes = [8, 128], strides = [1, 1]} : vector<8x384xf32> to vector<8x128xf32>
    %121 = arith.addf %120, %12 : vector<8x128xf32>
    %122 = arith.mulf %110, %121 : vector<8x128xf32>
    %123 = arith.addf %119, %122 : vector<8x128xf32>
    %124 = math.tanh %123 : vector<8x128xf32>
    %cst_53 = arith.constant 1.000000e+00 : f32
    %125 = vector.broadcast %cst_53 : f32 to vector<8x128xf32>
    %126 = arith.subf %125, %118 : vector<8x128xf32>
    %127 = arith.subf %124, %100 : vector<8x128xf32>
    %128 = arith.mulf %126, %127 : vector<8x128xf32>
    %129 = arith.addf %100, %128 : vector<8x128xf32>
    %130 = arith.subf %129, %100 : vector<8x128xf32>
    %131 = arith.mulf %99, %130 : vector<8x128xf32>
    %132 = arith.addf %100, %131 : vector<8x128xf32>
    %c0_54 = arith.constant 0 : index
    %c0_55 = arith.constant 0 : index
    %133 = vector.load %arg23[%c0_54, %c0_55] : memref<8x128xf32, #tpu.memory_space<vmem>>, vector<8x128xf32>
    tpu.vector_store %arg23[%c0_54, %c0_55], %132 {strides = array<i32>} : memref<8x128xf32, #tpu.memory_space<vmem>>, vector<8x128xf32>,
    %c3_i32 = arith.constant 3 : i32
    %134 = arith.index_cast %c3_i32 : i32 to index
    %c0_56 = arith.constant 0 : index
    %c0_57 = arith.constant 0 : index
    %135 = vector.load %arg24[%134, %c0_56, %c0_57] : memref<8x8x384xf32, #tpu.memory_space<vmem>>, vector<1x8x384xf32>
    %136 = vector.shape_cast %135 : vector<1x8x384xf32> to vector<8x384xf32>
    %137 = arith.index_cast %c3_i32 : i32 to index
    %c0_58 = arith.constant 0 : index
    %c0_59 = arith.constant 0 : index
    %138 = vector.load %arg2[%137, %c0_58, %c0_59] : memref<8x8x128xf32, #tpu.memory_space<vmem>>, vector<1x8x128xf32>
    %139 = vector.shape_cast %138 : vector<1x8x128xf32> to vector<8x128xf32>
    %c0_60 = arith.constant 0 : index
    %c0_61 = arith.constant 0 : index
    %140 = vector.load %arg23[%c0_60, %c0_61] : memref<8x128xf32, #tpu.memory_space<vmem>>, vector<8x128xf32>
    %c0_62 = arith.constant 0 : index
    %c0_63 = arith.constant 0 : index
    %141 = vector.load %arg6[%c0_62, %c0_63] : memref<128x384xf32, #tpu.memory_space<vmem>>, vector<128x384xf32>
    %cst_64 = arith.constant dense<0.000000e+00> : vector<8x384xf32>
    %142 = tpu.matmul %140, %141, %cst_64 {dimension_numbers = #tpu.dot_dimension_numbers<[1], [0], [0], [1], [0, 0, 1, 1], [], []>} : vector<8x128xf32>, vector<128x384xf32>, vector<8x384xf32> -> vector<8x384xf32>
    %143 = vector.extract_strided_slice %136 {offsets = [0, 0], sizes = [8, 128], strides = [1, 1]} : vector<8x384xf32> to vector<8x128xf32>
    %144 = vector.extract_strided_slice %142 {offsets = [0, 0], sizes = [8, 128], strides = [1, 1]} : vector<8x384xf32> to vector<8x128xf32>
    %145 = arith.addf %143, %144 : vector<8x128xf32>
    %146 = arith.negf %145 : vector<8x128xf32>
    %147 = math.exp %146 : vector<8x128xf32>
    %cst_65 = arith.constant 1.000000e+00 : f32
    %148 = vector.broadcast %cst_65 : f32 to vector<8x128xf32>
    %149 = arith.addf %148, %147 : vector<8x128xf32>
    %150 = arith.divf %148, %149 : vector<8x128xf32>
    %151 = vector.extract_strided_slice %136 {offsets = [0, 128], sizes = [8, 128], strides = [1, 1]} : vector<8x384xf32> to vector<8x128xf32>
    %152 = vector.extract_strided_slice %142 {offsets = [0, 128], sizes = [8, 128], strides = [1, 1]} : vector<8x384xf32> to vector<8x128xf32>
    %153 = arith.addf %151, %152 : vector<8x128xf32>
    %154 = arith.negf %153 : vector<8x128xf32>
    %155 = math.exp %154 : vector<8x128xf32>
    %cst_66 = arith.constant 1.000000e+00 : f32
    %156 = vector.broadcast %cst_66 : f32 to vector<8x128xf32>
    %157 = arith.addf %156, %155 : vector<8x128xf32>
    %158 = arith.divf %156, %157 : vector<8x128xf32>
    %159 = vector.extract_strided_slice %136 {offsets = [0, 256], sizes = [8, 128], strides = [1, 1]} : vector<8x384xf32> to vector<8x128xf32>
    %160 = vector.extract_strided_slice %142 {offsets = [0, 256], sizes = [8, 128], strides = [1, 1]} : vector<8x384xf32> to vector<8x128xf32>
    %161 = arith.addf %160, %12 : vector<8x128xf32>
    %162 = arith.mulf %150, %161 : vector<8x128xf32>
    %163 = arith.addf %159, %162 : vector<8x128xf32>
    %164 = math.tanh %163 : vector<8x128xf32>
    %cst_67 = arith.constant 1.000000e+00 : f32
    %165 = vector.broadcast %cst_67 : f32 to vector<8x128xf32>
    %166 = arith.subf %165, %158 : vector<8x128xf32>
    %167 = arith.subf %164, %140 : vector<8x128xf32>
    %168 = arith.mulf %166, %167 : vector<8x128xf32>
    %169 = arith.addf %140, %168 : vector<8x128xf32>
    %170 = arith.subf %169, %140 : vector<8x128xf32>
    %171 = arith.mulf %139, %170 : vector<8x128xf32>
    %172 = arith.addf %140, %171 : vector<8x128xf32>
    %c0_68 = arith.constant 0 : index
    %c0_69 = arith.constant 0 : index
    %173 = vector.load %arg23[%c0_68, %c0_69] : memref<8x128xf32, #tpu.memory_space<vmem>>, vector<8x128xf32>
    tpu.vector_store %arg23[%c0_68, %c0_69], %172 {strides = array<i32>} : memref<8x128xf32, #tpu.memory_space<vmem>>, vector<8x128xf32>,
    %c4_i32 = arith.constant 4 : i32
    %174 = arith.index_cast %c4_i32 : i32 to index
    %c0_70 = arith.constant 0 : index
    %c0_71 = arith.constant 0 : index
    %175 = vector.load %arg24[%174, %c0_70, %c0_71] : memref<8x8x384xf32, #tpu.memory_space<vmem>>, vector<1x8x384xf32>
    %176 = vector.shape_cast %175 : vector<1x8x384xf32> to vector<8x384xf32>
    %177 = arith.index_cast %c4_i32 : i32 to index
    %c0_72 = arith.constant 0 : index
    %c0_73 = arith.constant 0 : index
    %178 = vector.load %arg2[%177, %c0_72, %c0_73] : memref<8x8x128xf32, #tpu.memory_space<vmem>>, vector<1x8x128xf32>
    %179 = vector.shape_cast %178 : vector<1x8x128xf32> to vector<8x128xf32>
    %c0_74 = arith.constant 0 : index
    %c0_75 = arith.constant 0 : index
    %180 = vector.load %arg23[%c0_74, %c0_75] : memref<8x128xf32, #tpu.memory_space<vmem>>, vector<8x128xf32>
    %c0_76 = arith.constant 0 : index
    %c0_77 = arith.constant 0 : index
    %181 = vector.load %arg6[%c0_76, %c0_77] : memref<128x384xf32, #tpu.memory_space<vmem>>, vector<128x384xf32>
    %cst_78 = arith.constant dense<0.000000e+00> : vector<8x384xf32>
    %182 = tpu.matmul %180, %181, %cst_78 {dimension_numbers = #tpu.dot_dimension_numbers<[1], [0], [0], [1], [0, 0, 1, 1], [], []>} : vector<8x128xf32>, vector<128x384xf32>, vector<8x384xf32> -> vector<8x384xf32>
    %183 = vector.extract_strided_slice %176 {offsets = [0, 0], sizes = [8, 128], strides = [1, 1]} : vector<8x384xf32> to vector<8x128xf32>
    %184 = vector.extract_strided_slice %182 {offsets = [0, 0], sizes = [8, 128], strides = [1, 1]} : vector<8x384xf32> to vector<8x128xf32>
    %185 = arith.addf %183, %184 : vector<8x128xf32>
    %186 = arith.negf %185 : vector<8x128xf32>
    %187 = math.exp %186 : vector<8x128xf32>
    %cst_79 = arith.constant 1.000000e+00 : f32
    %188 = vector.broadcast %cst_79 : f32 to vector<8x128xf32>
    %189 = arith.addf %188, %187 : vector<8x128xf32>
    %190 = arith.divf %188, %189 : vector<8x128xf32>
    %191 = vector.extract_strided_slice %176 {offsets = [0, 128], sizes = [8, 128], strides = [1, 1]} : vector<8x384xf32> to vector<8x128xf32>
    %192 = vector.extract_strided_slice %182 {offsets = [0, 128], sizes = [8, 128], strides = [1, 1]} : vector<8x384xf32> to vector<8x128xf32>
    %193 = arith.addf %191, %192 : vector<8x128xf32>
    %194 = arith.negf %193 : vector<8x128xf32>
    %195 = math.exp %194 : vector<8x128xf32>
    %cst_80 = arith.constant 1.000000e+00 : f32
    %196 = vector.broadcast %cst_80 : f32 to vector<8x128xf32>
    %197 = arith.addf %196, %195 : vector<8x128xf32>
    %198 = arith.divf %196, %197 : vector<8x128xf32>
    %199 = vector.extract_strided_slice %176 {offsets = [0, 256], sizes = [8, 128], strides = [1, 1]} : vector<8x384xf32> to vector<8x128xf32>
    %200 = vector.extract_strided_slice %182 {offsets = [0, 256], sizes = [8, 128], strides = [1, 1]} : vector<8x384xf32> to vector<8x128xf32>
    %201 = arith.addf %200, %12 : vector<8x128xf32>
    %202 = arith.mulf %190, %201 : vector<8x128xf32>
    %203 = arith.addf %199, %202 : vector<8x128xf32>
    %204 = math.tanh %203 : vector<8x128xf32>
    %cst_81 = arith.constant 1.000000e+00 : f32
    %205 = vector.broadcast %cst_81 : f32 to vector<8x128xf32>
    %206 = arith.subf %205, %198 : vector<8x128xf32>
    %207 = arith.subf %204, %180 : vector<8x128xf32>
    %208 = arith.mulf %206, %207 : vector<8x128xf32>
    %209 = arith.addf %180, %208 : vector<8x128xf32>
    %210 = arith.subf %209, %180 : vector<8x128xf32>
    %211 = arith.mulf %179, %210 : vector<8x128xf32>
    %212 = arith.addf %180, %211 : vector<8x128xf32>
    %c0_82 = arith.constant 0 : index
    %c0_83 = arith.constant 0 : index
    %213 = vector.load %arg23[%c0_82, %c0_83] : memref<8x128xf32, #tpu.memory_space<vmem>>, vector<8x128xf32>
    tpu.vector_store %arg23[%c0_82, %c0_83], %212 {strides = array<i32>} : memref<8x128xf32, #tpu.memory_space<vmem>>, vector<8x128xf32>,
    %c5_i32 = arith.constant 5 : i32
    %214 = arith.index_cast %c5_i32 : i32 to index
    %c0_84 = arith.constant 0 : index
    %c0_85 = arith.constant 0 : index
    %215 = vector.load %arg24[%214, %c0_84, %c0_85] : memref<8x8x384xf32, #tpu.memory_space<vmem>>, vector<1x8x384xf32>
    %216 = vector.shape_cast %215 : vector<1x8x384xf32> to vector<8x384xf32>
    %217 = arith.index_cast %c5_i32 : i32 to index
    %c0_86 = arith.constant 0 : index
    %c0_87 = arith.constant 0 : index
    %218 = vector.load %arg2[%217, %c0_86, %c0_87] : memref<8x8x128xf32, #tpu.memory_space<vmem>>, vector<1x8x128xf32>
    %219 = vector.shape_cast %218 : vector<1x8x128xf32> to vector<8x128xf32>
    %c0_88 = arith.constant 0 : index
    %c0_89 = arith.constant 0 : index
    %220 = vector.load %arg23[%c0_88, %c0_89] : memref<8x128xf32, #tpu.memory_space<vmem>>, vector<8x128xf32>
    %c0_90 = arith.constant 0 : index
    %c0_91 = arith.constant 0 : index
    %221 = vector.load %arg6[%c0_90, %c0_91] : memref<128x384xf32, #tpu.memory_space<vmem>>, vector<128x384xf32>
    %cst_92 = arith.constant dense<0.000000e+00> : vector<8x384xf32>
    %222 = tpu.matmul %220, %221, %cst_92 {dimension_numbers = #tpu.dot_dimension_numbers<[1], [0], [0], [1], [0, 0, 1, 1], [], []>} : vector<8x128xf32>, vector<128x384xf32>, vector<8x384xf32> -> vector<8x384xf32>
    %223 = vector.extract_strided_slice %216 {offsets = [0, 0], sizes = [8, 128], strides = [1, 1]} : vector<8x384xf32> to vector<8x128xf32>
    %224 = vector.extract_strided_slice %222 {offsets = [0, 0], sizes = [8, 128], strides = [1, 1]} : vector<8x384xf32> to vector<8x128xf32>
    %225 = arith.addf %223, %224 : vector<8x128xf32>
    %226 = arith.negf %225 : vector<8x128xf32>
    %227 = math.exp %226 : vector<8x128xf32>
    %cst_93 = arith.constant 1.000000e+00 : f32
    %228 = vector.broadcast %cst_93 : f32 to vector<8x128xf32>
    %229 = arith.addf %228, %227 : vector<8x128xf32>
    %230 = arith.divf %228, %229 : vector<8x128xf32>
    %231 = vector.extract_strided_slice %216 {offsets = [0, 128], sizes = [8, 128], strides = [1, 1]} : vector<8x384xf32> to vector<8x128xf32>
    %232 = vector.extract_strided_slice %222 {offsets = [0, 128], sizes = [8, 128], strides = [1, 1]} : vector<8x384xf32> to vector<8x128xf32>
    %233 = arith.addf %231, %232 : vector<8x128xf32>
    %234 = arith.negf %233 : vector<8x128xf32>
    %235 = math.exp %234 : vector<8x128xf32>
    %cst_94 = arith.constant 1.000000e+00 : f32
    %236 = vector.broadcast %cst_94 : f32 to vector<8x128xf32>
    %237 = arith.addf %236, %235 : vector<8x128xf32>
    %238 = arith.divf %236, %237 : vector<8x128xf32>
    %239 = vector.extract_strided_slice %216 {offsets = [0, 256], sizes = [8, 128], strides = [1, 1]} : vector<8x384xf32> to vector<8x128xf32>
    %240 = vector.extract_strided_slice %222 {offsets = [0, 256], sizes = [8, 128], strides = [1, 1]} : vector<8x384xf32> to vector<8x128xf32>
    %241 = arith.addf %240, %12 : vector<8x128xf32>
    %242 = arith.mulf %230, %241 : vector<8x128xf32>
    %243 = arith.addf %239, %242 : vector<8x128xf32>
    %244 = math.tanh %243 : vector<8x128xf32>
    %cst_95 = arith.constant 1.000000e+00 : f32
    %245 = vector.broadcast %cst_95 : f32 to vector<8x128xf32>
    %246 = arith.subf %245, %238 : vector<8x128xf32>
    %247 = arith.subf %244, %220 : vector<8x128xf32>
    %248 = arith.mulf %246, %247 : vector<8x128xf32>
    %249 = arith.addf %220, %248 : vector<8x128xf32>
    %250 = arith.subf %249, %220 : vector<8x128xf32>
    %251 = arith.mulf %219, %250 : vector<8x128xf32>
    %252 = arith.addf %220, %251 : vector<8x128xf32>
    %c0_96 = arith.constant 0 : index
    %c0_97 = arith.constant 0 : index
    %253 = vector.load %arg23[%c0_96, %c0_97] : memref<8x128xf32, #tpu.memory_space<vmem>>, vector<8x128xf32>
    tpu.vector_store %arg23[%c0_96, %c0_97], %252 {strides = array<i32>} : memref<8x128xf32, #tpu.memory_space<vmem>>, vector<8x128xf32>,
    %c6_i32 = arith.constant 6 : i32
    %254 = arith.index_cast %c6_i32 : i32 to index
    %c0_98 = arith.constant 0 : index
    %c0_99 = arith.constant 0 : index
    %255 = vector.load %arg24[%254, %c0_98, %c0_99] : memref<8x8x384xf32, #tpu.memory_space<vmem>>, vector<1x8x384xf32>
    %256 = vector.shape_cast %255 : vector<1x8x384xf32> to vector<8x384xf32>
    %257 = arith.index_cast %c6_i32 : i32 to index
    %c0_100 = arith.constant 0 : index
    %c0_101 = arith.constant 0 : index
    %258 = vector.load %arg2[%257, %c0_100, %c0_101] : memref<8x8x128xf32, #tpu.memory_space<vmem>>, vector<1x8x128xf32>
    %259 = vector.shape_cast %258 : vector<1x8x128xf32> to vector<8x128xf32>
    %c0_102 = arith.constant 0 : index
    %c0_103 = arith.constant 0 : index
    %260 = vector.load %arg23[%c0_102, %c0_103] : memref<8x128xf32, #tpu.memory_space<vmem>>, vector<8x128xf32>
    %c0_104 = arith.constant 0 : index
    %c0_105 = arith.constant 0 : index
    %261 = vector.load %arg6[%c0_104, %c0_105] : memref<128x384xf32, #tpu.memory_space<vmem>>, vector<128x384xf32>
    %cst_106 = arith.constant dense<0.000000e+00> : vector<8x384xf32>
    %262 = tpu.matmul %260, %261, %cst_106 {dimension_numbers = #tpu.dot_dimension_numbers<[1], [0], [0], [1], [0, 0, 1, 1], [], []>} : vector<8x128xf32>, vector<128x384xf32>, vector<8x384xf32> -> vector<8x384xf32>
    %263 = vector.extract_strided_slice %256 {offsets = [0, 0], sizes = [8, 128], strides = [1, 1]} : vector<8x384xf32> to vector<8x128xf32>
    %264 = vector.extract_strided_slice %262 {offsets = [0, 0], sizes = [8, 128], strides = [1, 1]} : vector<8x384xf32> to vector<8x128xf32>
    %265 = arith.addf %263, %264 : vector<8x128xf32>
    %266 = arith.negf %265 : vector<8x128xf32>
    %267 = math.exp %266 : vector<8x128xf32>
    %cst_107 = arith.constant 1.000000e+00 : f32
    %268 = vector.broadcast %cst_107 : f32 to vector<8x128xf32>
    %269 = arith.addf %268, %267 : vector<8x128xf32>
    %270 = arith.divf %268, %269 : vector<8x128xf32>
    %271 = vector.extract_strided_slice %256 {offsets = [0, 128], sizes = [8, 128], strides = [1, 1]} : vector<8x384xf32> to vector<8x128xf32>
    %272 = vector.extract_strided_slice %262 {offsets = [0, 128], sizes = [8, 128], strides = [1, 1]} : vector<8x384xf32> to vector<8x128xf32>
    %273 = arith.addf %271, %272 : vector<8x128xf32>
    %274 = arith.negf %273 : vector<8x128xf32>
    %275 = math.exp %274 : vector<8x128xf32>
    %cst_108 = arith.constant 1.000000e+00 : f32
    %276 = vector.broadcast %cst_108 : f32 to vector<8x128xf32>
    %277 = arith.addf %276, %275 : vector<8x128xf32>
    %278 = arith.divf %276, %277 : vector<8x128xf32>
    %279 = vector.extract_strided_slice %256 {offsets = [0, 256], sizes = [8, 128], strides = [1, 1]} : vector<8x384xf32> to vector<8x128xf32>
    %280 = vector.extract_strided_slice %262 {offsets = [0, 256], sizes = [8, 128], strides = [1, 1]} : vector<8x384xf32> to vector<8x128xf32>
    %281 = arith.addf %280, %12 : vector<8x128xf32>
    %282 = arith.mulf %270, %281 : vector<8x128xf32>
    %283 = arith.addf %279, %282 : vector<8x128xf32>
    %284 = math.tanh %283 : vector<8x128xf32>
    %cst_109 = arith.constant 1.000000e+00 : f32
    %285 = vector.broadcast %cst_109 : f32 to vector<8x128xf32>
    %286 = arith.subf %285, %278 : vector<8x128xf32>
    %287 = arith.subf %284, %260 : vector<8x128xf32>
    %288 = arith.mulf %286, %287 : vector<8x128xf32>
    %289 = arith.addf %260, %288 : vector<8x128xf32>
    %290 = arith.subf %289, %260 : vector<8x128xf32>
    %291 = arith.mulf %259, %290 : vector<8x128xf32>
    %292 = arith.addf %260, %291 : vector<8x128xf32>
    %c0_110 = arith.constant 0 : index
    %c0_111 = arith.constant 0 : index
    %293 = vector.load %arg23[%c0_110, %c0_111] : memref<8x128xf32, #tpu.memory_space<vmem>>, vector<8x128xf32>
    tpu.vector_store %arg23[%c0_110, %c0_111], %292 {strides = array<i32>} : memref<8x128xf32, #tpu.memory_space<vmem>>, vector<8x128xf32>,
    %c7_i32 = arith.constant 7 : i32
    %294 = arith.index_cast %c7_i32 : i32 to index
    %c0_112 = arith.constant 0 : index
    %c0_113 = arith.constant 0 : index
    %295 = vector.load %arg24[%294, %c0_112, %c0_113] : memref<8x8x384xf32, #tpu.memory_space<vmem>>, vector<1x8x384xf32>
    %296 = vector.shape_cast %295 : vector<1x8x384xf32> to vector<8x384xf32>
    %297 = arith.index_cast %c7_i32 : i32 to index
    %c0_114 = arith.constant 0 : index
    %c0_115 = arith.constant 0 : index
    %298 = vector.load %arg2[%297, %c0_114, %c0_115] : memref<8x8x128xf32, #tpu.memory_space<vmem>>, vector<1x8x128xf32>
    %299 = vector.shape_cast %298 : vector<1x8x128xf32> to vector<8x128xf32>
    %c0_116 = arith.constant 0 : index
    %c0_117 = arith.constant 0 : index
    %300 = vector.load %arg23[%c0_116, %c0_117] : memref<8x128xf32, #tpu.memory_space<vmem>>, vector<8x128xf32>
    %c0_118 = arith.constant 0 : index
    %c0_119 = arith.constant 0 : index
    %301 = vector.load %arg6[%c0_118, %c0_119] : memref<128x384xf32, #tpu.memory_space<vmem>>, vector<128x384xf32>
    %cst_120 = arith.constant dense<0.000000e+00> : vector<8x384xf32>
    %302 = tpu.matmul %300, %301, %cst_120 {dimension_numbers = #tpu.dot_dimension_numbers<[1], [0], [0], [1], [0, 0, 1, 1], [], []>} : vector<8x128xf32>, vector<128x384xf32>, vector<8x384xf32> -> vector<8x384xf32>
    %303 = vector.extract_strided_slice %296 {offsets = [0, 0], sizes = [8, 128], strides = [1, 1]} : vector<8x384xf32> to vector<8x128xf32>
    %304 = vector.extract_strided_slice %302 {offsets = [0, 0], sizes = [8, 128], strides = [1, 1]} : vector<8x384xf32> to vector<8x128xf32>
    %305 = arith.addf %303, %304 : vector<8x128xf32>
    %306 = arith.negf %305 : vector<8x128xf32>
    %307 = math.exp %306 : vector<8x128xf32>
    %cst_121 = arith.constant 1.000000e+00 : f32
    %308 = vector.broadcast %cst_121 : f32 to vector<8x128xf32>
    %309 = arith.addf %308, %307 : vector<8x128xf32>
    %310 = arith.divf %308, %309 : vector<8x128xf32>
    %311 = vector.extract_strided_slice %296 {offsets = [0, 128], sizes = [8, 128], strides = [1, 1]} : vector<8x384xf32> to vector<8x128xf32>
    %312 = vector.extract_strided_slice %302 {offsets = [0, 128], sizes = [8, 128], strides = [1, 1]} : vector<8x384xf32> to vector<8x128xf32>
    %313 = arith.addf %311, %312 : vector<8x128xf32>
    %314 = arith.negf %313 : vector<8x128xf32>
    %315 = math.exp %314 : vector<8x128xf32>
    %cst_122 = arith.constant 1.000000e+00 : f32
    %316 = vector.broadcast %cst_122 : f32 to vector<8x128xf32>
    %317 = arith.addf %316, %315 : vector<8x128xf32>
    %318 = arith.divf %316, %317 : vector<8x128xf32>
    %319 = vector.extract_strided_slice %296 {offsets = [0, 256], sizes = [8, 128], strides = [1, 1]} : vector<8x384xf32> to vector<8x128xf32>
    %320 = vector.extract_strided_slice %302 {offsets = [0, 256], sizes = [8, 128], strides = [1, 1]} : vector<8x384xf32> to vector<8x128xf32>
    %321 = arith.addf %320, %12 : vector<8x128xf32>
    %322 = arith.mulf %310, %321 : vector<8x128xf32>
    %323 = arith.addf %319, %322 : vector<8x128xf32>
    %324 = math.tanh %323 : vector<8x128xf32>
    %cst_123 = arith.constant 1.000000e+00 : f32
    %325 = vector.broadcast %cst_123 : f32 to vector<8x128xf32>
    %326 = arith.subf %325, %318 : vector<8x128xf32>
    %327 = arith.subf %324, %300 : vector<8x128xf32>
    %328 = arith.mulf %326, %327 : vector<8x128xf32>
    %329 = arith.addf %300, %328 : vector<8x128xf32>
    %330 = arith.subf %329, %300 : vector<8x128xf32>
    %331 = arith.mulf %299, %330 : vector<8x128xf32>
    %332 = arith.addf %300, %331 : vector<8x128xf32>
    %c0_124 = arith.constant 0 : index
    %c0_125 = arith.constant 0 : index
    %333 = vector.load %arg23[%c0_124, %c0_125] : memref<8x128xf32, #tpu.memory_space<vmem>>, vector<8x128xf32>
    tpu.vector_store %arg23[%c0_124, %c0_125], %332 {strides = array<i32>} : memref<8x128xf32, #tpu.memory_space<vmem>>, vector<8x128xf32>,
    %c8_i32 = arith.constant 8 : i32
    %c0_126 = arith.constant 0 : index
    %c0_127 = arith.constant 0 : index
    %334 = vector.load %arg23[%c0_126, %c0_127] : memref<8x128xf32, #tpu.memory_space<vmem>>, vector<8x128xf32>
    %c0_128 = arith.constant 0 : index
    %c0_129 = arith.constant 0 : index
    %335 = vector.load %arg13[%c0_128, %c0_129] : memref<128x64xf32, #tpu.memory_space<vmem>>, vector<128x64xf32>
    %cst_130 = arith.constant dense<0.000000e+00> : vector<8x64xf32>
    %336 = tpu.matmul %334, %335, %cst_130 {dimension_numbers = #tpu.dot_dimension_numbers<[1], [0], [0], [1], [0, 0, 1, 1], [], []>} : vector<8x128xf32>, vector<128x64xf32>, vector<8x64xf32> -> vector<8x64xf32>
    %c0_131 = arith.constant 0 : index
    %c0_132 = arith.constant 0 : index
    %337 = vector.load %arg14[%c0_131, %c0_132] : memref<1x64xf32, #tpu.memory_space<vmem>>, vector<1x64xf32>
    %338 = vector.broadcast %337 : vector<1x64xf32> to vector<8x64xf32>
    %339 = arith.addf %336, %338 : vector<8x64xf32>
    %340 = vector.extract_strided_slice %339 {offsets = [0, 0], sizes = [8, 32], strides = [1, 1]} : vector<8x64xf32> to vector<8x32xf32>
    %341 = vector.extract_strided_slice %339 {offsets = [0, 32], sizes = [8, 32], strides = [1, 1]} : vector<8x64xf32> to vector<8x32xf32>
    %c0_133 = arith.constant 0 : index
    %c0_134 = arith.constant 0 : index
    %342 = vector.load %arg4[%c0_133, %c0_134] : memref<8x32xf32, #tpu.memory_space<vmem>>, vector<8x32xf32>
    %cst_135 = arith.constant 5.000000e-01 : f32
    %343 = vector.broadcast %cst_135 : f32 to vector<8x32xf32>
    %344 = arith.mulf %343, %341 : vector<8x32xf32>
    %345 = math.exp %344 : vector<8x32xf32>
    %346 = arith.mulf %342, %345 : vector<8x32xf32>
    %347 = arith.addf %346, %340 : vector<8x32xf32>
    %c0_136 = arith.constant 0 : index
    %c0_137 = arith.constant 0 : index
    %348 = vector.load %arg3[%c0_136, %c0_137] : memref<8x96xf32, #tpu.memory_space<vmem>>, vector<8x96xf32>
    %349 = tpu.concatenate %347, %348 in 1 : vector<8x32xf32>, vector<8x96xf32> -> vector<8x128xf32>
    %c0_138 = arith.constant 0 : index
    %c0_139 = arith.constant 0 : index
    %350 = vector.load %arg15[%c0_138, %c0_139] : memref<128x128xf32, #tpu.memory_space<vmem>>, vector<128x128xf32>
    %cst_140 = arith.constant dense<0.000000e+00> : vector<8x128xf32>
    %351 = tpu.matmul %349, %350, %cst_140 {dimension_numbers = #tpu.dot_dimension_numbers<[1], [0], [0], [1], [0, 0, 1, 1], [], []>} : vector<8x128xf32>, vector<128x128xf32>, vector<8x128xf32> -> vector<8x128xf32>
    %c0_141 = arith.constant 0 : index
    %c0_142 = arith.constant 0 : index
    %352 = vector.load %arg16[%c0_141, %c0_142] : memref<1x128xf32, #tpu.memory_space<vmem>>, vector<1x128xf32>
    %353 = vector.broadcast %352 : vector<1x128xf32> to vector<8x128xf32>
    %354 = arith.addf %351, %353 : vector<8x128xf32>
    %c0_143 = arith.constant 0 : index
    %c0_144 = arith.constant 0 : index
    %355 = vector.load %arg20[%c0_143, %c0_144] : memref<8x32xf32, #tpu.memory_space<vmem>>, vector<8x32xf32>
    tpu.vector_store %arg20[%c0_143, %c0_144], %340 {strides = array<i32>} : memref<8x32xf32, #tpu.memory_space<vmem>>, vector<8x32xf32>,
    %c0_145 = arith.constant 0 : index
    %c0_146 = arith.constant 0 : index
    %356 = vector.load %arg21[%c0_145, %c0_146] : memref<8x32xf32, #tpu.memory_space<vmem>>, vector<8x32xf32>
    tpu.vector_store %arg21[%c0_145, %c0_146], %341 {strides = array<i32>} : memref<8x32xf32, #tpu.memory_space<vmem>>, vector<8x32xf32>,
    %c0_147 = arith.constant 0 : index
    %c0_148 = arith.constant 0 : index
    %357 = vector.load %arg22[%c0_147, %c0_148] : memref<8x128xf32, #tpu.memory_space<vmem>>, vector<8x128xf32>
    tpu.vector_store %arg22[%c0_147, %c0_148], %349 {strides = array<i32>} : memref<8x128xf32, #tpu.memory_space<vmem>>, vector<8x128xf32>,
    %c0_149 = arith.constant 0 : index
    %c0_150 = arith.constant 0 : index
    %358 = vector.load %arg9[%c0_149, %c0_150] : memref<64x384xf32, #tpu.memory_space<vmem>>, vector<64x384xf32>
    %cst_151 = arith.constant dense<0.000000e+00> : vector<64x384xf32>
    %359 = tpu.matmul %1, %358, %cst_151 {dimension_numbers = #tpu.dot_dimension_numbers<[1], [0], [0], [1], [0, 0, 1, 1], [], []>} : vector<64x64xf32>, vector<64x384xf32>, vector<64x384xf32> -> vector<64x384xf32>
    %c0_152 = arith.constant 0 : index
    %c0_153 = arith.constant 0 : index
    %360 = vector.load %arg11[%c0_152, %c0_153] : memref<1x384xf32, #tpu.memory_space<vmem>>, vector<1x384xf32>
    %361 = vector.broadcast %360 : vector<1x384xf32> to vector<64x384xf32>
    %362 = arith.addf %359, %361 : vector<64x384xf32>
    %363 = vector.shape_cast %362 : vector<64x384xf32> to vector<8x8x384xf32>
    %c0_154 = arith.constant 0 : index
    %c0_155 = arith.constant 0 : index
    %c0_156 = arith.constant 0 : index
    %364 = vector.load %arg24[%c0_154, %c0_155, %c0_156] : memref<8x8x384xf32, #tpu.memory_space<vmem>>, vector<8x8x384xf32>
    tpu.vector_store %arg24[%c0_154, %c0_155, %c0_156], %363 {strides = array<i32>} : memref<8x8x384xf32, #tpu.memory_space<vmem>>, vector<8x8x384xf32>,
    %c0_157 = arith.constant 0 : index
    %c0_158 = arith.constant 0 : index
    %365 = vector.load %arg12[%c0_157, %c0_158] : memref<1x128xf32, #tpu.memory_space<vmem>>, vector<1x128xf32>
    %366 = vector.shape_cast %365 : vector<1x128xf32> to vector<1x128xf32>
    %367 = vector.broadcast %366 : vector<1x128xf32> to vector<8x128xf32>
    %c0_159 = arith.constant 0 : index
    %c0_160 = arith.constant 0 : index
    %368 = vector.load %arg23[%c0_159, %c0_160] : memref<8x128xf32, #tpu.memory_space<vmem>>, vector<8x128xf32>
    tpu.vector_store %arg23[%c0_159, %c0_160], %354 {strides = array<i32>} : memref<8x128xf32, #tpu.memory_space<vmem>>, vector<8x128xf32>,
    %c0_i32_161 = arith.constant 0 : i32
    %369 = arith.index_cast %c0_i32_161 : i32 to index
    %c0_162 = arith.constant 0 : index
    %c0_163 = arith.constant 0 : index
    %370 = vector.load %arg24[%369, %c0_162, %c0_163] : memref<8x8x384xf32, #tpu.memory_space<vmem>>, vector<1x8x384xf32>
    %371 = vector.shape_cast %370 : vector<1x8x384xf32> to vector<8x384xf32>
    %372 = arith.index_cast %c0_i32_161 : i32 to index
    %c0_164 = arith.constant 0 : index
    %c0_165 = arith.constant 0 : index
    %373 = vector.load %arg2[%372, %c0_164, %c0_165] : memref<8x8x128xf32, #tpu.memory_space<vmem>>, vector<1x8x128xf32>
    %374 = vector.shape_cast %373 : vector<1x8x128xf32> to vector<8x128xf32>
    %c0_166 = arith.constant 0 : index
    %c0_167 = arith.constant 0 : index
    %375 = vector.load %arg23[%c0_166, %c0_167] : memref<8x128xf32, #tpu.memory_space<vmem>>, vector<8x128xf32>
    %c0_168 = arith.constant 0 : index
    %c0_169 = arith.constant 0 : index
    %376 = vector.load %arg10[%c0_168, %c0_169] : memref<128x384xf32, #tpu.memory_space<vmem>>, vector<128x384xf32>
    %cst_170 = arith.constant dense<0.000000e+00> : vector<8x384xf32>
    %377 = tpu.matmul %375, %376, %cst_170 {dimension_numbers = #tpu.dot_dimension_numbers<[1], [0], [0], [1], [0, 0, 1, 1], [], []>} : vector<8x128xf32>, vector<128x384xf32>, vector<8x384xf32> -> vector<8x384xf32>
    %378 = vector.extract_strided_slice %371 {offsets = [0, 0], sizes = [8, 128], strides = [1, 1]} : vector<8x384xf32> to vector<8x128xf32>
    %379 = vector.extract_strided_slice %377 {offsets = [0, 0], sizes = [8, 128], strides = [1, 1]} : vector<8x384xf32> to vector<8x128xf32>
    %380 = arith.addf %378, %379 : vector<8x128xf32>
    %381 = arith.negf %380 : vector<8x128xf32>
    %382 = math.exp %381 : vector<8x128xf32>
    %cst_171 = arith.constant 1.000000e+00 : f32
    %383 = vector.broadcast %cst_171 : f32 to vector<8x128xf32>
    %384 = arith.addf %383, %382 : vector<8x128xf32>
    %385 = arith.divf %383, %384 : vector<8x128xf32>
    %386 = vector.extract_strided_slice %371 {offsets = [0, 128], sizes = [8, 128], strides = [1, 1]} : vector<8x384xf32> to vector<8x128xf32>
    %387 = vector.extract_strided_slice %377 {offsets = [0, 128], sizes = [8, 128], strides = [1, 1]} : vector<8x384xf32> to vector<8x128xf32>
    %388 = arith.addf %386, %387 : vector<8x128xf32>
    %389 = arith.negf %388 : vector<8x128xf32>
    %390 = math.exp %389 : vector<8x128xf32>
    %cst_172 = arith.constant 1.000000e+00 : f32
    %391 = vector.broadcast %cst_172 : f32 to vector<8x128xf32>
    %392 = arith.addf %391, %390 : vector<8x128xf32>
    %393 = arith.divf %391, %392 : vector<8x128xf32>
    %394 = vector.extract_strided_slice %371 {offsets = [0, 256], sizes = [8, 128], strides = [1, 1]} : vector<8x384xf32> to vector<8x128xf32>
    %395 = vector.extract_strided_slice %377 {offsets = [0, 256], sizes = [8, 128], strides = [1, 1]} : vector<8x384xf32> to vector<8x128xf32>
    %396 = arith.addf %395, %367 : vector<8x128xf32>
    %397 = arith.mulf %385, %396 : vector<8x128xf32>
    %398 = arith.addf %394, %397 : vector<8x128xf32>
    %399 = math.tanh %398 : vector<8x128xf32>
    %cst_173 = arith.constant 1.000000e+00 : f32
    %400 = vector.broadcast %cst_173 : f32 to vector<8x128xf32>
    %401 = arith.subf %400, %393 : vector<8x128xf32>
    %402 = arith.subf %399, %375 : vector<8x128xf32>
    %403 = arith.mulf %401, %402 : vector<8x128xf32>
    %404 = arith.addf %375, %403 : vector<8x128xf32>
    %405 = arith.subf %404, %375 : vector<8x128xf32>
    %406 = arith.mulf %374, %405 : vector<8x128xf32>
    %407 = arith.addf %375, %406 : vector<8x128xf32>
    %c0_174 = arith.constant 0 : index
    %c0_175 = arith.constant 0 : index
    %408 = vector.load %arg23[%c0_174, %c0_175] : memref<8x128xf32, #tpu.memory_space<vmem>>, vector<8x128xf32>
    tpu.vector_store %arg23[%c0_174, %c0_175], %407 {strides = array<i32>} : memref<8x128xf32, #tpu.memory_space<vmem>>, vector<8x128xf32>,
    %409 = arith.mulf %374, %404 : vector<8x128xf32>
    %410 = arith.index_cast %c0_i32_161 : i32 to index
    %c0_176 = arith.constant 0 : index
    %c0_177 = arith.constant 0 : index
    %411 = vector.load %arg25[%410, %c0_176, %c0_177] : memref<8x8x128xf32, #tpu.memory_space<vmem>>, vector<1x8x128xf32>
    %412 = vector.shape_cast %411 : vector<1x8x128xf32> to vector<8x128xf32>
    %413 = vector.shape_cast %409 : vector<8x128xf32> to vector<1x8x128xf32>
    tpu.vector_store %arg25[%410, %c0_176, %c0_177], %413 {strides = array<i32>} : memref<8x8x128xf32, #tpu.memory_space<vmem>>, vector<1x8x128xf32>,
    %c1_i32_178 = arith.constant 1 : i32
    %414 = arith.index_cast %c1_i32_178 : i32 to index
    %c0_179 = arith.constant 0 : index
    %c0_180 = arith.constant 0 : index
    %415 = vector.load %arg24[%414, %c0_179, %c0_180] : memref<8x8x384xf32, #tpu.memory_space<vmem>>, vector<1x8x384xf32>
    %416 = vector.shape_cast %415 : vector<1x8x384xf32> to vector<8x384xf32>
    %417 = arith.index_cast %c1_i32_178 : i32 to index
    %c0_181 = arith.constant 0 : index
    %c0_182 = arith.constant 0 : index
    %418 = vector.load %arg2[%417, %c0_181, %c0_182] : memref<8x8x128xf32, #tpu.memory_space<vmem>>, vector<1x8x128xf32>
    %419 = vector.shape_cast %418 : vector<1x8x128xf32> to vector<8x128xf32>
    %c0_183 = arith.constant 0 : index
    %c0_184 = arith.constant 0 : index
    %420 = vector.load %arg23[%c0_183, %c0_184] : memref<8x128xf32, #tpu.memory_space<vmem>>, vector<8x128xf32>
    %c0_185 = arith.constant 0 : index
    %c0_186 = arith.constant 0 : index
    %421 = vector.load %arg10[%c0_185, %c0_186] : memref<128x384xf32, #tpu.memory_space<vmem>>, vector<128x384xf32>
    %cst_187 = arith.constant dense<0.000000e+00> : vector<8x384xf32>
    %422 = tpu.matmul %420, %421, %cst_187 {dimension_numbers = #tpu.dot_dimension_numbers<[1], [0], [0], [1], [0, 0, 1, 1], [], []>} : vector<8x128xf32>, vector<128x384xf32>, vector<8x384xf32> -> vector<8x384xf32>
    %423 = vector.extract_strided_slice %416 {offsets = [0, 0], sizes = [8, 128], strides = [1, 1]} : vector<8x384xf32> to vector<8x128xf32>
    %424 = vector.extract_strided_slice %422 {offsets = [0, 0], sizes = [8, 128], strides = [1, 1]} : vector<8x384xf32> to vector<8x128xf32>
    %425 = arith.addf %423, %424 : vector<8x128xf32>
    %426 = arith.negf %425 : vector<8x128xf32>
    %427 = math.exp %426 : vector<8x128xf32>
    %cst_188 = arith.constant 1.000000e+00 : f32
    %428 = vector.broadcast %cst_188 : f32 to vector<8x128xf32>
    %429 = arith.addf %428, %427 : vector<8x128xf32>
    %430 = arith.divf %428, %429 : vector<8x128xf32>
    %431 = vector.extract_strided_slice %416 {offsets = [0, 128], sizes = [8, 128], strides = [1, 1]} : vector<8x384xf32> to vector<8x128xf32>
    %432 = vector.extract_strided_slice %422 {offsets = [0, 128], sizes = [8, 128], strides = [1, 1]} : vector<8x384xf32> to vector<8x128xf32>
    %433 = arith.addf %431, %432 : vector<8x128xf32>
    %434 = arith.negf %433 : vector<8x128xf32>
    %435 = math.exp %434 : vector<8x128xf32>
    %cst_189 = arith.constant 1.000000e+00 : f32
    %436 = vector.broadcast %cst_189 : f32 to vector<8x128xf32>
    %437 = arith.addf %436, %435 : vector<8x128xf32>
    %438 = arith.divf %436, %437 : vector<8x128xf32>
    %439 = vector.extract_strided_slice %416 {offsets = [0, 256], sizes = [8, 128], strides = [1, 1]} : vector<8x384xf32> to vector<8x128xf32>
    %440 = vector.extract_strided_slice %422 {offsets = [0, 256], sizes = [8, 128], strides = [1, 1]} : vector<8x384xf32> to vector<8x128xf32>
    %441 = arith.addf %440, %367 : vector<8x128xf32>
    %442 = arith.mulf %430, %441 : vector<8x128xf32>
    %443 = arith.addf %439, %442 : vector<8x128xf32>
    %444 = math.tanh %443 : vector<8x128xf32>
    %cst_190 = arith.constant 1.000000e+00 : f32
    %445 = vector.broadcast %cst_190 : f32 to vector<8x128xf32>
    %446 = arith.subf %445, %438 : vector<8x128xf32>
    %447 = arith.subf %444, %420 : vector<8x128xf32>
    %448 = arith.mulf %446, %447 : vector<8x128xf32>
    %449 = arith.addf %420, %448 : vector<8x128xf32>
    %450 = arith.subf %449, %420 : vector<8x128xf32>
    %451 = arith.mulf %419, %450 : vector<8x128xf32>
    %452 = arith.addf %420, %451 : vector<8x128xf32>
    %c0_191 = arith.constant 0 : index
    %c0_192 = arith.constant 0 : index
    %453 = vector.load %arg23[%c0_191, %c0_192] : memref<8x128xf32, #tpu.memory_space<vmem>>, vector<8x128xf32>
    tpu.vector_store %arg23[%c0_191, %c0_192], %452 {strides = array<i32>} : memref<8x128xf32, #tpu.memory_space<vmem>>, vector<8x128xf32>,
    %454 = arith.mulf %419, %449 : vector<8x128xf32>
    %455 = arith.index_cast %c1_i32_178 : i32 to index
    %c0_193 = arith.constant 0 : index
    %c0_194 = arith.constant 0 : index
    %456 = vector.load %arg25[%455, %c0_193, %c0_194] : memref<8x8x128xf32, #tpu.memory_space<vmem>>, vector<1x8x128xf32>
    %457 = vector.shape_cast %456 : vector<1x8x128xf32> to vector<8x128xf32>
    %458 = vector.shape_cast %454 : vector<8x128xf32> to vector<1x8x128xf32>
    tpu.vector_store %arg25[%455, %c0_193, %c0_194], %458 {strides = array<i32>} : memref<8x8x128xf32, #tpu.memory_space<vmem>>, vector<1x8x128xf32>,
    %c2_i32_195 = arith.constant 2 : i32
    %459 = arith.index_cast %c2_i32_195 : i32 to index
    %c0_196 = arith.constant 0 : index
    %c0_197 = arith.constant 0 : index
    %460 = vector.load %arg24[%459, %c0_196, %c0_197] : memref<8x8x384xf32, #tpu.memory_space<vmem>>, vector<1x8x384xf32>
    %461 = vector.shape_cast %460 : vector<1x8x384xf32> to vector<8x384xf32>
    %462 = arith.index_cast %c2_i32_195 : i32 to index
    %c0_198 = arith.constant 0 : index
    %c0_199 = arith.constant 0 : index
    %463 = vector.load %arg2[%462, %c0_198, %c0_199] : memref<8x8x128xf32, #tpu.memory_space<vmem>>, vector<1x8x128xf32>
    %464 = vector.shape_cast %463 : vector<1x8x128xf32> to vector<8x128xf32>
    %c0_200 = arith.constant 0 : index
    %c0_201 = arith.constant 0 : index
    %465 = vector.load %arg23[%c0_200, %c0_201] : memref<8x128xf32, #tpu.memory_space<vmem>>, vector<8x128xf32>
    %c0_202 = arith.constant 0 : index
    %c0_203 = arith.constant 0 : index
    %466 = vector.load %arg10[%c0_202, %c0_203] : memref<128x384xf32, #tpu.memory_space<vmem>>, vector<128x384xf32>
    %cst_204 = arith.constant dense<0.000000e+00> : vector<8x384xf32>
    %467 = tpu.matmul %465, %466, %cst_204 {dimension_numbers = #tpu.dot_dimension_numbers<[1], [0], [0], [1], [0, 0, 1, 1], [], []>} : vector<8x128xf32>, vector<128x384xf32>, vector<8x384xf32> -> vector<8x384xf32>
    %468 = vector.extract_strided_slice %461 {offsets = [0, 0], sizes = [8, 128], strides = [1, 1]} : vector<8x384xf32> to vector<8x128xf32>
    %469 = vector.extract_strided_slice %467 {offsets = [0, 0], sizes = [8, 128], strides = [1, 1]} : vector<8x384xf32> to vector<8x128xf32>
    %470 = arith.addf %468, %469 : vector<8x128xf32>
    %471 = arith.negf %470 : vector<8x128xf32>
    %472 = math.exp %471 : vector<8x128xf32>
    %cst_205 = arith.constant 1.000000e+00 : f32
    %473 = vector.broadcast %cst_205 : f32 to vector<8x128xf32>
    %474 = arith.addf %473, %472 : vector<8x128xf32>
    %475 = arith.divf %473, %474 : vector<8x128xf32>
    %476 = vector.extract_strided_slice %461 {offsets = [0, 128], sizes = [8, 128], strides = [1, 1]} : vector<8x384xf32> to vector<8x128xf32>
    %477 = vector.extract_strided_slice %467 {offsets = [0, 128], sizes = [8, 128], strides = [1, 1]} : vector<8x384xf32> to vector<8x128xf32>
    %478 = arith.addf %476, %477 : vector<8x128xf32>
    %479 = arith.negf %478 : vector<8x128xf32>
    %480 = math.exp %479 : vector<8x128xf32>
    %cst_206 = arith.constant 1.000000e+00 : f32
    %481 = vector.broadcast %cst_206 : f32 to vector<8x128xf32>
    %482 = arith.addf %481, %480 : vector<8x128xf32>
    %483 = arith.divf %481, %482 : vector<8x128xf32>
    %484 = vector.extract_strided_slice %461 {offsets = [0, 256], sizes = [8, 128], strides = [1, 1]} : vector<8x384xf32> to vector<8x128xf32>
    %485 = vector.extract_strided_slice %467 {offsets = [0, 256], sizes = [8, 128], strides = [1, 1]} : vector<8x384xf32> to vector<8x128xf32>
    %486 = arith.addf %485, %367 : vector<8x128xf32>
    %487 = arith.mulf %475, %486 : vector<8x128xf32>
    %488 = arith.addf %484, %487 : vector<8x128xf32>
    %489 = math.tanh %488 : vector<8x128xf32>
    %cst_207 = arith.constant 1.000000e+00 : f32
    %490 = vector.broadcast %cst_207 : f32 to vector<8x128xf32>
    %491 = arith.subf %490, %483 : vector<8x128xf32>
    %492 = arith.subf %489, %465 : vector<8x128xf32>
    %493 = arith.mulf %491, %492 : vector<8x128xf32>
    %494 = arith.addf %465, %493 : vector<8x128xf32>
    %495 = arith.subf %494, %465 : vector<8x128xf32>
    %496 = arith.mulf %464, %495 : vector<8x128xf32>
    %497 = arith.addf %465, %496 : vector<8x128xf32>
    %c0_208 = arith.constant 0 : index
    %c0_209 = arith.constant 0 : index
    %498 = vector.load %arg23[%c0_208, %c0_209] : memref<8x128xf32, #tpu.memory_space<vmem>>, vector<8x128xf32>
    tpu.vector_store %arg23[%c0_208, %c0_209], %497 {strides = array<i32>} : memref<8x128xf32, #tpu.memory_space<vmem>>, vector<8x128xf32>,
    %499 = arith.mulf %464, %494 : vector<8x128xf32>
    %500 = arith.index_cast %c2_i32_195 : i32 to index
    %c0_210 = arith.constant 0 : index
    %c0_211 = arith.constant 0 : index
    %501 = vector.load %arg25[%500, %c0_210, %c0_211] : memref<8x8x128xf32, #tpu.memory_space<vmem>>, vector<1x8x128xf32>
    %502 = vector.shape_cast %501 : vector<1x8x128xf32> to vector<8x128xf32>
    %503 = vector.shape_cast %499 : vector<8x128xf32> to vector<1x8x128xf32>
    tpu.vector_store %arg25[%500, %c0_210, %c0_211], %503 {strides = array<i32>} : memref<8x8x128xf32, #tpu.memory_space<vmem>>, vector<1x8x128xf32>,
    %c3_i32_212 = arith.constant 3 : i32
    %504 = arith.index_cast %c3_i32_212 : i32 to index
    %c0_213 = arith.constant 0 : index
    %c0_214 = arith.constant 0 : index
    %505 = vector.load %arg24[%504, %c0_213, %c0_214] : memref<8x8x384xf32, #tpu.memory_space<vmem>>, vector<1x8x384xf32>
    %506 = vector.shape_cast %505 : vector<1x8x384xf32> to vector<8x384xf32>
    %507 = arith.index_cast %c3_i32_212 : i32 to index
    %c0_215 = arith.constant 0 : index
    %c0_216 = arith.constant 0 : index
    %508 = vector.load %arg2[%507, %c0_215, %c0_216] : memref<8x8x128xf32, #tpu.memory_space<vmem>>, vector<1x8x128xf32>
    %509 = vector.shape_cast %508 : vector<1x8x128xf32> to vector<8x128xf32>
    %c0_217 = arith.constant 0 : index
    %c0_218 = arith.constant 0 : index
    %510 = vector.load %arg23[%c0_217, %c0_218] : memref<8x128xf32, #tpu.memory_space<vmem>>, vector<8x128xf32>
    %c0_219 = arith.constant 0 : index
    %c0_220 = arith.constant 0 : index
    %511 = vector.load %arg10[%c0_219, %c0_220] : memref<128x384xf32, #tpu.memory_space<vmem>>, vector<128x384xf32>
    %cst_221 = arith.constant dense<0.000000e+00> : vector<8x384xf32>
    %512 = tpu.matmul %510, %511, %cst_221 {dimension_numbers = #tpu.dot_dimension_numbers<[1], [0], [0], [1], [0, 0, 1, 1], [], []>} : vector<8x128xf32>, vector<128x384xf32>, vector<8x384xf32> -> vector<8x384xf32>
    %513 = vector.extract_strided_slice %506 {offsets = [0, 0], sizes = [8, 128], strides = [1, 1]} : vector<8x384xf32> to vector<8x128xf32>
    %514 = vector.extract_strided_slice %512 {offsets = [0, 0], sizes = [8, 128], strides = [1, 1]} : vector<8x384xf32> to vector<8x128xf32>
    %515 = arith.addf %513, %514 : vector<8x128xf32>
    %516 = arith.negf %515 : vector<8x128xf32>
    %517 = math.exp %516 : vector<8x128xf32>
    %cst_222 = arith.constant 1.000000e+00 : f32
    %518 = vector.broadcast %cst_222 : f32 to vector<8x128xf32>
    %519 = arith.addf %518, %517 : vector<8x128xf32>
    %520 = arith.divf %518, %519 : vector<8x128xf32>
    %521 = vector.extract_strided_slice %506 {offsets = [0, 128], sizes = [8, 128], strides = [1, 1]} : vector<8x384xf32> to vector<8x128xf32>
    %522 = vector.extract_strided_slice %512 {offsets = [0, 128], sizes = [8, 128], strides = [1, 1]} : vector<8x384xf32> to vector<8x128xf32>
    %523 = arith.addf %521, %522 : vector<8x128xf32>
    %524 = arith.negf %523 : vector<8x128xf32>
    %525 = math.exp %524 : vector<8x128xf32>
    %cst_223 = arith.constant 1.000000e+00 : f32
    %526 = vector.broadcast %cst_223 : f32 to vector<8x128xf32>
    %527 = arith.addf %526, %525 : vector<8x128xf32>
    %528 = arith.divf %526, %527 : vector<8x128xf32>
    %529 = vector.extract_strided_slice %506 {offsets = [0, 256], sizes = [8, 128], strides = [1, 1]} : vector<8x384xf32> to vector<8x128xf32>
    %530 = vector.extract_strided_slice %512 {offsets = [0, 256], sizes = [8, 128], strides = [1, 1]} : vector<8x384xf32> to vector<8x128xf32>
    %531 = arith.addf %530, %367 : vector<8x128xf32>
    %532 = arith.mulf %520, %531 : vector<8x128xf32>
    %533 = arith.addf %529, %532 : vector<8x128xf32>
    %534 = math.tanh %533 : vector<8x128xf32>
    %cst_224 = arith.constant 1.000000e+00 : f32
    %535 = vector.broadcast %cst_224 : f32 to vector<8x128xf32>
    %536 = arith.subf %535, %528 : vector<8x128xf32>
    %537 = arith.subf %534, %510 : vector<8x128xf32>
    %538 = arith.mulf %536, %537 : vector<8x128xf32>
    %539 = arith.addf %510, %538 : vector<8x128xf32>
    %540 = arith.subf %539, %510 : vector<8x128xf32>
    %541 = arith.mulf %509, %540 : vector<8x128xf32>
    %542 = arith.addf %510, %541 : vector<8x128xf32>
    %c0_225 = arith.constant 0 : index
    %c0_226 = arith.constant 0 : index
    %543 = vector.load %arg23[%c0_225, %c0_226] : memref<8x128xf32, #tpu.memory_space<vmem>>, vector<8x128xf32>
    tpu.vector_store %arg23[%c0_225, %c0_226], %542 {strides = array<i32>} : memref<8x128xf32, #tpu.memory_space<vmem>>, vector<8x128xf32>,
    %544 = arith.mulf %509, %539 : vector<8x128xf32>
    %545 = arith.index_cast %c3_i32_212 : i32 to index
    %c0_227 = arith.constant 0 : index
    %c0_228 = arith.constant 0 : index
    %546 = vector.load %arg25[%545, %c0_227, %c0_228] : memref<8x8x128xf32, #tpu.memory_space<vmem>>, vector<1x8x128xf32>
    %547 = vector.shape_cast %546 : vector<1x8x128xf32> to vector<8x128xf32>
    %548 = vector.shape_cast %544 : vector<8x128xf32> to vector<1x8x128xf32>
    tpu.vector_store %arg25[%545, %c0_227, %c0_228], %548 {strides = array<i32>} : memref<8x8x128xf32, #tpu.memory_space<vmem>>, vector<1x8x128xf32>,
    %c4_i32_229 = arith.constant 4 : i32
    %549 = arith.index_cast %c4_i32_229 : i32 to index
    %c0_230 = arith.constant 0 : index
    %c0_231 = arith.constant 0 : index
    %550 = vector.load %arg24[%549, %c0_230, %c0_231] : memref<8x8x384xf32, #tpu.memory_space<vmem>>, vector<1x8x384xf32>
    %551 = vector.shape_cast %550 : vector<1x8x384xf32> to vector<8x384xf32>
    %552 = arith.index_cast %c4_i32_229 : i32 to index
    %c0_232 = arith.constant 0 : index
    %c0_233 = arith.constant 0 : index
    %553 = vector.load %arg2[%552, %c0_232, %c0_233] : memref<8x8x128xf32, #tpu.memory_space<vmem>>, vector<1x8x128xf32>
    %554 = vector.shape_cast %553 : vector<1x8x128xf32> to vector<8x128xf32>
    %c0_234 = arith.constant 0 : index
    %c0_235 = arith.constant 0 : index
    %555 = vector.load %arg23[%c0_234, %c0_235] : memref<8x128xf32, #tpu.memory_space<vmem>>, vector<8x128xf32>
    %c0_236 = arith.constant 0 : index
    %c0_237 = arith.constant 0 : index
    %556 = vector.load %arg10[%c0_236, %c0_237] : memref<128x384xf32, #tpu.memory_space<vmem>>, vector<128x384xf32>
    %cst_238 = arith.constant dense<0.000000e+00> : vector<8x384xf32>
    %557 = tpu.matmul %555, %556, %cst_238 {dimension_numbers = #tpu.dot_dimension_numbers<[1], [0], [0], [1], [0, 0, 1, 1], [], []>} : vector<8x128xf32>, vector<128x384xf32>, vector<8x384xf32> -> vector<8x384xf32>
    %558 = vector.extract_strided_slice %551 {offsets = [0, 0], sizes = [8, 128], strides = [1, 1]} : vector<8x384xf32> to vector<8x128xf32>
    %559 = vector.extract_strided_slice %557 {offsets = [0, 0], sizes = [8, 128], strides = [1, 1]} : vector<8x384xf32> to vector<8x128xf32>
    %560 = arith.addf %558, %559 : vector<8x128xf32>
    %561 = arith.negf %560 : vector<8x128xf32>
    %562 = math.exp %561 : vector<8x128xf32>
    %cst_239 = arith.constant 1.000000e+00 : f32
    %563 = vector.broadcast %cst_239 : f32 to vector<8x128xf32>
    %564 = arith.addf %563, %562 : vector<8x128xf32>
    %565 = arith.divf %563, %564 : vector<8x128xf32>
    %566 = vector.extract_strided_slice %551 {offsets = [0, 128], sizes = [8, 128], strides = [1, 1]} : vector<8x384xf32> to vector<8x128xf32>
    %567 = vector.extract_strided_slice %557 {offsets = [0, 128], sizes = [8, 128], strides = [1, 1]} : vector<8x384xf32> to vector<8x128xf32>
    %568 = arith.addf %566, %567 : vector<8x128xf32>
    %569 = arith.negf %568 : vector<8x128xf32>
    %570 = math.exp %569 : vector<8x128xf32>
    %cst_240 = arith.constant 1.000000e+00 : f32
    %571 = vector.broadcast %cst_240 : f32 to vector<8x128xf32>
    %572 = arith.addf %571, %570 : vector<8x128xf32>
    %573 = arith.divf %571, %572 : vector<8x128xf32>
    %574 = vector.extract_strided_slice %551 {offsets = [0, 256], sizes = [8, 128], strides = [1, 1]} : vector<8x384xf32> to vector<8x128xf32>
    %575 = vector.extract_strided_slice %557 {offsets = [0, 256], sizes = [8, 128], strides = [1, 1]} : vector<8x384xf32> to vector<8x128xf32>
    %576 = arith.addf %575, %367 : vector<8x128xf32>
    %577 = arith.mulf %565, %576 : vector<8x128xf32>
    %578 = arith.addf %574, %577 : vector<8x128xf32>
    %579 = math.tanh %578 : vector<8x128xf32>
    %cst_241 = arith.constant 1.000000e+00 : f32
    %580 = vector.broadcast %cst_241 : f32 to vector<8x128xf32>
    %581 = arith.subf %580, %573 : vector<8x128xf32>
    %582 = arith.subf %579, %555 : vector<8x128xf32>
    %583 = arith.mulf %581, %582 : vector<8x128xf32>
    %584 = arith.addf %555, %583 : vector<8x128xf32>
    %585 = arith.subf %584, %555 : vector<8x128xf32>
    %586 = arith.mulf %554, %585 : vector<8x128xf32>
    %587 = arith.addf %555, %586 : vector<8x128xf32>
    %c0_242 = arith.constant 0 : index
    %c0_243 = arith.constant 0 : index
    %588 = vector.load %arg23[%c0_242, %c0_243] : memref<8x128xf32, #tpu.memory_space<vmem>>, vector<8x128xf32>
    tpu.vector_store %arg23[%c0_242, %c0_243], %587 {strides = array<i32>} : memref<8x128xf32, #tpu.memory_space<vmem>>, vector<8x128xf32>,
    %589 = arith.mulf %554, %584 : vector<8x128xf32>
    %590 = arith.index_cast %c4_i32_229 : i32 to index
    %c0_244 = arith.constant 0 : index
    %c0_245 = arith.constant 0 : index
    %591 = vector.load %arg25[%590, %c0_244, %c0_245] : memref<8x8x128xf32, #tpu.memory_space<vmem>>, vector<1x8x128xf32>
    %592 = vector.shape_cast %591 : vector<1x8x128xf32> to vector<8x128xf32>
    %593 = vector.shape_cast %589 : vector<8x128xf32> to vector<1x8x128xf32>
    tpu.vector_store %arg25[%590, %c0_244, %c0_245], %593 {strides = array<i32>} : memref<8x8x128xf32, #tpu.memory_space<vmem>>, vector<1x8x128xf32>,
    %c5_i32_246 = arith.constant 5 : i32
    %594 = arith.index_cast %c5_i32_246 : i32 to index
    %c0_247 = arith.constant 0 : index
    %c0_248 = arith.constant 0 : index
    %595 = vector.load %arg24[%594, %c0_247, %c0_248] : memref<8x8x384xf32, #tpu.memory_space<vmem>>, vector<1x8x384xf32>
    %596 = vector.shape_cast %595 : vector<1x8x384xf32> to vector<8x384xf32>
    %597 = arith.index_cast %c5_i32_246 : i32 to index
    %c0_249 = arith.constant 0 : index
    %c0_250 = arith.constant 0 : index
    %598 = vector.load %arg2[%597, %c0_249, %c0_250] : memref<8x8x128xf32, #tpu.memory_space<vmem>>, vector<1x8x128xf32>
    %599 = vector.shape_cast %598 : vector<1x8x128xf32> to vector<8x128xf32>
    %c0_251 = arith.constant 0 : index
    %c0_252 = arith.constant 0 : index
    %600 = vector.load %arg23[%c0_251, %c0_252] : memref<8x128xf32, #tpu.memory_space<vmem>>, vector<8x128xf32>
    %c0_253 = arith.constant 0 : index
    %c0_254 = arith.constant 0 : index
    %601 = vector.load %arg10[%c0_253, %c0_254] : memref<128x384xf32, #tpu.memory_space<vmem>>, vector<128x384xf32>
    %cst_255 = arith.constant dense<0.000000e+00> : vector<8x384xf32>
    %602 = tpu.matmul %600, %601, %cst_255 {dimension_numbers = #tpu.dot_dimension_numbers<[1], [0], [0], [1], [0, 0, 1, 1], [], []>} : vector<8x128xf32>, vector<128x384xf32>, vector<8x384xf32> -> vector<8x384xf32>
    %603 = vector.extract_strided_slice %596 {offsets = [0, 0], sizes = [8, 128], strides = [1, 1]} : vector<8x384xf32> to vector<8x128xf32>
    %604 = vector.extract_strided_slice %602 {offsets = [0, 0], sizes = [8, 128], strides = [1, 1]} : vector<8x384xf32> to vector<8x128xf32>
    %605 = arith.addf %603, %604 : vector<8x128xf32>
    %606 = arith.negf %605 : vector<8x128xf32>
    %607 = math.exp %606 : vector<8x128xf32>
    %cst_256 = arith.constant 1.000000e+00 : f32
    %608 = vector.broadcast %cst_256 : f32 to vector<8x128xf32>
    %609 = arith.addf %608, %607 : vector<8x128xf32>
    %610 = arith.divf %608, %609 : vector<8x128xf32>
    %611 = vector.extract_strided_slice %596 {offsets = [0, 128], sizes = [8, 128], strides = [1, 1]} : vector<8x384xf32> to vector<8x128xf32>
    %612 = vector.extract_strided_slice %602 {offsets = [0, 128], sizes = [8, 128], strides = [1, 1]} : vector<8x384xf32> to vector<8x128xf32>
    %613 = arith.addf %611, %612 : vector<8x128xf32>
    %614 = arith.negf %613 : vector<8x128xf32>
    %615 = math.exp %614 : vector<8x128xf32>
    %cst_257 = arith.constant 1.000000e+00 : f32
    %616 = vector.broadcast %cst_257 : f32 to vector<8x128xf32>
    %617 = arith.addf %616, %615 : vector<8x128xf32>
    %618 = arith.divf %616, %617 : vector<8x128xf32>
    %619 = vector.extract_strided_slice %596 {offsets = [0, 256], sizes = [8, 128], strides = [1, 1]} : vector<8x384xf32> to vector<8x128xf32>
    %620 = vector.extract_strided_slice %602 {offsets = [0, 256], sizes = [8, 128], strides = [1, 1]} : vector<8x384xf32> to vector<8x128xf32>
    %621 = arith.addf %620, %367 : vector<8x128xf32>
    %622 = arith.mulf %610, %621 : vector<8x128xf32>
    %623 = arith.addf %619, %622 : vector<8x128xf32>
    %624 = math.tanh %623 : vector<8x128xf32>
    %cst_258 = arith.constant 1.000000e+00 : f32
    %625 = vector.broadcast %cst_258 : f32 to vector<8x128xf32>
    %626 = arith.subf %625, %618 : vector<8x128xf32>
    %627 = arith.subf %624, %600 : vector<8x128xf32>
    %628 = arith.mulf %626, %627 : vector<8x128xf32>
    %629 = arith.addf %600, %628 : vector<8x128xf32>
    %630 = arith.subf %629, %600 : vector<8x128xf32>
    %631 = arith.mulf %599, %630 : vector<8x128xf32>
    %632 = arith.addf %600, %631 : vector<8x128xf32>
    %c0_259 = arith.constant 0 : index
    %c0_260 = arith.constant 0 : index
    %633 = vector.load %arg23[%c0_259, %c0_260] : memref<8x128xf32, #tpu.memory_space<vmem>>, vector<8x128xf32>
    tpu.vector_store %arg23[%c0_259, %c0_260], %632 {strides = array<i32>} : memref<8x128xf32, #tpu.memory_space<vmem>>, vector<8x128xf32>,
    %634 = arith.mulf %599, %629 : vector<8x128xf32>
    %635 = arith.index_cast %c5_i32_246 : i32 to index
    %c0_261 = arith.constant 0 : index
    %c0_262 = arith.constant 0 : index
    %636 = vector.load %arg25[%635, %c0_261, %c0_262] : memref<8x8x128xf32, #tpu.memory_space<vmem>>, vector<1x8x128xf32>
    %637 = vector.shape_cast %636 : vector<1x8x128xf32> to vector<8x128xf32>
    %638 = vector.shape_cast %634 : vector<8x128xf32> to vector<1x8x128xf32>
    tpu.vector_store %arg25[%635, %c0_261, %c0_262], %638 {strides = array<i32>} : memref<8x8x128xf32, #tpu.memory_space<vmem>>, vector<1x8x128xf32>,
    %c6_i32_263 = arith.constant 6 : i32
    %639 = arith.index_cast %c6_i32_263 : i32 to index
    %c0_264 = arith.constant 0 : index
    %c0_265 = arith.constant 0 : index
    %640 = vector.load %arg24[%639, %c0_264, %c0_265] : memref<8x8x384xf32, #tpu.memory_space<vmem>>, vector<1x8x384xf32>
    %641 = vector.shape_cast %640 : vector<1x8x384xf32> to vector<8x384xf32>
    %642 = arith.index_cast %c6_i32_263 : i32 to index
    %c0_266 = arith.constant 0 : index
    %c0_267 = arith.constant 0 : index
    %643 = vector.load %arg2[%642, %c0_266, %c0_267] : memref<8x8x128xf32, #tpu.memory_space<vmem>>, vector<1x8x128xf32>
    %644 = vector.shape_cast %643 : vector<1x8x128xf32> to vector<8x128xf32>
    %c0_268 = arith.constant 0 : index
    %c0_269 = arith.constant 0 : index
    %645 = vector.load %arg23[%c0_268, %c0_269] : memref<8x128xf32, #tpu.memory_space<vmem>>, vector<8x128xf32>
    %c0_270 = arith.constant 0 : index
    %c0_271 = arith.constant 0 : index
    %646 = vector.load %arg10[%c0_270, %c0_271] : memref<128x384xf32, #tpu.memory_space<vmem>>, vector<128x384xf32>
    %cst_272 = arith.constant dense<0.000000e+00> : vector<8x384xf32>
    %647 = tpu.matmul %645, %646, %cst_272 {dimension_numbers = #tpu.dot_dimension_numbers<[1], [0], [0], [1], [0, 0, 1, 1], [], []>} : vector<8x128xf32>, vector<128x384xf32>, vector<8x384xf32> -> vector<8x384xf32>
    %648 = vector.extract_strided_slice %641 {offsets = [0, 0], sizes = [8, 128], strides = [1, 1]} : vector<8x384xf32> to vector<8x128xf32>
    %649 = vector.extract_strided_slice %647 {offsets = [0, 0], sizes = [8, 128], strides = [1, 1]} : vector<8x384xf32> to vector<8x128xf32>
    %650 = arith.addf %648, %649 : vector<8x128xf32>
    %651 = arith.negf %650 : vector<8x128xf32>
    %652 = math.exp %651 : vector<8x128xf32>
    %cst_273 = arith.constant 1.000000e+00 : f32
    %653 = vector.broadcast %cst_273 : f32 to vector<8x128xf32>
    %654 = arith.addf %653, %652 : vector<8x128xf32>
    %655 = arith.divf %653, %654 : vector<8x128xf32>
    %656 = vector.extract_strided_slice %641 {offsets = [0, 128], sizes = [8, 128], strides = [1, 1]} : vector<8x384xf32> to vector<8x128xf32>
    %657 = vector.extract_strided_slice %647 {offsets = [0, 128], sizes = [8, 128], strides = [1, 1]} : vector<8x384xf32> to vector<8x128xf32>
    %658 = arith.addf %656, %657 : vector<8x128xf32>
    %659 = arith.negf %658 : vector<8x128xf32>
    %660 = math.exp %659 : vector<8x128xf32>
    %cst_274 = arith.constant 1.000000e+00 : f32
    %661 = vector.broadcast %cst_274 : f32 to vector<8x128xf32>
    %662 = arith.addf %661, %660 : vector<8x128xf32>
    %663 = arith.divf %661, %662 : vector<8x128xf32>
    %664 = vector.extract_strided_slice %641 {offsets = [0, 256], sizes = [8, 128], strides = [1, 1]} : vector<8x384xf32> to vector<8x128xf32>
    %665 = vector.extract_strided_slice %647 {offsets = [0, 256], sizes = [8, 128], strides = [1, 1]} : vector<8x384xf32> to vector<8x128xf32>
    %666 = arith.addf %665, %367 : vector<8x128xf32>
    %667 = arith.mulf %655, %666 : vector<8x128xf32>
    %668 = arith.addf %664, %667 : vector<8x128xf32>
    %669 = math.tanh %668 : vector<8x128xf32>
    %cst_275 = arith.constant 1.000000e+00 : f32
    %670 = vector.broadcast %cst_275 : f32 to vector<8x128xf32>
    %671 = arith.subf %670, %663 : vector<8x128xf32>
    %672 = arith.subf %669, %645 : vector<8x128xf32>
    %673 = arith.mulf %671, %672 : vector<8x128xf32>
    %674 = arith.addf %645, %673 : vector<8x128xf32>
    %675 = arith.subf %674, %645 : vector<8x128xf32>
    %676 = arith.mulf %644, %675 : vector<8x128xf32>
    %677 = arith.addf %645, %676 : vector<8x128xf32>
    %c0_276 = arith.constant 0 : index
    %c0_277 = arith.constant 0 : index
    %678 = vector.load %arg23[%c0_276, %c0_277] : memref<8x128xf32, #tpu.memory_space<vmem>>, vector<8x128xf32>
    tpu.vector_store %arg23[%c0_276, %c0_277], %677 {strides = array<i32>} : memref<8x128xf32, #tpu.memory_space<vmem>>, vector<8x128xf32>,
    %679 = arith.mulf %644, %674 : vector<8x128xf32>
    %680 = arith.index_cast %c6_i32_263 : i32 to index
    %c0_278 = arith.constant 0 : index
    %c0_279 = arith.constant 0 : index
    %681 = vector.load %arg25[%680, %c0_278, %c0_279] : memref<8x8x128xf32, #tpu.memory_space<vmem>>, vector<1x8x128xf32>
    %682 = vector.shape_cast %681 : vector<1x8x128xf32> to vector<8x128xf32>
    %683 = vector.shape_cast %679 : vector<8x128xf32> to vector<1x8x128xf32>
    tpu.vector_store %arg25[%680, %c0_278, %c0_279], %683 {strides = array<i32>} : memref<8x8x128xf32, #tpu.memory_space<vmem>>, vector<1x8x128xf32>,
    %c7_i32_280 = arith.constant 7 : i32
    %684 = arith.index_cast %c7_i32_280 : i32 to index
    %c0_281 = arith.constant 0 : index
    %c0_282 = arith.constant 0 : index
    %685 = vector.load %arg24[%684, %c0_281, %c0_282] : memref<8x8x384xf32, #tpu.memory_space<vmem>>, vector<1x8x384xf32>
    %686 = vector.shape_cast %685 : vector<1x8x384xf32> to vector<8x384xf32>
    %687 = arith.index_cast %c7_i32_280 : i32 to index
    %c0_283 = arith.constant 0 : index
    %c0_284 = arith.constant 0 : index
    %688 = vector.load %arg2[%687, %c0_283, %c0_284] : memref<8x8x128xf32, #tpu.memory_space<vmem>>, vector<1x8x128xf32>
    %689 = vector.shape_cast %688 : vector<1x8x128xf32> to vector<8x128xf32>
    %c0_285 = arith.constant 0 : index
    %c0_286 = arith.constant 0 : index
    %690 = vector.load %arg23[%c0_285, %c0_286] : memref<8x128xf32, #tpu.memory_space<vmem>>, vector<8x128xf32>
    %c0_287 = arith.constant 0 : index
    %c0_288 = arith.constant 0 : index
    %691 = vector.load %arg10[%c0_287, %c0_288] : memref<128x384xf32, #tpu.memory_space<vmem>>, vector<128x384xf32>
    %cst_289 = arith.constant dense<0.000000e+00> : vector<8x384xf32>
    %692 = tpu.matmul %690, %691, %cst_289 {dimension_numbers = #tpu.dot_dimension_numbers<[1], [0], [0], [1], [0, 0, 1, 1], [], []>} : vector<8x128xf32>, vector<128x384xf32>, vector<8x384xf32> -> vector<8x384xf32>
    %693 = vector.extract_strided_slice %686 {offsets = [0, 0], sizes = [8, 128], strides = [1, 1]} : vector<8x384xf32> to vector<8x128xf32>
    %694 = vector.extract_strided_slice %692 {offsets = [0, 0], sizes = [8, 128], strides = [1, 1]} : vector<8x384xf32> to vector<8x128xf32>
    %695 = arith.addf %693, %694 : vector<8x128xf32>
    %696 = arith.negf %695 : vector<8x128xf32>
    %697 = math.exp %696 : vector<8x128xf32>
    %cst_290 = arith.constant 1.000000e+00 : f32
    %698 = vector.broadcast %cst_290 : f32 to vector<8x128xf32>
    %699 = arith.addf %698, %697 : vector<8x128xf32>
    %700 = arith.divf %698, %699 : vector<8x128xf32>
    %701 = vector.extract_strided_slice %686 {offsets = [0, 128], sizes = [8, 128], strides = [1, 1]} : vector<8x384xf32> to vector<8x128xf32>
    %702 = vector.extract_strided_slice %692 {offsets = [0, 128], sizes = [8, 128], strides = [1, 1]} : vector<8x384xf32> to vector<8x128xf32>
    %703 = arith.addf %701, %702 : vector<8x128xf32>
    %704 = arith.negf %703 : vector<8x128xf32>
    %705 = math.exp %704 : vector<8x128xf32>
    %cst_291 = arith.constant 1.000000e+00 : f32
    %706 = vector.broadcast %cst_291 : f32 to vector<8x128xf32>
    %707 = arith.addf %706, %705 : vector<8x128xf32>
    %708 = arith.divf %706, %707 : vector<8x128xf32>
    %709 = vector.extract_strided_slice %686 {offsets = [0, 256], sizes = [8, 128], strides = [1, 1]} : vector<8x384xf32> to vector<8x128xf32>
    %710 = vector.extract_strided_slice %692 {offsets = [0, 256], sizes = [8, 128], strides = [1, 1]} : vector<8x384xf32> to vector<8x128xf32>
    %711 = arith.addf %710, %367 : vector<8x128xf32>
    %712 = arith.mulf %700, %711 : vector<8x128xf32>
    %713 = arith.addf %709, %712 : vector<8x128xf32>
    %714 = math.tanh %713 : vector<8x128xf32>
    %cst_292 = arith.constant 1.000000e+00 : f32
    %715 = vector.broadcast %cst_292 : f32 to vector<8x128xf32>
    %716 = arith.subf %715, %708 : vector<8x128xf32>
    %717 = arith.subf %714, %690 : vector<8x128xf32>
    %718 = arith.mulf %716, %717 : vector<8x128xf32>
    %719 = arith.addf %690, %718 : vector<8x128xf32>
    %720 = arith.subf %719, %690 : vector<8x128xf32>
    %721 = arith.mulf %689, %720 : vector<8x128xf32>
    %722 = arith.addf %690, %721 : vector<8x128xf32>
    %c0_293 = arith.constant 0 : index
    %c0_294 = arith.constant 0 : index
    %723 = vector.load %arg23[%c0_293, %c0_294] : memref<8x128xf32, #tpu.memory_space<vmem>>, vector<8x128xf32>
    tpu.vector_store %arg23[%c0_293, %c0_294], %722 {strides = array<i32>} : memref<8x128xf32, #tpu.memory_space<vmem>>, vector<8x128xf32>,
    %724 = arith.mulf %689, %719 : vector<8x128xf32>
    %725 = arith.index_cast %c7_i32_280 : i32 to index
    %c0_295 = arith.constant 0 : index
    %c0_296 = arith.constant 0 : index
    %726 = vector.load %arg25[%725, %c0_295, %c0_296] : memref<8x8x128xf32, #tpu.memory_space<vmem>>, vector<1x8x128xf32>
    %727 = vector.shape_cast %726 : vector<1x8x128xf32> to vector<8x128xf32>
    %728 = vector.shape_cast %724 : vector<8x128xf32> to vector<1x8x128xf32>
    tpu.vector_store %arg25[%725, %c0_295, %c0_296], %728 {strides = array<i32>} : memref<8x8x128xf32, #tpu.memory_space<vmem>>, vector<1x8x128xf32>,
    %c8_i32_297 = arith.constant 8 : i32
    %c0_298 = arith.constant 0 : index
    %c0_299 = arith.constant 0 : index
    %c0_300 = arith.constant 0 : index
    %729 = vector.load %arg25[%c0_298, %c0_299, %c0_300] : memref<8x8x128xf32, #tpu.memory_space<vmem>>, vector<8x8x128xf32>
    %730 = vector.shape_cast %729 : vector<8x8x128xf32> to vector<64x128xf32>
    %c0_301 = arith.constant 0 : index
    %c0_302 = arith.constant 0 : index
    %731 = vector.load %arg17[%c0_301, %c0_302] : memref<128x256xf32, #tpu.memory_space<vmem>>, vector<128x256xf32>
    %cst_303 = arith.constant dense<0.000000e+00> : vector<64x256xf32>
    %732 = tpu.matmul %730, %731, %cst_303 {dimension_numbers = #tpu.dot_dimension_numbers<[1], [0], [0], [1], [0, 0, 1, 1], [], []>} : vector<64x128xf32>, vector<128x256xf32>, vector<64x256xf32> -> vector<64x256xf32>
    %c0_304 = arith.constant 0 : index
    %c0_305 = arith.constant 0 : index
    %733 = vector.load %arg18[%c0_304, %c0_305] : memref<1x256xf32, #tpu.memory_space<vmem>>, vector<1x256xf32>
    %734 = vector.broadcast %733 : vector<1x256xf32> to vector<64x256xf32>
    %735 = arith.addf %732, %734 : vector<64x256xf32>
    %cst_306 = arith.constant dense<0xFF800000> : vector<64xf32>
    %736 = vector.multi_reduction <maximumf>, %735, %cst_306 [1] : vector<64x256xf32> to vector<64xf32>
    %737 = vector.shape_cast %736 : vector<64xf32> to vector<64x1xf32>
    %738 = vector.broadcast %737 : vector<64x1xf32> to vector<64x256xf32>
    %739 = arith.subf %735, %738 : vector<64x256xf32>
    %740 = math.exp %739 : vector<64x256xf32>
    %cst_307 = arith.constant dense<0.000000e+00> : vector<64xf32>
    %741 = vector.multi_reduction <add>, %740, %cst_307 [1] : vector<64x256xf32> to vector<64xf32>
    %742 = vector.shape_cast %741 : vector<64xf32> to vector<64x1xf32>
    %743 = math.log %742 : vector<64x1xf32>
    %744 = vector.broadcast %743 : vector<64x1xf32> to vector<64x256xf32>
    %745 = arith.subf %739, %744 : vector<64x256xf32>
    %746 = vector.shape_cast %745 : vector<64x256xf32> to vector<8x8x256xf32>
    %c0_308 = arith.constant 0 : index
    %c0_309 = arith.constant 0 : index
    %c0_310 = arith.constant 0 : index
    %747 = vector.load %arg19[%c0_308, %c0_309, %c0_310] : memref<8x8x256xf32, #tpu.memory_space<vmem>>, vector<8x8x256xf32>
    tpu.vector_store %arg19[%c0_308, %c0_309, %c0_310], %746 {strides = array<i32>} : memref<8x8x256xf32, #tpu.memory_space<vmem>>, vector<8x8x256xf32>,
    return
  }
  func.func @transform_0(%arg0: i32) -> (i32, i32, i32) {
    %c0_i32 = arith.constant 0 : i32
    %c0_i32_0 = arith.constant 0 : i32
    %c0_i32_1 = arith.constant 0 : i32
    %c0_i32_2 = arith.constant 0 : i32
    return %c0_i32, %c0_i32_0, %c0_i32_1 : i32, i32, i32
  }
  func.func @transform_1(%arg0: i32) -> (i32, i32, i32) {
    %c0_i32 = arith.constant 0 : i32
    %c0_i32_0 = arith.constant 0 : i32
    %c0_i32_1 = arith.constant 0 : i32
    %c0_i32_2 = arith.constant 0 : i32
    return %c0_i32, %c0_i32_0, %c0_i32_1 : i32, i32, i32
  }
  func.func @transform_2(%arg0: i32) -> (i32, i32) {
    %c0_i32 = arith.constant 0 : i32
    %c0_i32_0 = arith.constant 0 : i32
    %c0_i32_1 = arith.constant 0 : i32
    return %c0_i32, %c0_i32_0 : i32, i32
  }
  func.func @transform_3(%arg0: i32) -> (i32, i32) {
    %c0_i32 = arith.constant 0 : i32
    %c0_i32_0 = arith.constant 0 : i32
    %c0_i32_1 = arith.constant 0 : i32
    return %c0_i32, %c0_i32_0 : i32, i32
  }
  func.func @transform_4(%arg0: i32) -> (i32, i32) {
    %c0_i32 = arith.constant 0 : i32
    %c0_i32_0 = arith.constant 0 : i32
    %c0_i32_1 = arith.constant 0 : i32
    return %c0_i32, %c0_i32_0 : i32, i32
  }
  func.func @transform_5(%arg0: i32) -> (i32, i32) {
    %c0_i32 = arith.constant 0 : i32
    %c0_i32_0 = arith.constant 0 : i32
    %c0_i32_1 = arith.constant 0 : i32
    return %c0_i32, %c0_i32_0 : i32, i32
  }
  func.func @transform_6(%arg0: i32) -> (i32, i32) {
    %c0_i32 = arith.constant 0 : i32
    %c0_i32_0 = arith.constant 0 : i32
    %c0_i32_1 = arith.constant 0 : i32
    return %c0_i32, %c0_i32_0 : i32, i32
  }
  func.func @transform_7(%arg0: i32) -> (i32, i32) {
    %c0_i32 = arith.constant 0 : i32
    %c0_i32_0 = arith.constant 0 : i32
    %c0_i32_1 = arith.constant 0 : i32
    return %c0_i32, %c0_i32_0 : i32, i32
  }
  func.func @transform_8(%arg0: i32) -> (i32, i32) {
    %c0_i32 = arith.constant 0 : i32
    %c0_i32_0 = arith.constant 0 : i32
    %c0_i32_1 = arith.constant 0 : i32
    return %c0_i32, %c0_i32_0 : i32, i32
  }
  func.func @transform_9(%arg0: i32) -> (i32, i32) {
    %c0_i32 = arith.constant 0 : i32
    %c0_i32_0 = arith.constant 0 : i32
    %c0_i32_1 = arith.constant 0 : i32
    return %c0_i32, %c0_i32_0 : i32, i32
  }
  func.func @transform_10(%arg0: i32) -> (i32, i32) {
    %c0_i32 = arith.constant 0 : i32
    %c0_i32_0 = arith.constant 0 : i32
    %c0_i32_1 = arith.constant 0 : i32
    return %c0_i32, %c0_i32_0 : i32, i32
  }
  func.func @transform_11(%arg0: i32) -> (i32, i32) {
    %c0_i32 = arith.constant 0 : i32
    %c0_i32_0 = arith.constant 0 : i32
    %c0_i32_1 = arith.constant 0 : i32
    return %c0_i32, %c0_i32_0 : i32, i32
  }
  func.func @transform_12(%arg0: i32) -> (i32, i32) {
    %c0_i32 = arith.constant 0 : i32
    %c0_i32_0 = arith.constant 0 : i32
    %c0_i32_1 = arith.constant 0 : i32
    return %c0_i32, %c0_i32_0 : i32, i32
  }
  func.func @transform_13(%arg0: i32) -> (i32, i32) {
    %c0_i32 = arith.constant 0 : i32
    %c0_i32_0 = arith.constant 0 : i32
    %c0_i32_1 = arith.constant 0 : i32
    return %c0_i32, %c0_i32_0 : i32, i32
  }
  func.func @transform_14(%arg0: i32) -> (i32, i32) {
    %c0_i32 = arith.constant 0 : i32
    %c0_i32_0 = arith.constant 0 : i32
    %c0_i32_1 = arith.constant 0 : i32
    return %c0_i32, %c0_i32_0 : i32, i32
  }
  func.func @transform_15(%arg0: i32) -> (i32, i32) {
    %c0_i32 = arith.constant 0 : i32
    %c0_i32_0 = arith.constant 0 : i32
    %c0_i32_1 = arith.constant 0 : i32
    return %c0_i32, %c0_i32_0 : i32, i32
  }
  func.func @transform_16(%arg0: i32) -> (i32, i32) {
    %c0_i32 = arith.constant 0 : i32
    %c0_i32_0 = arith.constant 0 : i32
    %c0_i32_1 = arith.constant 0 : i32
    return %c0_i32, %c0_i32_0 : i32, i32
  }
  func.func @transform_17(%arg0: i32) -> (i32, i32) {
    %c0_i32 = arith.constant 0 : i32
    %c0_i32_0 = arith.constant 0 : i32
    %c0_i32_1 = arith.constant 0 : i32
    return %c0_i32, %c0_i32_0 : i32, i32
  }
  func.func @transform_18(%arg0: i32) -> (i32, i32, i32) {
    %c0_i32 = arith.constant 0 : i32
    %c0_i32_0 = arith.constant 0 : i32
    %c0_i32_1 = arith.constant 0 : i32
    %c0_i32_2 = arith.constant 0 : i32
    return %c0_i32, %c0_i32_0, %c0_i32_1 : i32, i32, i32
  }
  func.func @transform_19(%arg0: i32) -> (i32, i32) {
    %c0_i32 = arith.constant 0 : i32
    %c0_i32_0 = arith.constant 0 : i32
    %c0_i32_1 = arith.constant 0 : i32
    return %c0_i32, %c0_i32_0 : i32, i32
  }
  func.func @transform_20(%arg0: i32) -> (i32, i32) {
    %c0_i32 = arith.constant 0 : i32
    %c0_i32_0 = arith.constant 0 : i32
    %c0_i32_1 = arith.constant 0 : i32
    return %c0_i32, %c0_i32_0 : i32, i32
  }
  func.func @transform_21(%arg0: i32) -> (i32, i32) {
    %c0_i32 = arith.constant 0 : i32
    %c0_i32_0 = arith.constant 0 : i32
    %c0_i32_1 = arith.constant 0 : i32
    return %c0_i32, %c0_i32_0 : i32, i32
  }
}

</mosaic_0001>

<bundles_post_ra>
// kernel: tpu_custom_call.1
= control target key start
LH: loop header
LB: loop body
LE: loop exit
PB: predicated region body
PF: predicated region fallthrough
CT: control target
= control target key end

     0   :  { %s6543_s0 = inlined_call_operand.hbm [shape: f32[8,8,64], index: 0, kind: input, shape index: {}]   ;;  %s6544_s1 = inlined_call_operand.hbm [shape: f32[8,8,128], index: 1, kind: input, shape index: {}]   ;;  %s6545_s2 = inlined_call_operand.hbm [shape: f32[8,96], index: 2, kind: input, shape index: {}]   ;;  %s6546_s3 = inlined_call_operand.hbm [shape: f32[8,32], index: 3, kind: input, shape index: {}]   ;;  %s6547_s4 = inlined_call_operand.vmem [shape: f32[64,384], index: 4, kind: input, shape index: {}]   ;;  %s6548_s5 = inlined_call_operand.hbm [shape: f32[128,384], index: 5, kind: input, shape index: {}]   ;;  %s6549_s6 = inlined_call_operand.vmem [shape: f32[1,384], index: 6, kind: input, shape index: {}]   ;;  %s6550_s7 = inlined_call_operand.hbm [shape: f32[1,128], index: 7, kind: input, shape index: {}]   ;;  %s6551_s8 = inlined_call_operand.hbm [shape: f32[64,384], index: 8, kind: input, shape index: {}]   ;;  %s6552_s9 = inlined_call_operand.hbm [shape: f32[128,384], index: 9, kind: input, shape index: {}]   ;;  %s6553_s10 = inlined_call_operand.vmem [shape: f32[1,384], index: 10, kind: input, shape index: {}]   ;;  %s6554_s11 = inlined_call_operand.hbm [shape: f32[1,128], index: 11, kind: input, shape index: {}]   ;;  %s6555_s12 = inlined_call_operand.vmem [shape: f32[128,64], index: 12, kind: input, shape index: {}]   ;;  %s6556_s13 = inlined_call_operand.vmem [shape: f32[1,64], index: 13, kind: input, shape index: {}]   ;;  %s6557_s14 = inlined_call_operand.hbm [shape: f32[128,128], index: 14, kind: input, shape index: {}]   ;;  %s6558_s15 = inlined_call_operand.vmem [shape: f32[1,128], index: 15, kind: input, shape index: {}]   ;;  %s6559_s16 = inlined_call_operand.hbm [shape: f32[128,256], index: 16, kind: input, shape index: {}]   ;;  %s6560_s17 = inlined_call_operand.vmem [shape: f32[1,256], index: 17, kind: input, shape index: {}]   ;;  %s6561_s18 = inlined_call_operand.hbm [shape: f32[8,8,256], index: 18, kind: output, shape index: {0}]   ;;  %s6562_s19 = inlined_call_operand.hbm [shape: f32[8,32], index: 19, kind: output, shape index: {1}]   ;;  %s6563_s20 = inlined_call_operand.hbm [shape: f32[8,32], index: 20, kind: output, shape index: {2}]   ;;  %s6564_s21 = inlined_call_operand.hbm [shape: f32[8,128], index: 21, kind: output, shape index: {3}]  }
   0x1   :  { %6580 = sst [smem:[#allocation61_spill]] %s6543_s0 }
   0x2   :  { %6581 = sst [smem:[#allocation62_spill]] %s6544_s1 }
   0x3   :  { %6582 = sst [smem:[#allocation63_spill]] %s6545_s2 }
   0x4   :  { %6583 = sst [smem:[#allocation64_spill]] %s6546_s3 }
   0x5   :  { %6584 = sst [smem:[#allocation65_spill]] %s6547_s4 }
   0x6   :  { %6585 = sst [smem:[#allocation66_spill]] %s6548_s5 }
   0x7   :  { %6586 = sst [smem:[#allocation67_spill]] %s6561_s18 }
   0x8   :  { %27 = vsyncpa [#allocation6], 0 }
   0x9   :  { %28 = vsyncpa [#allocation9], 0 }
   0xa   :  { %29 = vsyncpa [#allocation12], 0 }
   0xb   :  { %30 = vsyncpa [#allocation15], 0 }
   0xc   :  { %31 = vsyncpa [#allocation18], 0 }
   0xd   :  { %32 = vsyncpa [#allocation21], 0 }
   0xe   :  { %33 = vsyncpa [#allocation7], 0 }
   0xf   :  { %34 = vsyncpa [#allocation25], 0 }
  0x10   :  { %35 = vsyncpa [#allocation28], 0  ;;  %s6587_s26 = sld [smem:[#allocation62_spill]]  ;;  %s4469_s3 = smov [#allocation8]  }
  0x11   :  { %s55_s28 = sshll.u32 %s4469_s3, 4  ;;  %s6588_s4 = sld [smem:[#allocation64_spill]]  ;;  %s56_s28 = int_to_ptr.vmem [resolvable:$true] %s55_s28 }
  0x12   :  { %s6566_s5 = smov 128   ;;  %s6568_s22 = smov 8  }
  0x13   :  { %s4472_s23 = smov [#allocation11]   ;;  %s106_s25 = sshll.u32 %s6550_s7, 4  ;;  %s107_s25 = int_to_ptr.hbm [resolvable:$true] %s106_s25 }
  0x14   :  { %s80_s1 = sshll.u32 %s4472_s23, 4  ;;  %s4475_s7 = smov 384   ;;  %s81_s1 = int_to_ptr.vmem [resolvable:$true] %s80_s1 }
  0x15   :  { %s4476_s24 = smov 24   ;;  %s6589_s2 = sld [smem:[#allocation61_spill]] }
  0x16   :  { %s53_s27 = sshll.u32 %s6587_s26, 4  ;;  %s4473_s26 = smov [#allocation14]   ;;  %s54_s27 = int_to_ptr.hbm [resolvable:$true] %s53_s27 }
  0x17   :  { %s78_s30 = sshll.u32 %s6588_s4, 4  ;;  %s108_s3 = sshll.u32 %s4473_s26, 4  ;;  %s79_s30 = int_to_ptr.hbm [resolvable:$true] %s78_s30  ;;  %s109_s3 = int_to_ptr.vmem [resolvable:$true] %s108_s3 }
  0x18   :  { %61 = dma.hbm_to_vmem [thread:$0]  %s54_s27, 1024, %s56_s28, [#allocation9], %s6566_s5, %s6566_s5, %s6568_s22  }
  0x19   :  { %83 = dma.hbm_to_vmem [thread:$0]  %s79_s30, 128, %s81_s1, [#allocation12]  }
  0x1a   :  { %s129_s4 = sshll.u32 %s6552_s9, 4  ;;  %s4474_s27 = smov [#allocation17]   ;;  %s130_s4 = int_to_ptr.hbm [resolvable:$true] %s129_s4 }
  0x1b   :  { %111 = dma.hbm_to_vmem [thread:$0]  %s107_s25, 16, %s109_s3, [#allocation15]  }
  0x1c   :  { %s131_s28 = sshll.u32 %s4474_s27, 4  ;;  %s159_s22 = sshll.u32 %s6557_s14, 4  ;;  %s132_s28 = int_to_ptr.vmem [resolvable:$true] %s131_s28  ;;  %s160_s22 = int_to_ptr.hbm [resolvable:$true] %s159_s22 }
  0x1d   :  { %137 = dma.hbm_to_vmem [thread:$0]  %s130_s4, 6144, %s132_s28, [#allocation18], %s4475_s7, %s4475_s7, %s4476_s24  }
  0x1e   :  { %s40_s9 = sshll.u32 %s6589_s2, 4  ;;  %s4477_s25 = smov [#allocation20]   ;;  %s41_s9 = int_to_ptr.hbm [resolvable:$true] %s40_s9 }
  0x1f   :  { %s161_s26 = sshll.u32 %s4477_s25, 4  ;;  %s6590_s3 = smov 8   ;;  %s162_s26 = int_to_ptr.vmem [resolvable:$true] %s161_s26 }
  0x20   :  { %s6591_s29 = smov 128   ;;  %s4478_s14 = smov [#allocation5]  }
  0x21   :  { %167 = dma.hbm_to_vmem [thread:$0]  %s160_s22, 2048, %s162_s26, [#allocation21], %s6591_s29, %s6591_s29, %s6590_s3  }
  0x22   :  { %s42_s5 = sshll.u32 %s4478_s14, 4  ;;  %s6592_s23 = sld [smem:[#allocation63_spill]]  ;;  %s43_s5 = int_to_ptr.vmem [resolvable:$true] %s42_s5 }
  0x23   :  { %48 = dma.hbm_to_vmem [thread:$0]  %s41_s9, 1024, %s43_s5, [#allocation6], %s6591_s29, %s6591_s29, %s6590_s3  }
  0x24   :  { %s6593_s30 = sld [smem:[#allocation66_spill]]  ;;  %s4479_s2 = smov [#allocation10]  }
  0x25   :  { %s69_s25 = sshll.u32 %s4479_s2, 4  ;;  %s4480_s22 = smov [#allocation13]   ;;  %s70_s25 = int_to_ptr.vmem [resolvable:$true] %s69_s25 }
  0x26   :  { %s92_s26 = sshll.u32 %s4480_s22, 4  ;;  %s116_s27 = sshll.u32 %s6551_s8, 4  ;;  %s93_s26 = int_to_ptr.vmem [resolvable:$true] %s92_s26  ;;  %s117_s27 = int_to_ptr.hbm [resolvable:$true] %s116_s27 }
  0x27   :  { %s145_s29 = sshll.u32 %s6554_s11, 4  ;;  %s4481_s5 = smov [#allocation16]   ;;  %s146_s29 = int_to_ptr.hbm [resolvable:$true] %s145_s29 }
  0x28   :  { %s67_s18 = sshll.u32 %s6592_s23, 4  ;;  %s118_s23 = sshll.u32 %s4481_s5, 4  ;;  %s68_s18 = int_to_ptr.hbm [resolvable:$true] %s67_s18  ;;  %s119_s23 = int_to_ptr.vmem [resolvable:$true] %s118_s23 }
  0x29   :  { %72 = dma.hbm_to_vmem [thread:$0]  %s68_s18, 128, %s70_s25, [#allocation9]  }
  0x2a   :  { %s90_s1 = sshll.u32 %s6593_s30, 4  ;;  %s4482_s18 = smov [#allocation19]   ;;  %s91_s1 = int_to_ptr.hbm [resolvable:$true] %s90_s1 }
  0x2b   :  { %98 = dma.hbm_to_vmem [thread:$0]  %s91_s1, 6144, %s93_s26, [#allocation12], %s4475_s7, %s4475_s7, %s4476_s24  }
  0x2c   :  { %124 = dma.hbm_to_vmem [thread:$0]  %s117_s27, 3072, %s119_s23, [#allocation15], %s4475_s7, %s4475_s7, %s4476_s24  }
  0x2d   :  { %s147_s8 = sshll.u32 %s4482_s18, 4  ;;  %s174_s30 = sshll.u32 %s6559_s16, 4  ;;  %s148_s8 = int_to_ptr.vmem [resolvable:$true] %s147_s8  ;;  %s175_s30 = int_to_ptr.hbm [resolvable:$true] %s174_s30 }
  0x2e   :  { %150 = dma.hbm_to_vmem [thread:$0]  %s146_s29, 16, %s148_s8, [#allocation18]  }
  0x2f   :  { %s4483_s1 = smov [#allocation22]   ;;  %s4484_s11 = smov 256  }
  0x30   :  { %s176_s2 = sshll.u32 %s4483_s1, 4  ;;  %s4485_s25 = smov 16   ;;  %s177_s2 = int_to_ptr.vmem [resolvable:$true] %s176_s2 }
  0x31   :  { %182 = dma.hbm_to_vmem [thread:$0]  %s175_s30, 4096, %s177_s2, [#allocation21], %s4484_s11, %s4484_s11, %s4485_s25  }
  0x32   :  { %4451 = dma.done.wait [#allocation6], 1024  }
  0x33   :  { %4452 = vsyncadd [#allocation6], 4294966272 }
  0x34   :  { %4453 = dma.done.wait [#allocation9], 1152  }
  0x35   :  { %4454 = vsyncadd [#allocation9], 4294966144 }
  0x36   :  { %4455 = dma.done.wait [#allocation12], 6272  }
  0x37   :  { %4456 = vsyncadd [#allocation12], 4294961024 }
  0x38   :  { %4457 = dma.done.wait [#allocation15], 3088  }
  0x39   :  { %4458 = vsyncadd [#allocation15], 4294964208 }
  0x3a   :  { %4459 = dma.done.wait [#allocation18], 6160  }
  0x3b   :  { %4460 = vsyncadd [#allocation18], 4294961136 }
  0x3c   :  { %4461 = dma.done.wait [#allocation21], 6144  }
  0x3d   :  { %4462 = vsyncadd [#allocation21], 4294961152  ;;  %s6594_s24 = sld [smem:[#allocation65_spill]]  ;;  %v4660_v1 = vld [vmem:[#allocation13 + $0x168] sm:$0xff]  ;;  %v4666_v3 = vld [vmem:[#allocation13 + $0x150] sm:$0xff]  ;;  %vm269_vm0 = vcmask 523264  }
  0x3e   :  { %499 = vmatpush.msra.mxu3 %v4660_v1  ;;  %v4671_v5 = vld [vmem:[#allocation13 + $0x138] sm:$0xff]  ;;  %v4677_v7 = vld [vmem:[#allocation13 + $0x120] sm:$0xff]  ;;  %v4683_v9 = vld [vmem:[#allocation13 + $0x108] sm:$0xff]  ;;  %v4486_v53 = vmov 0.0   ;;  %s4488_s26 = smov 32   ;;  %s3704_s5 = sshll.u32 %s6562_s19, 4  ;;  %s3705_s5 = int_to_ptr.hbm [resolvable:$true] %s3704_s5 }
  0x3f   :  { %v4695_v13 = vld [vmem:[#allocation13 + $0xf0] sm:$0xff]  ;;  %v4704_v16 = vld [vmem:[#allocation13 + $0xd8] sm:$0xff]  ;;  %v4713_v19 = vld [vmem:[#allocation13 + $0xc0] sm:$0xff]  ;;  %s4490_s19 = smov [#allocation26]   ;;  %s3715_s8 = sshll.u32 %s6563_s20, 4  ;;  %s3716_s8 = int_to_ptr.hbm [resolvable:$true] %s3715_s8 }
  0x40   :  { %500 = vmatpush.msra.mxu3 %v4666_v3  ;;  %v4716_v20 = vld [vmem:[#allocation5] sm:$0xff]  ;;  %v4721_v22 = vld [vmem:[#allocation13 + $0xa8] sm:$0xff]  ;;  %v4723_v23 = vld [vmem:[#allocation13 + $0x178] sm:$0xff]  ;;  %s3726_s30 = sshll.u32 %s6564_s21, 4  ;;  %s4491_s1 = smov [#allocation27]   ;;  %s3727_s30 = int_to_ptr.hbm [resolvable:$true] %s3726_s30 }
  0x41   :  { %v4731_v25 = vld [vmem:[#allocation13 + $0x90] sm:$0xff]  ;;  %v4733_v26 = vld [vmem:[#allocation13 + $0x160] sm:$0xff]  ;;  %v4740_v28 = vld [vmem:[#allocation13 + $0x78] sm:$0xff]  ;;  %s3724_s2 = sshll.u32 %s4491_s1, 4  ;;  %s4492_s20 = smov [#allocation23]   ;;  %s3725_s2 = int_to_ptr.vmem [resolvable:$true] %s3724_s2 }
  0x42   :  { %501 = vmatpush.msra.mxu3 %v4671_v5  ;;  %v4742_v29 = vld [vmem:[#allocation13 + $0x148] sm:$0xff]  ;;  %v4749_v31 = vld [vmem:[#allocation13 + $0x60] sm:$0xff]  ;;  %v4751_v32 = vld [vmem:[#allocation13 + $0x130] sm:$0xff]  ;;  %s3688_s21 = sshll.u32 %s4492_s20, 4  ;;  %s3689_s21 = int_to_ptr.vmem [resolvable:$true] %s3688_s21 }
  0x43   :  { %v260_v0 = vld [vmem:[%s6594_s24 + $0xb8] sm:$0xff]  ;;  %v257_v2 = vld [vmem:[%s6594_s24 + $0xa0] sm:$0xff]  ;;  %v254_v4 = vld [vmem:[%s6594_s24 + $0x88] sm:$0xff] }
  0x44   :  { %384 = vmatpush.msra.mxu2 %v260_v0  ;;  %v251_v6 = vld [vmem:[%s6594_s24 + $0x70] sm:$0xff]  ;;  %v248_v8 = vld [vmem:[%s6594_s24 + $0x58] sm:$0xff]  ;;  %v258_v10 = vld [vmem:[%s6594_s24 + $0xa8] sm:$0xff]  ;;  %502 = vmatpush.msra.mxu3 %v4677_v7 }
  0x45   :  { %v255_v11 = vld [vmem:[%s6594_s24 + $0x90] sm:$0xff]  ;;  %v245_v12 = vld [vmem:[%s6594_s24 + $0x40] sm:$0xff]  ;;  %3835 = vmatpush.msra.mxu1 %v258_v10  ;;  %302 = vmatpush.msra.mxu0 %v258_v10  ;;  %v252_v14 = vld [vmem:[%s6594_s24 + $0x78] sm:$0xff] }
  0x46   :  { %385 = vmatpush.msra.mxu2 %v257_v2  ;;  %503 = vmatpush.msra.mxu3 %v4683_v9  ;;  %v242_v15 = vld [vmem:[%s6594_s24 + $0x28] sm:$0xff]  ;;  %v249_v17 = vld [vmem:[%s6594_s24 + $0x60] sm:$0xff]  ;;  %v239_v18 = vld [vmem:[%s6594_s24 + $0x10] sm:$0xff] }
  0x47   :  { %3836 = vmatpush.msra.mxu1 %v255_v11  ;;  %303 = vmatpush.msra.mxu0 %v255_v11  ;;  %v246_v21 = vld [vmem:[%s6594_s24 + $0x48] sm:$0xff]  ;;  %v243_v24 = vld [vmem:[%s6594_s24 + $0x30] sm:$0xff]  ;;  %v240_v27 = vld [vmem:[%s6594_s24 + $0x18] sm:$0xff] }
  0x48   :  { %386 = vmatpush.msra.mxu2 %v254_v4  ;;  %504 = vmatpush.msra.mxu3 %v4695_v13  ;;  %v237_v30 = vld [vmem:[%s6594_s24] sm:$0xff]  ;;  %v4754_v33 = vld [vmem:[#allocation5 + $0x8] sm:$0xff]  ;;  %v4759_v35 = vld [vmem:[#allocation13 + $0x48] sm:$0xff] }
  0x49   :  { %3837 = vmatpush.msra.mxu1 %v252_v14  ;;  %304 = vmatpush.msra.mxu0 %v252_v14  ;;  %v4757_v34 = vld [vmem:[#allocation5 + $0x20] sm:$0xff]  ;;  %v4761_v36 = vld [vmem:[#allocation13 + $0x118] sm:$0xff]  ;;  %v259_v37 = vld [vmem:[%s6594_s24 + $0xb0] sm:$0xff] }
  0x4a   :  { %387 = vmatpush.msra.mxu2 %v251_v6  ;;  %505 = vmatpush.msra.mxu3 %v4704_v16  ;;  %v4770_v38 = vld [vmem:[#allocation13 + $0x30] sm:$0xff]  ;;  %v4774_v39 = vld [vmem:[#allocation13 + $0x100] sm:$0xff]  ;;  %v256_v40 = vld [vmem:[%s6594_s24 + $0x98] sm:$0xff] }
  0x4b   :  { %3838 = vmatpush.msra.mxu1 %v249_v17  ;;  %305 = vmatpush.msra.mxu0 %v249_v17  ;;  %v4781_v41 = vld [vmem:[#allocation13 + $0x18] sm:$0xff]  ;;  %v4783_v42 = vld [vmem:[#allocation13 + $0xe8] sm:$0xff]  ;;  %v253_v43 = vld [vmem:[%s6594_s24 + $0x80] sm:$0xff] }
  0x4c   :  { %388 = vmatpush.msra.mxu2 %v248_v8  ;;  %506 = vmatpush.msra.mxu3 %v4713_v19  ;;  %v4790_v44 = vld [vmem:[#allocation13] sm:$0xff]  ;;  %v4794_v45 = vld [vmem:[#allocation13 + $0xd0] sm:$0xff]  ;;  %v4802_v48 = vld [vmem:[#allocation5 + $0x28] sm:$0xff] }
  0x4d   :  { %3839 = vmatpush.msra.mxu1 %v246_v21  ;;  %306 = vmatpush.msra.mxu0 %v246_v21  ;;  %v4797_v46 = vld [vmem:[#allocation5 + $0x10] sm:$0xff]  ;;  %v4799_v47 = vld [vmem:[#allocation13 + $0x170] sm:$0xff]  ;;  %v4806_v49 = vld [vmem:[#allocation13 + $0x158] sm:$0xff] }
  0x4e   :  { %389 = vmatpush.msra.mxu2 %v245_v12  ;;  %507 = vmatpush.msra.mxu3 %v4721_v22  ;;  %v250_v50 = vld [vmem:[%s6594_s24 + $0x68] sm:$0xff]  ;;  %v4817_v52 = vld [vmem:[#allocation13 + $0x140] sm:$0xff]  ;;  %v4828_v56 = vld [vmem:[#allocation13 + $0x128] sm:$0xff] }
  0x4f   :  { %3840 = vmatpush.msra.mxu1 %v243_v24  ;;  %307 = vmatpush.msra.mxu0 %v243_v24  ;;  %v4815_v51 = vld [vmem:[#allocation13 + $0xb8] sm:$0xff]  ;;  %v247_v54 = vld [vmem:[%s6594_s24 + $0x50] sm:$0xff]  ;;  %v244_v57 = vld [vmem:[%s6594_s24 + $0x38] sm:$0xff] }
  0x50   :  { %390 = vmatpush.msra.mxu2 %v242_v15  ;;  %508 = vmatpush.msra.mxu3 %v4731_v25  ;;  %v4826_v55 = vld [vmem:[#allocation13 + $0xa0] sm:$0xff]  ;;  %v4836_v58 = vld [vmem:[#allocation13 + $0x88] sm:$0xff]  ;;  %v4840_v60 = vld [vmem:[#allocation13 + $0x110] sm:$0xff] }
  0x51   :  { %3841 = vmatpush.msra.mxu1 %v240_v27  ;;  %308 = vmatpush.msra.mxu0 %v240_v27  ;;  %v4838_v59 = vld [vmem:[#allocation5 + $0x18] sm:$0xff]  ;;  %v4846_v61 = vld [vmem:[#allocation5 + $0x30] sm:$0xff]  ;;  %v4848_v62 = vld [vmem:[#allocation13 + $0x70] sm:$0xff] }
  0x52   :  { %391 = vmatpush.msra.mxu2 %v239_v18  ;;  %509 = vmatpush.msra.mxu3 %v4740_v28  ;;  %v4850_v63 = vld [vmem:[#allocation13 + $0xf8] sm:$0xff]  ;;  %v241_v0 = vld [vmem:[%s6594_s24 + $0x20] sm:$0xff]  ;;  %v4862_v4 = vld [vmem:[#allocation13 + $0xe0] sm:$0xff] }
  0x53   :  { %3771 = vmatmul.msk.f32.vlgmr.msra.gmra.mxu2 %vm269_vm0, %v4716_v20  ;;  %3842 = vmatpush.msra.mxu1 %v237_v30  ;;  %v4860_v2 = vld [vmem:[#allocation13 + $0x58] sm:$0xff]  ;;  %v4871_v8 = vld [vmem:[#allocation13 + $0x40] sm:$0xff]  ;;  %v4873_v10 = vld [vmem:[#allocation13 + $0xc8] sm:$0xff] }
  0x54   :  { %539 = vmatpush.msrb.mxu2 %v4723_v23  ;;  %510 = vmatpush.msra.mxu3 %v4749_v31  ;;  %v238_v6 = vld [vmem:[%s6594_s24 + $0x8] sm:$0xff]  ;;  %v4878_v11 = vld [vmem:[#allocation13 + $0x28] sm:$0xff]  ;;  %v4880_v12 = vld [vmem:[#allocation13 + $0xb0] sm:$0xff] }
  0x55   :  { %3759 = vmatmul.msk.f32.vlgmr.msra.gmra.mxu1 %vm269_vm0, %v4757_v34  ;;  %309 = vmatpush.msra.mxu0 %v237_v30  ;;  %v4885_v14 = vld [vmem:[#allocation5 + $0x38] sm:$0xff]  ;;  %v4887_v15 = vld [vmem:[#allocation13 + $0x10] sm:$0xff]  ;;  %v4890_v17 = vld [vmem:[#allocation13 + $0x98] sm:$0xff] }
  0x56   :  { %540 = vmatpush.msrb.mxu2 %v4733_v26  ;;  %511 = vmatpush.msra.mxu3 %v4759_v35  ;;  %v4904_v18 = vld [vmem:[#allocation13 + $0x68] sm:$0xff] }
  0x57   :  { %343 = vmatpush.msrb.mxu1 %v259_v37  ;;  %3755 = vmatmul.msk.f32.vlgmr.msra.gmra.mxu0 %vm269_vm0, %v4716_v20 }
  0x58   :  { %541 = vmatpush.msrb.mxu2 %v4742_v29  ;;  %512 = vmatpush.msra.mxu3 %v4770_v38 }
  0x59   :  { %344 = vmatpush.msrb.mxu1 %v256_v40  ;;  %833 = vmatpush.msrb.mxu0 %v4660_v1 }
  0x5a   :  { %542 = vmatpush.msrb.mxu2 %v4751_v32  ;;  %513 = vmatpush.msra.mxu3 %v4781_v41 }
  0x5b   :  { %3772 = vmatmul.msk.f32.gmra.mxu2 %vm269_vm0, %v4754_v33  ;;  %345 = vmatpush.msrb.mxu1 %v253_v43 }
  0x5c   :  { %543 = vmatpush.msrb.mxu2 %v4761_v36  ;;  %514 = vmatpush.msra.mxu3 %v4790_v44 }
  0x5d   :  { %515 = vmatmul.f32.vlgmr.msra.gmra.mxu3 %v4486_v53  ;;  %3760 = vmatmul.msk.f32.gmra.mxu1 %vm269_vm0, %v4802_v48 }
  0x5e   :  { %544 = vmatpush.msrb.mxu2 %v4774_v39  ;;  %519 = vmatpush.msrb.mxu3 %v4799_v47 }
  0x5f   :  { %346 = vmatpush.msrb.mxu1 %v250_v50  ;;  %834 = vmatpush.msrb.mxu0 %v4666_v3 }
  0x60   :  { %545 = vmatpush.msrb.mxu2 %v4783_v42  ;;  %520 = vmatpush.msrb.mxu3 %v4806_v49 }
  0x61   :  { %347 = vmatpush.msrb.mxu1 %v247_v54  ;;  %3756 = vmatmul.msk.f32.gmra.mxu0 %vm269_vm0, %v4754_v33 }
  0x62   :  { %546 = vmatpush.msrb.mxu2 %v4794_v45  ;;  %521 = vmatpush.msrb.mxu3 %v4817_v52 }
  0x63   :  { %3773 = vmatmul.msk.f32.gmra.mxu2 %vm269_vm0, %v4797_v46  ;;  %348 = vmatpush.msrb.mxu1 %v244_v57 }
  0x64   :  { %547 = vmatpush.msrb.mxu2 %v4815_v51  ;;  %522 = vmatpush.msrb.mxu3 %v4828_v56 }
  0x65   :  { %835 = vmatpush.msrb.mxu0 %v4671_v5  ;;  %3761 = vmatmul.msk.f32.gmra.mxu1 %vm269_vm0, %v4846_v61 }
  0x66   :  { %548 = vmatpush.msrb.mxu2 %v4826_v55  ;;  %523 = vmatpush.msrb.mxu3 %v4840_v60 }
  0x67   :  { %349 = vmatpush.msrb.mxu1 %v241_v0  ;;  %836 = vmatpush.msrb.mxu0 %v4677_v7 }
  0x68   :  { %549 = vmatpush.msrb.mxu2 %v4836_v58  ;;  %524 = vmatpush.msrb.mxu3 %v4850_v63 }
  0x69   :  { %350 = vmatpush.msrb.mxu1 %v238_v6  ;;  %837 = vmatpush.msrb.mxu0 %v4683_v9  ;;  %v5072_v6 = vld [vmem:[#allocation14] ss:$0 sm:$0xff] }
  0x6a   :  { %550 = vmatpush.msrb.mxu2 %v4848_v62  ;;  %525 = vmatpush.msrb.mxu3 %v4862_v4 }
  0x6b   :  { %3774 = vmatmul.msk.f32.gmra.mxu2 %vm269_vm0, %v4838_v59  ;;  %666 = vmatpush.msra.mxu1 %v4660_v1  ;;  %v4897_v1 = vld [vmem:[#allocation13 + $0x80] sm:$0xff] }
  0x6c   :  { %551 = vmatpush.msrb.mxu2 %v4860_v2  ;;  %526 = vmatpush.msrb.mxu3 %v4873_v10 }
  0x6d   :  { %667 = vmatpush.msra.mxu1 %v4666_v3  ;;  %838 = vmatpush.msrb.mxu0 %v4695_v13  ;;  %v4910_v3 = vld [vmem:[#allocation13 + $0x50] sm:$0xff] }
  0x6e   :  { %552 = vmatpush.msrb.mxu2 %v4871_v8  ;;  %527 = vmatpush.msrb.mxu3 %v4880_v12 }
  0x6f   :  { %3762 = vmatmul.msk.f32.gmra.mxu1 %vm269_vm0, %v4885_v14  ;;  %839 = vmatpush.msrb.mxu0 %v4704_v16 }
  0x70   :  { %553 = vmatpush.msrb.mxu2 %v4878_v11  ;;  %528 = vmatpush.msrb.mxu3 %v4890_v17 }
  0x71   :  { %668 = vmatpush.msra.mxu1 %v4671_v5  ;;  %v4916_v5 = vld [vmem:[#allocation13 + $0x38] sm:$0xff]  ;;  %840 = vmatpush.msrb.mxu0 %v4713_v19 }
  0x72   :  { %554 = vmatpush.msrb.mxu2 %v4887_v15  ;;  %529 = vmatpush.msrb.mxu3 %v4897_v1 }
  0x73   :  { %3775 = vmatmul.msk.f32.gmra.mxu2 %vm269_vm0, %v4757_v34  ;;  %669 = vmatpush.msra.mxu1 %v4677_v7  ;;  %v4923_v7 = vld [vmem:[#allocation13 + $0x20] sm:$0xff] }
  0x74   :  { %686 = vmatpush.msra.mxu2 %v4799_v47  ;;  %530 = vmatpush.msrb.mxu3 %v4904_v18 }
  0x75   :  { %670 = vmatpush.msra.mxu1 %v4683_v9  ;;  %v4930_v9 = vld [vmem:[#allocation13 + $0x8] sm:$0xff]  ;;  %3757 = vmatmul.msk.f32.gmra.mxu0 %vm269_vm0, %v4797_v46 }
  0x76   :  { %687 = vmatpush.msra.mxu2 %v4806_v49  ;;  %531 = vmatpush.msrb.mxu3 %v4910_v3 }
  0x77   :  { %3763 = vmatmul.msk.f32.vlgmr.msrb.gmra.mxu1 %vm269_vm0, %v4716_v20  ;;  %841 = vmatpush.msrb.mxu0 %v4721_v22  ;;  %v261_v20 = vld [vmem:[%s6549_s6] sm:$0x7]  ;;  %s3713_s6 = sshll.u32 %s4490_s19, 4  ;;  %s3714_s6 = int_to_ptr.vmem [resolvable:$true] %s3713_s6 }
  0x78   :  { %688 = vmatpush.msra.mxu2 %v4817_v52  ;;  %532 = vmatpush.msrb.mxu3 %v4916_v5  ;;  %v5060_v37 = vperm.slane %v261_v20, 1 }
  0x79   :  { %671 = vmatpush.msra.mxu1 %v4695_v13  ;;  %842 = vmatpush.msrb.mxu0 %v4731_v25 }
  0x7a   :  { %689 = vmatpush.msra.mxu2 %v4828_v56  ;;  %533 = vmatpush.msrb.mxu3 %v4923_v7 }
  0x7b   :  { %3776 = vmatmul.msk.f32.gmra.mxu2 %vm269_vm0, %v4802_v48  ;;  %672 = vmatpush.msra.mxu1 %v4704_v16 }
  0x7c   :  { %690 = vmatpush.msra.mxu2 %v4840_v60  ;;  %534 = vmatpush.msrb.mxu3 %v4930_v9 }
  0x7d   :  { %673 = vmatpush.msra.mxu1 %v4713_v19  ;;  %535 = vmatmul.f32.vlgmr.msrb.gmra.mxu3 %v4486_v53 }
  0x7e   :  { %691 = vmatpush.msra.mxu2 %v4850_v63  ;;  %706 = vmatpush.msra.mxu3 %v4723_v23 }
  0x7f   :  { %674 = vmatpush.msra.mxu1 %v4721_v22  ;;  %843 = vmatpush.msrb.mxu0 %v4740_v28 }
  0x80   :  { %692 = vmatpush.msra.mxu2 %v4862_v4  ;;  %3764 = vmatmul.msk.f32.gmra.mxu1 %vm269_vm0, %v4754_v33 }
  0x81   :  { %675 = vmatpush.msra.mxu1 %v4731_v25  ;;  %707 = vmatpush.msra.mxu3 %v4733_v26 }
  0x82   :  { %693 = vmatpush.msra.mxu2 %v4873_v10  ;;  %844 = vmatpush.msrb.mxu0 %v4749_v31 }
  0x83   :  { %3777 = vmatmul.msk.f32.gmra.mxu2 %vm269_vm0, %v4846_v61  ;;  %676 = vmatpush.msra.mxu1 %v4740_v28 }
  0x84   :  { %694 = vmatpush.msra.mxu2 %v4880_v12  ;;  %708 = vmatpush.msra.mxu3 %v4742_v29 }
  0x85   :  { %677 = vmatpush.msra.mxu1 %v4749_v31  ;;  %3758 = vmatmul.msk.f32.gmra.mxu0 %vm269_vm0, %v4838_v59 }
  0x86   :  { %695 = vmatpush.msra.mxu2 %v4890_v17  ;;  %709 = vmatpush.msra.mxu3 %v4751_v32 }
  0x87   :  { %678 = vmatpush.msra.mxu1 %v4759_v35  ;;  %845 = vmatpush.msrb.mxu0 %v4759_v35  ;;  %v5058_v35 = vperm.slane %v261_v20, 2 }
  0x88   :  { %3765 = vmatmul.msk.f32.gmra.mxu1 %vm269_vm0, %v4797_v46  ;;  %710 = vmatpush.msra.mxu3 %v4761_v36 }
  0x89   :  { %679 = vmatpush.msra.mxu1 %v4770_v38  ;;  %696 = vmatpush.msra.mxu2 %v4897_v1 }
  0x8a   :  { %711 = vmatpush.msra.mxu3 %v4774_v39  ;;  %846 = vmatpush.msrb.mxu0 %v4770_v38 }
  0x8b   :  { %3778 = vmatmul.msk.f32.gmra.mxu2 %vm269_vm0, %v4885_v14  ;;  %680 = vmatpush.msra.mxu1 %v4781_v41 }
  0x8c   :  { %697 = vmatpush.msra.mxu2 %v4904_v18  ;;  %712 = vmatpush.msra.mxu3 %v4783_v42 }
  0x8d   :  { %681 = vmatpush.msra.mxu1 %v4790_v44  ;;  %847 = vmatpush.msrb.mxu0 %v4781_v41 }
  0x8e   :  { %698 = vmatpush.msra.mxu2 %v4910_v3  ;;  %713 = vmatpush.msra.mxu3 %v4794_v45 }
  0x8f   :  { %853 = vmatpush.msrb.mxu1 %v4799_v47  ;;  %848 = vmatpush.msrb.mxu0 %v4790_v44 }
  0x90   :  { %3766 = vmatmul.msk.f32.gmra.mxu1 %vm269_vm0, %v4838_v59  ;;  %714 = vmatpush.msra.mxu3 %v4815_v51 }
  0x91   :  { %699 = vmatpush.msra.mxu2 %v4916_v5  ;;  %854 = vmatpush.msrb.mxu1 %v4806_v49 }
  0x92   :  { %715 = vmatpush.msra.mxu3 %v4826_v55 }
  0x93   :  { %555 = vmatmul.f32.vlgmr.msrb.gmra.mxu2 %v4486_v53  ;;  %855 = vmatpush.msrb.mxu1 %v4817_v52 }
  0x94   :  { %700 = vmatpush.msra.mxu2 %v4923_v7  ;;  %716 = vmatpush.msra.mxu3 %v4836_v58 }
  0x95   :  { %856 = vmatpush.msrb.mxu1 %v4828_v56 }
  0x96   :  { %701 = vmatpush.msra.mxu2 %v4930_v9  ;;  %717 = vmatpush.msra.mxu3 %v4848_v62 }
  0x97   :  { %857 = vmatpush.msrb.mxu1 %v4840_v60 }
  0x98   :  { %873 = vmatpush.msrb.mxu2 %v4723_v23  ;;  %3767 = vmatmul.msk.f32.gmra.mxu1 %vm269_vm0, %v4757_v34  ;;  %v5045_v23 = vperm.slane %v261_v20, 0 }
  0x99   :  { %718 = vmatpush.msra.mxu3 %v4860_v2  ;;  %858 = vmatpush.msrb.mxu1 %v4850_v63 }
  0x9a   :  { %874 = vmatpush.msrb.mxu2 %v4733_v26 }
  0x9b   :  { %719 = vmatpush.msra.mxu3 %v4871_v8  ;;  %859 = vmatpush.msrb.mxu1 %v4862_v4 }
  0x9c   :  { %875 = vmatpush.msrb.mxu2 %v4742_v29 }
  0x9d   :  { %720 = vmatpush.msra.mxu3 %v4878_v11  ;;  %860 = vmatpush.msrb.mxu1 %v4873_v10 }
  0x9e   :  { %876 = vmatpush.msrb.mxu2 %v4751_v32 }
  0x9f   :  { %721 = vmatpush.msra.mxu3 %v4887_v15  ;;  %861 = vmatpush.msrb.mxu1 %v4880_v12 }
  0xa0   :  { %877 = vmatpush.msrb.mxu2 %v4761_v36  ;;  %3768 = vmatmul.msk.f32.gmra.mxu1 %vm269_vm0, %v4802_v48 }
  0xa1   :  { %862 = vmatpush.msrb.mxu1 %v4890_v17 }
  0xa2   :  { %878 = vmatpush.msrb.mxu2 %v4774_v39 }
  0xa3   :  { %863 = vmatpush.msrb.mxu1 %v4897_v1 }
  0xa4   :  { %879 = vmatpush.msrb.mxu2 %v4783_v42 }
  0xa5   :  { %864 = vmatpush.msrb.mxu1 %v4904_v18 }
  0xa6   :  { %880 = vmatpush.msrb.mxu2 %v4794_v45 }
  0xa7   :  { %865 = vmatpush.msrb.mxu1 %v4910_v3 }
  0xa8   :  { %881 = vmatpush.msrb.mxu2 %v4815_v51  ;;  %3769 = vmatmul.msk.f32.gmra.mxu1 %vm269_vm0, %v4846_v61 }
  0xa9   :  { %866 = vmatpush.msrb.mxu1 %v4916_v5 }
  0xaa   :  { %882 = vmatpush.msrb.mxu2 %v4826_v55 }
  0xab   :  { %867 = vmatpush.msrb.mxu1 %v4923_v7 }
  0xac   :  { %883 = vmatpush.msrb.mxu2 %v4836_v58 }
  0xad   :  { %868 = vmatpush.msrb.mxu1 %v4930_v9 }
  0xae   :  { %884 = vmatpush.msrb.mxu2 %v4848_v62 }
  0xb0   :  { %885 = vmatpush.msrb.mxu2 %v4860_v2  ;;  %3770 = vmatmul.msk.f32.gmra.mxu1 %vm269_vm0, %v4885_v14 }
  0xb2   :  { %886 = vmatpush.msrb.mxu2 %v4871_v8 }
  0xb4   :  { %887 = vmatpush.msrb.mxu2 %v4878_v11 }
  0xb6   :  { %888 = vmatpush.msrb.mxu2 %v4887_v15 }
  0xd2   :  { %v5036_v16 = vpop.f32.mrf.mxu1 }
  0xd4   :  { %v311_v22 = vpop.f32.mrf.mxu0 }
  0xd5   :  { %v312_v24 = vadd.f32 %v311_v22, %v5045_v23 }
  0xd6   :  { %v393_v13 = vpop.f32.mrf.mxu2 }
  0xd7   :  { %v394_v7 = vadd.f32 %v393_v13, %v5058_v35 }
  0xda   :  { %v5043_v21 = vpop.f32.mrf.mxu1 }
  0xde   :  { %v5038_v19 = vpop.f32.mrf.mxu2 }
  0xe0   :  { %v516_v26 = vpop.f32.mrf.mxu3 }
  0xe1   :  { %v559_v27 = vadd.f32 %v516_v26, %v312_v24 }
  0xe2   :  { %v5050_v29 = vpop.f32.mrf.mxu1 }
  0xe3   :  { %v3779_v28 = vmul.f32 -1.442695, %v559_v27 }
  0xe5   :  { %3871 = vpow2.f32 %v3779_v28 }
  0xe6   :  { %v5048_v25 = vpop.f32.mrf.mxu2 }
  0xeb   :  { %v3872_v31 = vpop.eup %3871 }
  0xec   :  { %v5054_v32 = vpop.f32.mrf.mxu1  ;;  %v563_v34 = vadd.f32 1.0, %v3872_v31 }
  0xed   :  { %6595 = vst [vmem:[#allocation38_spill] sm:$0xff] %v5054_v32 }
  0xee   :  { %v5052_v30 = vpop.f32.mrf.mxu2  ;;  %3873 = vrcp.f32 %v563_v34  ;;  %vm569_vm1 = vweird.f32 %v563_v34  ;;  %v575_v57 = vand.u32 2147483648, %v563_v34  ;;  %v573_v0 = vand.u32 2147483647, %v563_v34 }
  0xf0   :  { %v576_v14 = vor.u32 1.1754944e-38, %v575_v57  ;;  %vm574_vm4 = vcmp.eq.f32.partialorder %v573_v0, 8.507059e+37  ;;  %v314_v57 = vpop.f32.mrf.mxu0 }
  0xf4   :  { %v352_v39 = vpop.f32.mrf.mxu1  ;;  %v3874_v40 = vpop.eup %3873 }
  0xf5   :  { %v353_v41 = vadd.f32 %v352_v39, %v5060_v37  ;;  %v565_v43 = vmul.f32 %v3874_v40, %v563_v34  ;;  %vm570_vm2 = vweird.f32 %v3874_v40 }
  0xf6   :  { %v5056_v33 = vpop.f32.mrf.mxu2  ;;  %vm571_vm3 = vmor %vm569_vm1, %vm570_vm2 }
  0xf7   :  { %v566_v49 = vsub.f32 1.0, %v565_v43 }
  0xf9   :  { %v567_v50 = vmul.f32 %v3874_v40, %v566_v49 }
  0xfb   :  { %v568_v61 = vadd.f32 %v3874_v40, %v567_v50 }
  0xfd   :  { %v572_v17 = vsel %vm571_vm3, %v3874_v40, %v568_v61 }
  0xfe   :  { %v408_v36 = vpop.f32.mrf.mxu2  ;;  %v577_v3 = vsel %vm574_vm4, %v576_v14, %v572_v17 }
  0xff   :  { %v5063_v38 = vadd.f32 %v408_v36, %v5058_v35 }
 0x100   :  { %v536_v42 = vpop.f32.mrf.mxu3 }
 0x101   :  { %v579_v44 = vadd.f32 %v536_v42, %v353_v41  ;;  %v449_v42 = vld [vmem:[#allocation8] sm:$0xff] }
 0x103   :  { %v3780_v48 = vmul.f32 -1.442695, %v579_v44  ;;  %v355_v44 = vpop.f32.mrf.mxu1 }
 0x104   :  { %v356_v17 = vadd.f32 %v355_v44, %v5060_v37 }
 0x105   :  { %3875 = vpow2.f32 %v3780_v48 }
 0x106   :  { %v411_v46 = vpop.f32.mrf.mxu2 }
 0x107   :  { %v5067_v47 = vadd.f32 %v411_v46, %v5058_v35 }
 0x109   :  { %6596 = vst [vmem:[#allocation39_spill] sm:$0xff] %v5067_v47 }
 0x10b   :  { %v3876_v56 = vpop.eup %3875  ;;  %v5081_v46 = vpop.f32.mrf.mxu1 }
 0x10c   :  { %v583_v59 = vadd.f32 1.0, %v3876_v56 }
 0x10e   :  { %v414_v53 = vpop.f32.mrf.mxu2  ;;  %3877 = vrcp.f32 %v583_v59  ;;  %v595_v26 = vand.u32 2147483648, %v583_v59  ;;  %v593_v28 = vand.u32 2147483647, %v583_v59  ;;  %vm589_vm6 = vweird.f32 %v583_v59 }
 0x10f   :  { %v5070_v54 = vadd.f32 %v414_v53, %v5058_v35 }
 0x110   :  { %v596_v34 = vor.u32 1.1754944e-38, %v595_v26  ;;  %vm594_vm8 = vcmp.eq.f32.partialorder %v593_v28, 8.507059e+37 }
 0x111   :  { %6597 = vst [vmem:[#allocation40_spill] sm:$0xff] %v5070_v54 }
 0x113   :  { %v5083_v48 = vpop.f32.mrf.mxu1 }
 0x114   :  { %v3878_v5 = vpop.eup %3877 }
 0x115   :  { %v585_v20 = vmul.f32 %v3878_v5, %v583_v59  ;;  %vm590_vm5 = vweird.f32 %v3878_v5  ;;  %v315_v59 = vadd.f32 %v314_v57, %v5045_v23 }
 0x116   :  { %v556_v1 = vpop.f32.mrf.mxu2  ;;  %vm591_vm7 = vmor %vm589_vm6, %vm590_vm5 }
 0x117   :  { %v599_v18 = vadd.f32 %v5072_v6, %v556_v1  ;;  %v586_v24 = vsub.f32 1.0, %v585_v20 }
 0x119   :  { %v600_v9 = vmul.f32 %v599_v18, %v577_v3  ;;  %v587_v27 = vmul.f32 %v3878_v5, %v586_v24 }
 0x11b   :  { %v601_v22 = vadd.f32 %v600_v9, %v394_v7  ;;  %v588_v31 = vadd.f32 %v3878_v5, %v587_v27  ;;  %v5085_v49 = vpop.f32.mrf.mxu1 }
 0x11d   :  { %3879 = vtanh.f32 %v601_v22  ;;  %v592_v36 = vsel %vm591_vm7, %v3878_v5, %v588_v31 }
 0x11e   :  { %v597_v39 = vsel %vm594_vm8, %v596_v34, %v592_v36 }
 0x11f   :  { %v603_v40 = vsub.f32 1.0, %v597_v39 }
 0x123   :  { %v3880_v41 = vpop.eup %3879  ;;  %v5087_v50 = vpop.f32.mrf.mxu1 }
 0x124   :  { %v605_v13 = vmul.f32 %v3880_v41, %v603_v40 }
 0x126   :  { %v5076_v43 = vmul.f32 %v605_v13, %v449_v42 }
 0x128   :  { %682 = vmatmul.f32.vlgmr.msra.gmra.mxu1 %v5076_v43  ;;  %702 = vmatmul.f32.vlgmr.msra.gmra.mxu2 %v5076_v43 }
 0x129   :  { %722 = vmatmul.f32.vlgmr.msra.gmra.mxu3 %v5076_v43 }
 0x12b   :  { %v5089_v53 = vpop.f32.mrf.mxu1 }
 0x12c   :  { %6598 = vst [vmem:[#allocation41_spill] sm:$0xff] %v5089_v53 }
 0x133   :  { %v5091_v56 = vpop.f32.mrf.mxu1 }
 0x134   :  { %6599 = vst [vmem:[#allocation42_spill] sm:$0xff] %v5091_v56 }
 0x1a5   :  { %v683_v61 = vpop.f32.mrf.mxu1 }
 0x1a6   :  { %v726_v0 = vadd.f32 %v683_v61, %v315_v59  ;;  %v397_v59 = vadd.f32 %v5038_v19, %v5058_v35 }
 0x1a8   :  { %v3781_v14 = vmul.f32 -1.442695, %v726_v0 }
 0x1aa   :  { %3881 = vpow2.f32 %v3781_v14 }
 0x1ab   :  { %v703_v1 = vpop.f32.mrf.mxu2 }
 0x1ac   :  { %v746_v18 = vadd.f32 %v703_v1, %v356_v17  ;;  %v723_v36 = vpop.f32.mrf.mxu3 }
 0x1ad   :  { %v766_v44 = vadd.f32 %v5072_v6, %v723_v36 }
 0x1ae   :  { %v3782_v3 = vmul.f32 -1.442695, %v746_v18 }
 0x1b0   :  { %v3882_v5 = vpop.eup %3881  ;;  %3883 = vpow2.f32 %v3782_v3 }
 0x1b1   :  { %v730_v7 = vadd.f32 1.0, %v3882_v5 }
 0x1b3   :  { %3885 = vrcp.f32 %v730_v7  ;;  %v742_v27 = vand.u32 2147483648, %v730_v7  ;;  %v740_v31 = vand.u32 2147483647, %v730_v7  ;;  %vm736_vm10 = vweird.f32 %v730_v7 }
 0x1b5   :  { %v743_v41 = vor.u32 1.1754944e-38, %v742_v27  ;;  %vm741_vm12 = vcmp.eq.f32.partialorder %v740_v31, 8.507059e+37  ;;  %v616_v27 = vld [vmem:[#allocation8 + $0x8] sm:$0xff] }
 0x1b6   :  { %v3884_v9 = vpop.eup %3883 }
 0x1b7   :  { %v750_v20 = vadd.f32 1.0, %v3884_v9 }
 0x1b9   :  { %v3886_v22 = vpop.eup %3885  ;;  %3887 = vrcp.f32 %v750_v20  ;;  %v762_v17 = vand.u32 2147483648, %v750_v20  ;;  %vm756_vm14 = vweird.f32 %v750_v20  ;;  %v760_v18 = vand.u32 2147483647, %v750_v20 }
 0x1ba   :  { %v732_v24 = vmul.f32 %v3886_v22, %v730_v7  ;;  %vm737_vm9 = vweird.f32 %v3886_v22 }
 0x1bb   :  { %vm738_vm11 = vmor %vm736_vm10, %vm737_vm9  ;;  %v763_v5 = vor.u32 1.1754944e-38, %v762_v17  ;;  %vm761_vm1 = vcmp.eq.f32.partialorder %v760_v18, 8.507059e+37 }
 0x1bc   :  { %v733_v26 = vsub.f32 1.0, %v732_v24 }
 0x1be   :  { %v734_v28 = vmul.f32 %v3886_v22, %v733_v26 }
 0x1bf   :  { %v3888_v34 = vpop.eup %3887 }
 0x1c0   :  { %v752_v39 = vmul.f32 %v3888_v34, %v750_v20  ;;  %v735_v40 = vadd.f32 %v3886_v22, %v734_v28  ;;  %vm757_vm13 = vweird.f32 %v3888_v34  ;;  %v317_v20 = vpop.f32.mrf.mxu0 }
 0x1c1   :  { %vm758_vm15 = vmor %vm756_vm14, %vm757_vm13  ;;  %v318_v17 = vadd.f32 %v317_v20, %v5045_v23  ;;  %v5205_v20 = vld [vmem:[#allocation13 + $0x60] sm:$0xff] }
 0x1c2   :  { %v753_v42 = vsub.f32 1.0, %v752_v39  ;;  %v739_v13 = vsel %vm738_vm11, %v3886_v22, %v735_v40  ;;  %v5109_v39 = vld [vmem:[#allocation13 + $0x168] sm:$0xff]  ;;  %v5111_v40 = vld [vmem:[#allocation13 + $0x170] sm:$0xff] }
 0x1c3   :  { %v744_v57 = vsel %vm741_vm12, %v743_v41, %v739_v13  ;;  %v5113_v41 = vld [vmem:[#allocation13 + $0x178] sm:$0xff]  ;;  %1000 = vmatpush.msrb.mxu3 %v5109_v39  ;;  %1020 = vmatpush.msra.mxu0 %v5111_v40  ;;  %v5122_v13 = vld [vmem:[#allocation13 + $0x160] sm:$0xff] }
 0x1c4   :  { %v754_v61 = vmul.f32 %v3888_v34, %v753_v42  ;;  %v767_v0 = vmul.f32 %v766_v44, %v744_v57  ;;  %1040 = vmatpush.msra.mxu1 %v5113_v41  ;;  %v5120_v42 = vld [vmem:[#allocation13 + $0x158] sm:$0xff]  ;;  %1167 = vmatpush.msra.mxu2 %v5109_v39  ;;  %v5130_v57 = vld [vmem:[#allocation13 + $0x148] sm:$0xff] }
 0x1c5   :  { %1021 = vmatpush.msra.mxu0 %v5120_v42  ;;  %v5128_v44 = vld [vmem:[#allocation13 + $0x138] sm:$0xff] }
 0x1c6   :  { %v755_v14 = vadd.f32 %v3888_v34, %v754_v61  ;;  %v768_v1 = vadd.f32 %v767_v0, %v397_v59  ;;  %1041 = vmatpush.msra.mxu1 %v5122_v13  ;;  %v5136_v59 = vld [vmem:[#allocation13 + $0x120] sm:$0xff]  ;;  %v5138_v61 = vld [vmem:[#allocation13 + $0x128] sm:$0xff]  ;;  %v5140_v0 = vld [vmem:[#allocation13 + $0x130] sm:$0xff] }
 0x1c7   :  { %1022 = vmatpush.msra.mxu0 %v4817_v52  ;;  %v5149_v52 = vld [vmem:[#allocation13 + $0x108] sm:$0xff] }
 0x1c8   :  { %3889 = vtanh.f32 %v768_v1  ;;  %v759_v3 = vsel %vm758_vm15, %v3888_v34, %v755_v14  ;;  %v5107_v34 = vpop.f32.mrf.mxu0  ;;  %1042 = vmatpush.msra.mxu1 %v5130_v57  ;;  %v359_v14 = vadd.f32 %v5081_v46, %v5060_v37  ;;  %v5151_v1 = vld [vmem:[#allocation13 + $0x118] sm:$0xff]  ;;  %v5157_v46 = vld [vmem:[#allocation13 + $0xf0] sm:$0xff] }
 0x1c9   :  { %v764_v7 = vsel %vm761_vm1, %v763_v5, %v759_v3  ;;  %1023 = vmatpush.msra.mxu0 %v5138_v61 }
 0x1ca   :  { %v770_v22 = vsub.f32 1.0, %v764_v7  ;;  %1043 = vmatpush.msra.mxu1 %v5140_v0 }
 0x1cb   :  { %1024 = vmatpush.msra.mxu0 %v4840_v60  ;;  %v5167_v60 = vld [vmem:[#allocation13 + $0xe8] sm:$0xff] }
 0x1cc   :  { %1044 = vmatpush.msra.mxu1 %v5151_v1 }
 0x1cd   :  { %1025 = vmatpush.msra.mxu0 %v4850_v63  ;;  %v5179_v63 = vld [vmem:[#allocation13 + $0xa8] sm:$0xff] }
 0x1ce   :  { %v3890_v9 = vpop.eup %3889 }
 0x1cf   :  { %v771_v24 = vsub.f32 %v3890_v9, %v5076_v43  ;;  %v5159_v9 = vld [vmem:[#allocation13 + $0x100] sm:$0xff]  ;;  %1026 = vmatpush.msra.mxu0 %v4862_v4  ;;  %v5185_v4 = vld [vmem:[#allocation13 + $0x90] sm:$0xff] }
 0x1d0   :  { %1045 = vmatpush.msra.mxu1 %v5159_v9 }
 0x1d1   :  { %v772_v26 = vmul.f32 %v771_v24, %v770_v22  ;;  %1027 = vmatpush.msra.mxu0 %v4873_v10  ;;  %v5193_v10 = vld [vmem:[#allocation13 + $0x78] sm:$0xff] }
 0x1d2   :  { %1046 = vmatpush.msra.mxu1 %v5167_v60 }
 0x1d3   :  { %v773_v19 = vadd.f32 %v772_v26, %v5076_v43  ;;  %v5165_v26 = vld [vmem:[#allocation13 + $0xd8] sm:$0xff]  ;;  %1028 = vmatpush.msra.mxu0 %v4880_v12 }
 0x1d4   :  { %1047 = vmatpush.msra.mxu1 %v4794_v45 }
 0x1d5   :  { %v774_v28 = vsub.f32 %v773_v19, %v5076_v43  ;;  %v5173_v19 = vld [vmem:[#allocation13 + $0xc0] sm:$0xff] }
 0x1d6   :  { %1048 = vmatpush.msra.mxu1 %v4815_v51 }
 0x1d7   :  { %v775_v31 = vmul.f32 %v774_v28, %v616_v27  ;;  %v5187_v27 = vld [vmem:[#allocation13 + $0x98] sm:$0xff]  ;;  %v5195_v28 = vld [vmem:[#allocation13 + $0x80] sm:$0xff] }
 0x1d8   :  { %1029 = vmatpush.msra.mxu0 %v5187_v27  ;;  %1049 = vmatpush.msra.mxu1 %v4826_v55  ;;  %v5207_v55 = vld [vmem:[#allocation13 + $0x68] sm:$0xff] }
 0x1d9   :  { %v5102_v36 = vadd.f32 %v775_v31, %v5076_v43  ;;  %v5118_v43 = vld [vmem:[#allocation13 + $0x150] sm:$0xff] }
 0x1da   :  { %1001 = vmatpush.msrb.mxu3 %v5118_v43  ;;  %1168 = vmatpush.msra.mxu2 %v5118_v43 }
 0x1db   :  { %849 = vmatmul.f32.vlgmr.msrb.gmra.mxu0 %v5102_v36  ;;  %869 = vmatmul.f32.vlgmr.msrb.gmra.mxu1 %v5102_v36 }
 0x1dc   :  { %889 = vmatmul.f32.vlgmr.msrb.gmra.mxu2 %v5102_v36  ;;  %1002 = vmatpush.msrb.mxu3 %v5128_v44 }
 0x1dd   :  { %1169 = vmatpush.msra.mxu2 %v5128_v44  ;;  %1030 = vmatpush.msra.mxu0 %v5195_v28 }
 0x1de   :  { %1003 = vmatpush.msrb.mxu3 %v5136_v59  ;;  %1050 = vmatpush.msra.mxu1 %v4836_v58  ;;  %v5223_v58 = vld [vmem:[#allocation13 + $0x30] sm:$0xff] }
 0x1df   :  { %1170 = vmatpush.msra.mxu2 %v5136_v59  ;;  %1031 = vmatpush.msra.mxu0 %v5207_v55 }
 0x1e0   :  { %1004 = vmatpush.msrb.mxu3 %v5149_v52  ;;  %1051 = vmatpush.msra.mxu1 %v4848_v62  ;;  %v5231_v62 = vld [vmem:[#allocation13 + $0x18] sm:$0xff] }
 0x1e1   :  { %1171 = vmatpush.msra.mxu2 %v5149_v52 }
 0x1e2   :  { %1005 = vmatpush.msrb.mxu3 %v5157_v46  ;;  %1052 = vmatpush.msra.mxu1 %v4860_v2  ;;  %v5238_v2 = vld [vmem:[#allocation13] sm:$0xff] }
 0x1e3   :  { %1172 = vmatpush.msra.mxu2 %v5157_v46 }
 0x1e4   :  { %1006 = vmatpush.msrb.mxu3 %v5165_v26  ;;  %1053 = vmatpush.msra.mxu1 %v4871_v8 }
 0x1e5   :  { %1173 = vmatpush.msra.mxu2 %v5165_v26 }
 0x1e6   :  { %1007 = vmatpush.msrb.mxu3 %v5173_v19  ;;  %1054 = vmatpush.msra.mxu1 %v4878_v11 }
 0x1e7   :  { %1174 = vmatpush.msra.mxu2 %v5173_v19 }
 0x1e8   :  { %1008 = vmatpush.msrb.mxu3 %v5179_v63  ;;  %1055 = vmatpush.msra.mxu1 %v4887_v15 }
 0x1e9   :  { %1175 = vmatpush.msra.mxu2 %v5179_v63 }
 0x1ea   :  { %1009 = vmatpush.msrb.mxu3 %v5185_v4  ;;  %1334 = vmatpush.msrb.mxu1 %v5109_v39 }
 0x1eb   :  { %1176 = vmatpush.msra.mxu2 %v5185_v4 }
 0x1ec   :  { %1010 = vmatpush.msrb.mxu3 %v5193_v10  ;;  %1335 = vmatpush.msrb.mxu1 %v5118_v43 }
 0x1ed   :  { %1177 = vmatpush.msra.mxu2 %v5193_v10 }
 0x1ee   :  { %1011 = vmatpush.msrb.mxu3 %v5205_v20  ;;  %1336 = vmatpush.msrb.mxu1 %v5128_v44 }
 0x1ef   :  { %1178 = vmatpush.msra.mxu2 %v5205_v20 }
 0x1f0   :  { %1337 = vmatpush.msrb.mxu1 %v5136_v59 }
 0x1f2   :  { %1338 = vmatpush.msrb.mxu1 %v5149_v52 }
 0x1f4   :  { %1339 = vmatpush.msrb.mxu1 %v5157_v46 }
 0x1f6   :  { %1340 = vmatpush.msrb.mxu1 %v5165_v26 }
 0x1f8   :  { %1341 = vmatpush.msrb.mxu1 %v5173_v19 }
 0x1fa   :  { %1342 = vmatpush.msrb.mxu1 %v5179_v63 }
 0x1fc   :  { %1343 = vmatpush.msrb.mxu1 %v5185_v4 }
 0x1fe   :  { %1344 = vmatpush.msrb.mxu1 %v5193_v10 }
 0x200   :  { %1345 = vmatpush.msrb.mxu1 %v5205_v20 }
 0x258   :  { %v850_v18 = vpop.f32.mrf.mxu0  ;;  %v870_v3 = vpop.f32.mrf.mxu1 }
 0x259   :  { %v893_v5 = vadd.f32 %v850_v18, %v318_v17  ;;  %v913_v7 = vadd.f32 %v870_v3, %v359_v14  ;;  %v5215_v14 = vld [vmem:[#allocation13 + $0x48] sm:$0xff]  ;;  %v5217_v17 = vld [vmem:[#allocation13 + $0x50] sm:$0xff]  ;;  %v5225_v18 = vld [vmem:[#allocation13 + $0x38] sm:$0xff] }
 0x25a   :  { %1012 = vmatpush.msrb.mxu3 %v5215_v14  ;;  %1032 = vmatpush.msra.mxu0 %v5217_v17  ;;  %v5233_v3 = vld [vmem:[#allocation13 + $0x20] sm:$0xff] }
 0x25b   :  { %v3783_v22 = vmul.f32 -1.442695, %v893_v5  ;;  %v3784_v24 = vmul.f32 -1.442695, %v913_v7  ;;  %1179 = vmatpush.msra.mxu2 %v5215_v14  ;;  %v5240_v7 = vld [vmem:[#allocation13 + $0x8] sm:$0xff]  ;;  %1346 = vmatpush.msrb.mxu1 %v5215_v14 }
 0x25c   :  { %1013 = vmatpush.msrb.mxu3 %v5223_v58  ;;  %1033 = vmatpush.msra.mxu0 %v5225_v18 }
 0x25d   :  { %3891 = vpow2.f32 %v3783_v22  ;;  %1180 = vmatpush.msra.mxu2 %v5223_v58  ;;  %1347 = vmatpush.msrb.mxu1 %v5223_v58 }
 0x25e   :  { %3893 = vpow2.f32 %v3784_v24  ;;  %1014 = vmatpush.msrb.mxu3 %v5231_v62  ;;  %1034 = vmatpush.msra.mxu0 %v5233_v3 }
 0x25f   :  { %1181 = vmatpush.msra.mxu2 %v5231_v62  ;;  %1348 = vmatpush.msrb.mxu1 %v5231_v62 }
 0x260   :  { %1015 = vmatpush.msrb.mxu3 %v5238_v2  ;;  %1035 = vmatpush.msra.mxu0 %v5240_v7 }
 0x261   :  { %1182 = vmatpush.msra.mxu2 %v5238_v2  ;;  %1349 = vmatpush.msrb.mxu1 %v5238_v2 }
 0x262   :  { %1187 = vmatpush.msra.mxu3 %v5111_v40  ;;  %1207 = vmatpush.msrb.mxu0 %v5113_v41 }
 0x263   :  { %v3892_v45 = vpop.eup %3891  ;;  %1354 = vmatpush.msrb.mxu2 %v5111_v40 }
 0x264   :  { %v3894_v51 = vpop.eup %3893  ;;  %v5198_v12 = vadd.f32 1.0, %v3892_v45  ;;  %1188 = vmatpush.msra.mxu3 %v5120_v42  ;;  %1208 = vmatpush.msrb.mxu0 %v5122_v13 }
 0x265   :  { %v5202_v31 = vadd.f32 1.0, %v3894_v51  ;;  %1355 = vmatpush.msrb.mxu2 %v5120_v42 }
 0x266   :  { %3895 = vrcp.f32 %v5198_v12  ;;  %v909_v54 = vand.u32 2147483648, %v5198_v12  ;;  %v907_v32 = vand.u32 2147483647, %v5198_v12  ;;  %vm903_vm3 = vweird.f32 %v5198_v12  ;;  %1209 = vmatpush.msrb.mxu0 %v5130_v57 }
 0x267   :  { %3897 = vrcp.f32 %v5202_v31  ;;  %vm923_vm7 = vweird.f32 %v5202_v31 }
 0x268   :  { %vm908_vm5 = vcmp.eq.f32.partialorder %v907_v32, 8.507059e+37  ;;  %1210 = vmatpush.msrb.mxu0 %v5140_v0 }
 0x26a   :  { %1211 = vmatpush.msrb.mxu0 %v5151_v1 }
 0x26c   :  { %v3896_v5 = vpop.eup %3895  ;;  %1212 = vmatpush.msrb.mxu0 %v5159_v9 }
 0x26d   :  { %v3898_v22 = vpop.eup %3897  ;;  %v899_v24 = vmul.f32 %v3896_v5, %v5198_v12  ;;  %vm904_vm2 = vweird.f32 %v3896_v5  ;;  %v400_v12 = vadd.f32 %v5048_v25, %v5058_v35 }
 0x26e   :  { %v919_v8 = vmul.f32 %v3898_v22, %v5202_v31  ;;  %vm905_vm4 = vmor %vm903_vm3, %vm904_vm2  ;;  %vm924_vm6 = vweird.f32 %v3898_v22  ;;  %1213 = vmatpush.msrb.mxu0 %v5167_v60 }
 0x26f   :  { %v900_v45 = vsub.f32 1.0, %v899_v24  ;;  %v890_v24 = vpop.f32.mrf.mxu2  ;;  %vm925_vm8 = vmor %vm923_vm7, %vm924_vm6 }
 0x270   :  { %v920_v51 = vsub.f32 1.0, %v919_v8  ;;  %v933_v47 = vadd.f32 %v5072_v6, %v890_v24 }
 0x271   :  { %v901_v11 = vmul.f32 %v3896_v5, %v900_v45  ;;  %v910_v45 = vor.u32 1.1754944e-38, %v909_v54 }
 0x272   :  { %v921_v8 = vmul.f32 %v3898_v22, %v920_v51 }
 0x273   :  { %v902_v15 = vadd.f32 %v3896_v5, %v901_v11 }
 0x274   :  { %v922_v54 = vadd.f32 %v3898_v22, %v921_v8  ;;  %v783_v8 = vld [vmem:[#allocation8 + $0x10] sm:$0xff] }
 0x275   :  { %v906_v56 = vsel %vm905_vm4, %v3896_v5, %v902_v15  ;;  %v929_v5 = vand.u32 2147483648, %v5202_v31 }
 0x276   :  { %v911_v53 = vsel %vm908_vm5, %v910_v45, %v906_v56  ;;  %v927_v56 = vand.u32 2147483647, %v5202_v31  ;;  %v926_v25 = vsel %vm925_vm8, %v3898_v22, %v922_v54  ;;  %v362_v54 = vadd.f32 %v5083_v48, %v5060_v37  ;;  %v5308_v48 = vld [vmem:[#allocation13 + $0x110] sm:$0xff] }
 0x277   :  { %v934_v11 = vmul.f32 %v933_v47, %v911_v53  ;;  %v930_v47 = vor.u32 1.1754944e-38, %v929_v5 }
 0x278   :  { %vm928_vm9 = vcmp.eq.f32.partialorder %v927_v56, 8.507059e+37 }
 0x279   :  { %v935_v32 = vadd.f32 %v934_v11, %v400_v12  ;;  %v931_v53 = vsel %vm928_vm9, %v930_v47, %v926_v25  ;;  %v5313_v47 = vld [vmem:[#allocation13 + $0xf8] sm:$0xff] }
 0x27a   :  { %v937_v31 = vsub.f32 1.0, %v931_v53  ;;  %v5318_v53 = vld [vmem:[#allocation13 + $0xe0] sm:$0xff] }
 0x27b   :  { %3899 = vtanh.f32 %v935_v32  ;;  %v5299_v32 = vld [vmem:[#allocation13 + $0x140] sm:$0xff] }
 0x27c   :  { %1189 = vmatpush.msra.mxu3 %v5299_v32  ;;  %1356 = vmatpush.msrb.mxu2 %v5299_v32 }
 0x27e   :  { %1190 = vmatpush.msra.mxu3 %v5138_v61  ;;  %1357 = vmatpush.msrb.mxu2 %v5138_v61 }
 0x280   :  { %1191 = vmatpush.msra.mxu3 %v5308_v48  ;;  %1358 = vmatpush.msrb.mxu2 %v5308_v48 }
 0x281   :  { %v3900_v51 = vpop.eup %3899 }
 0x282   :  { %v938_v24 = vsub.f32 %v3900_v51, %v5102_v36  ;;  %1192 = vmatpush.msra.mxu3 %v5313_v47  ;;  %1359 = vmatpush.msrb.mxu2 %v5313_v47  ;;  %v5323_v51 = vld [vmem:[#allocation13 + $0xc8] sm:$0xff] }
 0x284   :  { %v939_v15 = vmul.f32 %v938_v24, %v937_v31  ;;  %1193 = vmatpush.msra.mxu3 %v5318_v53  ;;  %1360 = vmatpush.msrb.mxu2 %v5318_v53  ;;  %v5325_v31 = vld [vmem:[#allocation13 + $0xd0] sm:$0xff] }
 0x285   :  { %1214 = vmatpush.msrb.mxu0 %v5325_v31 }
 0x286   :  { %v940_v22 = vadd.f32 %v939_v15, %v5102_v36  ;;  %1194 = vmatpush.msra.mxu3 %v5323_v51  ;;  %v5332_v15 = vld [vmem:[#allocation13 + $0xb0] sm:$0xff]  ;;  %1361 = vmatpush.msrb.mxu2 %v5323_v51 }
 0x287   :  { %6600 = vst [vmem:[#allocation43_spill] sm:$0xff] %v5332_v15 }
 0x288   :  { %v941_v45 = vsub.f32 %v940_v22, %v5102_v36  ;;  %v5334_v22 = vld [vmem:[#allocation13 + $0xb8] sm:$0xff]  ;;  %1195 = vmatpush.msra.mxu3 %v5332_v15  ;;  %1362 = vmatpush.msrb.mxu2 %v5332_v15 }
 0x289   :  { %1215 = vmatpush.msrb.mxu0 %v5334_v22 }
 0x28a   :  { %v942_v12 = vmul.f32 %v941_v45, %v783_v8  ;;  %v5340_v8 = vld [vmem:[#allocation13 + $0xa0] sm:$0xff]  ;;  %1196 = vmatpush.msra.mxu3 %v5187_v27  ;;  %1363 = vmatpush.msrb.mxu2 %v5187_v27 }
 0x28b   :  { %1216 = vmatpush.msrb.mxu0 %v5340_v8 }
 0x28c   :  { %v5288_v11 = vadd.f32 %v942_v12, %v5102_v36  ;;  %v5347_v12 = vld [vmem:[#allocation13 + $0x88] sm:$0xff]  ;;  %1197 = vmatpush.msra.mxu3 %v5195_v28  ;;  %1364 = vmatpush.msrb.mxu2 %v5195_v28 }
 0x28d   :  { %1217 = vmatpush.msrb.mxu0 %v5347_v12 }
 0x28e   :  { %1016 = vmatmul.f32.vlgmr.msrb.gmra.mxu3 %v5288_v11  ;;  %1036 = vmatmul.f32.vlgmr.msra.gmra.mxu0 %v5288_v11 }
 0x28f   :  { %1056 = vmatmul.f32.vlgmr.msra.gmra.mxu1 %v5288_v11  ;;  %1198 = vmatpush.msra.mxu3 %v5207_v55 }
 0x290   :  { %1521 = vmatpush.msra.mxu1 %v5111_v40  ;;  %v321_v40 = vadd.f32 %v5107_v34, %v5045_v23  ;;  %1365 = vmatpush.msrb.mxu2 %v5207_v55 }
 0x291   :  { %1199 = vmatpush.msra.mxu3 %v5217_v17 }
 0x292   :  { %1522 = vmatpush.msra.mxu1 %v5120_v42  ;;  %1366 = vmatpush.msrb.mxu2 %v5217_v17 }
 0x293   :  { %1200 = vmatpush.msra.mxu3 %v5225_v18 }
 0x294   :  { %1523 = vmatpush.msra.mxu1 %v5299_v32  ;;  %1367 = vmatpush.msrb.mxu2 %v5225_v18 }
 0x295   :  { %1201 = vmatpush.msra.mxu3 %v5233_v3 }
 0x296   :  { %1524 = vmatpush.msra.mxu1 %v5138_v61  ;;  %1368 = vmatpush.msrb.mxu2 %v5233_v3 }
 0x297   :  { %1202 = vmatpush.msra.mxu3 %v5240_v7 }
 0x298   :  { %1525 = vmatpush.msra.mxu1 %v5308_v48  ;;  %1369 = vmatpush.msrb.mxu2 %v5240_v7 }
 0x299   :  { %1374 = vmatpush.msrb.mxu3 %v5113_v41 }
 0x29a   :  { %1526 = vmatpush.msra.mxu1 %v5313_v47 }
 0x29b   :  { %1375 = vmatpush.msrb.mxu3 %v5122_v13 }
 0x29c   :  { %1527 = vmatpush.msra.mxu1 %v5318_v53 }
 0x29d   :  { %1376 = vmatpush.msrb.mxu3 %v5130_v57 }
 0x29e   :  { %1528 = vmatpush.msra.mxu1 %v5323_v51 }
 0x29f   :  { %1377 = vmatpush.msrb.mxu3 %v5140_v0 }
 0x2a0   :  { %1529 = vmatpush.msra.mxu1 %v5332_v15 }
 0x2a1   :  { %1378 = vmatpush.msrb.mxu3 %v5151_v1 }
 0x2a2   :  { %1530 = vmatpush.msra.mxu1 %v5187_v27 }
 0x2a3   :  { %1379 = vmatpush.msrb.mxu3 %v5159_v9 }
 0x2a4   :  { %1531 = vmatpush.msra.mxu1 %v5195_v28  ;;  %v5375_v28 = vld [vmem:[#allocation13 + $0x10] sm:$0xff] }
 0x2a5   :  { %1380 = vmatpush.msrb.mxu3 %v5167_v60 }
 0x2a6   :  { %1532 = vmatpush.msra.mxu1 %v5207_v55 }
 0x2a7   :  { %1381 = vmatpush.msrb.mxu3 %v5325_v31 }
 0x2a8   :  { %1533 = vmatpush.msra.mxu1 %v5217_v17 }
 0x2a9   :  { %1382 = vmatpush.msrb.mxu3 %v5334_v22 }
 0x2aa   :  { %1534 = vmatpush.msra.mxu1 %v5225_v18 }
 0x2ab   :  { %1383 = vmatpush.msrb.mxu3 %v5340_v8 }
 0x2ac   :  { %1535 = vmatpush.msra.mxu1 %v5233_v3 }
 0x2ad   :  { %1384 = vmatpush.msrb.mxu3 %v5347_v12 }
 0x2ae   :  { %1536 = vmatpush.msra.mxu1 %v5240_v7 }
 0x30b   :  { %v1037_v5 = vpop.f32.mrf.mxu0 }
 0x30c   :  { %v1080_v36 = vadd.f32 %v1037_v5, %v362_v54  ;;  %v5353_v5 = vld [vmem:[#allocation13 + $0x70] sm:$0xff]  ;;  %v1057_v3 = vpop.f32.mrf.mxu1 }
 0x30d   :  { %1218 = vmatpush.msrb.mxu0 %v5353_v5  ;;  %1385 = vmatpush.msrb.mxu3 %v5353_v5 }
 0x30e   :  { %v3786_v56 = vmul.f32 -1.442695, %v1080_v36  ;;  %v5355_v36 = vld [vmem:[#allocation13 + $0x58] sm:$0xff] }
 0x30f   :  { %1219 = vmatpush.msrb.mxu0 %v5355_v36  ;;  %1386 = vmatpush.msrb.mxu3 %v5355_v36 }
 0x310   :  { %3901 = vpow2.f32 %v3786_v56  ;;  %v5361_v56 = vld [vmem:[#allocation13 + $0x40] sm:$0xff] }
 0x311   :  { %v1017_v42 = vpop.f32.mrf.mxu3  ;;  %1220 = vmatpush.msrb.mxu0 %v5361_v56  ;;  %1387 = vmatpush.msrb.mxu3 %v5361_v56 }
 0x312   :  { %v1060_v25 = vadd.f32 %v1017_v42, %v321_v40  ;;  %v5369_v40 = vld [vmem:[#allocation13 + $0x28] sm:$0xff] }
 0x313   :  { %1221 = vmatpush.msrb.mxu0 %v5369_v40  ;;  %1388 = vmatpush.msrb.mxu3 %v5369_v40 }
 0x314   :  { %v3785_v34 = vmul.f32 -1.442695, %v1060_v25 }
 0x315   :  { %1222 = vmatpush.msrb.mxu0 %v5375_v28  ;;  %1389 = vmatpush.msrb.mxu3 %v5375_v28 }
 0x316   :  { %v3902_v61 = vpop.eup %3901  ;;  %3903 = vpow2.f32 %v3785_v34 }
 0x317   :  { %v5330_v24 = vadd.f32 1.0, %v3902_v61  ;;  %1501 = vmatpush.msra.mxu0 %v5109_v39  ;;  %v1100_v39 = vadd.f32 %v5072_v6, %v1057_v3 }
 0x319   :  { %3905 = vrcp.f32 %v5330_v24  ;;  %1502 = vmatpush.msra.mxu0 %v5118_v43  ;;  %v403_v43 = vadd.f32 %v5052_v30, %v5058_v35  ;;  %vm1090_vm15 = vweird.f32 %v5330_v24 }
 0x31b   :  { %1503 = vmatpush.msra.mxu0 %v5128_v44  ;;  %v1096_v44 = vand.u32 2147483648, %v5330_v24 }
 0x31c   :  { %v3904_v45 = vpop.eup %3903 }
 0x31d   :  { %v1064_v54 = vadd.f32 1.0, %v3904_v45  ;;  %1504 = vmatpush.msra.mxu0 %v5136_v59  ;;  %v1094_v59 = vand.u32 2147483647, %v5330_v24 }
 0x31f   :  { %3907 = vrcp.f32 %v1064_v54  ;;  %v5367_v27 = vpop.eup %3905  ;;  %v1076_v34 = vand.u32 2147483648, %v1064_v54  ;;  %v1074_v45 = vand.u32 2147483647, %v1064_v54  ;;  %vm1070_vm11 = vweird.f32 %v1064_v54  ;;  %1505 = vmatpush.msra.mxu0 %v5149_v52 }
 0x320   :  { %v1086_v42 = vmul.f32 %v5367_v27, %v5330_v24  ;;  %vm1091_vm14 = vweird.f32 %v5367_v27  ;;  %v1097_v52 = vor.u32 1.1754944e-38, %v1096_v44  ;;  %vm1095_vm2 = vcmp.eq.f32.partialorder %v1094_v59, 8.507059e+37 }
 0x321   :  { %vm1075_vm13 = vcmp.eq.f32.partialorder %v1074_v45, 8.507059e+37  ;;  %1506 = vmatpush.msra.mxu0 %v5157_v46  ;;  %vm1092_vm1 = vmor %vm1090_vm15, %vm1091_vm14  ;;  %v406_v59 = vadd.f32 %v5056_v33, %v5058_v35  ;;  %v1117_v35 = vld [vmem:[#allocation8 + $0x20] sm:$0xff] }
 0x322   :  { %v1087_v18 = vsub.f32 1.0, %v1086_v42  ;;  %v1077_v42 = vor.u32 1.1754944e-38, %v1076_v34 }
 0x323   :  { %1507 = vmatpush.msra.mxu0 %v5165_v26 }
 0x325   :  { %v3908_v55 = vpop.eup %3907  ;;  %1508 = vmatpush.msra.mxu0 %v5173_v19 }
 0x326   :  { %v1066_v25 = vmul.f32 %v3908_v55, %v1064_v54  ;;  %vm1071_vm10 = vweird.f32 %v3908_v55 }
 0x327   :  { %vm1072_vm12 = vmor %vm1070_vm11, %vm1071_vm10  ;;  %1509 = vmatpush.msra.mxu0 %v5179_v63  ;;  %v950_v63 = vld [vmem:[#allocation8 + $0x18] sm:$0xff] }
 0x328   :  { %v1067_v17 = vsub.f32 1.0, %v1066_v25  ;;  %v1088_v25 = vmul.f32 %v5367_v27, %v1087_v18 }
 0x329   :  { %1510 = vmatpush.msra.mxu0 %v5185_v4 }
 0x32a   :  { %v1068_v61 = vmul.f32 %v3908_v55, %v1067_v17  ;;  %v1089_v18 = vadd.f32 %v5367_v27, %v1088_v25 }
 0x32b   :  { %1511 = vmatpush.msra.mxu0 %v5193_v10 }
 0x32c   :  { %v1069_v15 = vadd.f32 %v3908_v55, %v1068_v61  ;;  %v1093_v30 = vsel %vm1092_vm1, %v5367_v27, %v1089_v18 }
 0x32d   :  { %1512 = vmatpush.msra.mxu0 %v5205_v20 }
 0x32e   :  { %v1073_v7 = vsel %vm1072_vm12, %v3908_v55, %v1069_v15  ;;  %v1098_v55 = vsel %vm1095_vm2, %v1097_v52, %v1093_v30 }
 0x32f   :  { %v1078_v17 = vsel %vm1075_vm13, %v1077_v42, %v1073_v7  ;;  %v1104_v24 = vsub.f32 1.0, %v1098_v55  ;;  %1513 = vmatpush.msra.mxu0 %v5215_v14 }
 0x330   :  { %v1101_v54 = vmul.f32 %v1100_v39, %v1078_v17 }
 0x331   :  { %1514 = vmatpush.msra.mxu0 %v5223_v58 }
 0x332   :  { %v1102_v15 = vadd.f32 %v1101_v54, %v403_v43 }
 0x333   :  { %1515 = vmatpush.msra.mxu0 %v5231_v62 }
 0x334   :  { %3909 = vtanh.f32 %v1102_v15 }
 0x335   :  { %1516 = vmatpush.msra.mxu0 %v5238_v2 }
 0x33a   :  { %v3910_v46 = vpop.eup %3909 }
 0x33b   :  { %v1105_v34 = vsub.f32 %v3910_v46, %v5288_v11 }
 0x33d   :  { %v1106_v26 = vmul.f32 %v1105_v34, %v1104_v24 }
 0x33f   :  { %v1107_v19 = vadd.f32 %v1106_v26, %v5288_v11 }
 0x341   :  { %v1108_v27 = vsub.f32 %v1107_v19, %v5288_v11 }
 0x343   :  { %v1109_v4 = vmul.f32 %v1108_v27, %v950_v63 }
 0x345   :  { %v5432_v10 = vadd.f32 %v1109_v4, %v5288_v11 }
 0x347   :  { %1183 = vmatmul.f32.vlgmr.msra.gmra.mxu2 %v5432_v10  ;;  %1203 = vmatmul.f32.vlgmr.msra.gmra.mxu3 %v5432_v10 }
 0x348   :  { %1223 = vmatmul.f32.vlgmr.msrb.gmra.mxu0 %v5432_v10  ;;  %1541 = vmatpush.msra.mxu2 %v5113_v41  ;;  %v324_v41 = vadd.f32 %v5036_v16, %v5045_v23 }
 0x34a   :  { %1542 = vmatpush.msra.mxu2 %v5122_v13  ;;  %v365_v13 = vadd.f32 %v5085_v49, %v5060_v37 }
 0x34c   :  { %1543 = vmatpush.msra.mxu2 %v5130_v57 }
 0x34e   :  { %1544 = vmatpush.msra.mxu2 %v5140_v0 }
 0x350   :  { %1545 = vmatpush.msra.mxu2 %v5151_v1 }
 0x352   :  { %1546 = vmatpush.msra.mxu2 %v5159_v9 }
 0x354   :  { %1547 = vmatpush.msra.mxu2 %v5167_v60 }
 0x356   :  { %1548 = vmatpush.msra.mxu2 %v5325_v31 }
 0x358   :  { %1549 = vmatpush.msra.mxu2 %v5334_v22 }
 0x35a   :  { %1550 = vmatpush.msra.mxu2 %v5340_v8 }
 0x35c   :  { %1551 = vmatpush.msra.mxu2 %v5347_v12 }
 0x35e   :  { %1552 = vmatpush.msra.mxu2 %v5353_v5 }
 0x360   :  { %1553 = vmatpush.msra.mxu2 %v5355_v36 }
 0x362   :  { %1554 = vmatpush.msra.mxu2 %v5361_v56 }
 0x364   :  { %1555 = vmatpush.msra.mxu2 %v5369_v40 }
 0x366   :  { %1556 = vmatpush.msra.mxu2 %v5375_v28 }
 0x3c5   :  { %v1224_v7 = vpop.f32.mrf.mxu0 }
 0x3c6   :  { %v1267_v18 = vadd.f32 %v5072_v6, %v1224_v7 }
 0x3ca   :  { %v1184_v57 = vpop.f32.mrf.mxu2  ;;  %v1204_v0 = vpop.f32.mrf.mxu3 }
 0x3cb   :  { %v1227_v1 = vadd.f32 %v1184_v57, %v324_v41  ;;  %v1247_v9 = vadd.f32 %v1204_v0, %v365_v13  ;;  %v327_v0 = vadd.f32 %v5043_v21, %v5045_v23 }
 0x3cd   :  { %v3787_v60 = vmul.f32 -1.442695, %v1227_v1  ;;  %v3788_v20 = vmul.f32 -1.442695, %v1247_v9 }
 0x3cf   :  { %3911 = vpow2.f32 %v3787_v60 }
 0x3d0   :  { %3913 = vpow2.f32 %v3788_v20  ;;  %v368_v20 = vadd.f32 %v5087_v50, %v5060_v37 }
 0x3d5   :  { %v3912_v14 = vpop.eup %3911 }
 0x3d6   :  { %v3914_v58 = vpop.eup %3913  ;;  %v1231_v62 = vadd.f32 1.0, %v3912_v14 }
 0x3d7   :  { %v1251_v2 = vadd.f32 1.0, %v3914_v58 }
 0x3d8   :  { %3915 = vrcp.f32 %v1231_v62  ;;  %v1243_v49 = vand.u32 2147483648, %v1231_v62  ;;  %v1241_v39 = vand.u32 2147483647, %v1231_v62  ;;  %vm1237_vm4 = vweird.f32 %v1231_v62 }
 0x3d9   :  { %3917 = vrcp.f32 %v1251_v2  ;;  %v1263_v46 = vand.u32 2147483648, %v1251_v2  ;;  %vm1257_vm8 = vweird.f32 %v1251_v2  ;;  %v1261_v24 = vand.u32 2147483647, %v1251_v2 }
 0x3da   :  { %v1244_v43 = vor.u32 1.1754944e-38, %v1243_v49  ;;  %vm1242_vm6 = vcmp.eq.f32.partialorder %v1241_v39, 8.507059e+37 }
 0x3db   :  { %v1264_v26 = vor.u32 1.1754944e-38, %v1263_v46  ;;  %vm1262_vm10 = vcmp.eq.f32.partialorder %v1261_v24, 8.507059e+37 }
 0x3de   :  { %v3916_v11 = vpop.eup %3915 }
 0x3df   :  { %v3918_v61 = vpop.eup %3917  ;;  %v1233_v16 = vmul.f32 %v3916_v11, %v1231_v62  ;;  %vm1238_vm3 = vweird.f32 %v3916_v11 }
 0x3e0   :  { %v1253_v45 = vmul.f32 %v3918_v61, %v1251_v2  ;;  %vm1239_vm5 = vmor %vm1237_vm4, %vm1238_vm3  ;;  %vm1258_vm7 = vweird.f32 %v3918_v61 }
 0x3e1   :  { %v1234_v3 = vsub.f32 1.0, %v1233_v16  ;;  %vm1259_vm9 = vmor %vm1257_vm8, %vm1258_vm7 }
 0x3e2   :  { %v1254_v25 = vsub.f32 1.0, %v1253_v45 }
 0x3e3   :  { %v1235_v42 = vmul.f32 %v3916_v11, %v1234_v3 }
 0x3e4   :  { %v1255_v54 = vmul.f32 %v3918_v61, %v1254_v25 }
 0x3e5   :  { %v1236_v17 = vadd.f32 %v3916_v11, %v1235_v42 }
 0x3e6   :  { %v1256_v52 = vadd.f32 %v3918_v61, %v1255_v54 }
 0x3e7   :  { %v1240_v44 = vsel %vm1239_vm5, %v3916_v11, %v1236_v17 }
 0x3e8   :  { %v1245_v15 = vsel %vm1242_vm6, %v1244_v43, %v1240_v44  ;;  %v1260_v34 = vsel %vm1259_vm9, %v3918_v61, %v1256_v52 }
 0x3e9   :  { %v1268_v30 = vmul.f32 %v1267_v18, %v1245_v15  ;;  %v1265_v19 = vsel %vm1262_vm10, %v1264_v26, %v1260_v34  ;;  %v5471_v18 = vld [vmem:[#allocation14] ss:$0 sm:$0xff] }
 0x3ea   :  { %v1271_v63 = vsub.f32 1.0, %v1265_v19 }
 0x3eb   :  { %v1269_v55 = vadd.f32 %v1268_v30, %v406_v59 }
 0x3ed   :  { %3919 = vtanh.f32 %v1269_v55 }
 0x3f3   :  { %v3920_v6 = vpop.eup %3919 }
 0x3f4   :  { %v1272_v27 = vsub.f32 %v3920_v6, %v5432_v10 }
 0x3f6   :  { %v1273_v4 = vmul.f32 %v1272_v27, %v1271_v63 }
 0x3f8   :  { %v1274_v33 = vadd.f32 %v1273_v4, %v5432_v10 }
 0x3fa   :  { %v1275_v41 = vsub.f32 %v1274_v33, %v5432_v10 }
 0x3fc   :  { %v1276_v13 = vmul.f32 %v1275_v41, %v1117_v35  ;;  %v1284_v35 = vld [vmem:[#allocation8 + $0x28] sm:$0xff] }
 0x3fe   :  { %v1277_v57 = vadd.f32 %v1276_v13, %v5432_v10 }
 0x400   :  { %1350 = vmatmul.f32.vlgmr.msrb.gmra.mxu1 %v1277_v57  ;;  %1370 = vmatmul.f32.vlgmr.msrb.gmra.mxu2 %v1277_v57 }
 0x401   :  { %1390 = vmatmul.f32.vlgmr.msrb.gmra.mxu3 %v1277_v57 }
 0x47d   :  { %v1351_v1 = vpop.f32.mrf.mxu1 }
 0x47e   :  { %v1394_v9 = vadd.f32 %v1351_v1, %v327_v0  ;;  %v1666_v1 = vld [vmem:[#allocation13 + $0x170] sm:$0xff] }
 0x47f   :  { %1688 = vmatpush.msrb.mxu0 %v1666_v1 }
 0x480   :  { %v3789_v60 = vmul.f32 -1.442695, %v1394_v9  ;;  %v1667_v9 = vld [vmem:[#allocation13 + $0x178] sm:$0xff] }
 0x481   :  { %1708 = vmatpush.msrb.mxu1 %v1667_v9 }
 0x482   :  { %3921 = vpow2.f32 %v3789_v60  ;;  %v1662_v60 = vld [vmem:[#allocation13 + $0x150] sm:$0xff] }
 0x483   :  { %v1371_v14 = vpop.f32.mrf.mxu2 }
 0x484   :  { %v1414_v58 = vadd.f32 %v1371_v14, %v368_v20  ;;  %v1391_v50 = vpop.f32.mrf.mxu3  ;;  %v1663_v20 = vld [vmem:[#allocation13 + $0x158] sm:$0xff]  ;;  %v1664_v14 = vld [vmem:[#allocation13 + $0x160] sm:$0xff] }
 0x485   :  { %v1434_v44 = vadd.f32 %v5471_v18, %v1391_v50  ;;  %1689 = vmatpush.msrb.mxu0 %v1663_v20  ;;  %1709 = vmatpush.msrb.mxu1 %v1664_v14  ;;  %v1652_v50 = vld [vmem:[#allocation13 + $0x100] sm:$0xff] }
 0x486   :  { %v3790_v62 = vmul.f32 -1.442695, %v1414_v58  ;;  %v1661_v58 = vld [vmem:[#allocation13 + $0x148] sm:$0xff] }
 0x487   :  { %1690 = vmatpush.msrb.mxu0 %v5299_v32  ;;  %1710 = vmatpush.msrb.mxu1 %v1661_v58 }
 0x488   :  { %v3922_v2 = vpop.eup %3921  ;;  %3923 = vpow2.f32 %v3790_v62  ;;  %v1656_v62 = vld [vmem:[#allocation13 + $0x120] sm:$0xff] }
 0x489   :  { %v1398_v11 = vadd.f32 1.0, %v3922_v2  ;;  %v1657_v2 = vld [vmem:[#allocation13 + $0x128] sm:$0xff] }
 0x48a   :  { %1691 = vmatpush.msrb.mxu0 %v1657_v2 }
 0x48b   :  { %3925 = vrcp.f32 %v1398_v11  ;;  %v1410_v3 = vand.u32 2147483648, %v1398_v11  ;;  %v1408_v25 = vand.u32 2147483647, %v1398_v11  ;;  %vm1404_vm12 = vweird.f32 %v1398_v11 }
 0x48c   :  { %1692 = vmatpush.msrb.mxu0 %v5308_v48  ;;  %v1641_v48 = vld [vmem:[#allocation13 + $0xa8] sm:$0xff] }
 0x48d   :  { %v1411_v17 = vor.u32 1.1754944e-38, %v1410_v3  ;;  %vm1409_vm14 = vcmp.eq.f32.partialorder %v1408_v25, 8.507059e+37 }
 0x48e   :  { %v3924_v10 = vpop.eup %3923  ;;  %1693 = vmatpush.msrb.mxu0 %v5313_v47  ;;  %v6602_v47 = vld [vmem:[#allocation43_spill] sm:$0xff] }
 0x48f   :  { %v1418_v61 = vadd.f32 1.0, %v3924_v10  ;;  %v330_v10 = vadd.f32 %v5050_v29, %v5045_v23 }
 0x490   :  { %1694 = vmatpush.msrb.mxu0 %v5318_v53 }
 0x491   :  { %v3926_v16 = vpop.eup %3925  ;;  %3927 = vrcp.f32 %v1418_v61  ;;  %v1430_v55 = vand.u32 2147483648, %v1418_v61  ;;  %vm1424_vm1 = vweird.f32 %v1418_v61  ;;  %v1428_v24 = vand.u32 2147483647, %v1418_v61 }
 0x492   :  { %v1400_v45 = vmul.f32 %v3926_v16, %v1398_v11  ;;  %vm1405_vm11 = vweird.f32 %v3926_v16  ;;  %v1658_v11 = vld [vmem:[#allocation13 + $0x130] sm:$0xff]  ;;  %1695 = vmatpush.msrb.mxu0 %v5323_v51 }
 0x493   :  { %vm1406_vm13 = vmor %vm1404_vm12, %vm1405_vm11  ;;  %v1431_v26 = vor.u32 1.1754944e-38, %v1430_v55  ;;  %vm1429_vm3 = vcmp.eq.f32.partialorder %v1428_v24, 8.507059e+37  ;;  %1711 = vmatpush.msrb.mxu1 %v1658_v11  ;;  %v1633_v55 = vld [vmem:[#allocation13 + $0x68] sm:$0xff]  ;;  %v1627_v24 = vld [vmem:[#allocation13 + $0x38] sm:$0xff] }
 0x494   :  { %v1401_v21 = vsub.f32 1.0, %v1400_v45  ;;  %v1653_v45 = vld [vmem:[#allocation13 + $0x108] sm:$0xff]  ;;  %1696 = vmatpush.msrb.mxu0 %v6602_v47  ;;  %v1793_v47 = vld [vmem:[%s6555_s12 + $0x60] sm:$0xff] }
 0x496   :  { %v1402_v49 = vmul.f32 %v3926_v16, %v1401_v21  ;;  %v1655_v21 = vld [vmem:[#allocation13 + $0x118] sm:$0xff] }
 0x497   :  { %v3928_v42 = vpop.eup %3927  ;;  %1712 = vmatpush.msrb.mxu1 %v1655_v21 }
 0x498   :  { %v1420_v39 = vmul.f32 %v3928_v42, %v1418_v61  ;;  %v1403_v7 = vadd.f32 %v3926_v16, %v1402_v49  ;;  %vm1425_vm15 = vweird.f32 %v3928_v42  ;;  %v6601_v61 = vld [vmem:[#allocation41_spill] sm:$0xff] }
 0x499   :  { %vm1426_vm2 = vmor %vm1424_vm1, %vm1425_vm15  ;;  %1713 = vmatpush.msrb.mxu1 %v1652_v50  ;;  %v1796_v50 = vld [vmem:[%s6555_s12 + $0x78] sm:$0xff] }
 0x49a   :  { %v1421_v43 = vsub.f32 1.0, %v1420_v39  ;;  %v1407_v54 = vsel %vm1406_vm13, %v3926_v16, %v1403_v7  ;;  %v371_v16 = vadd.f32 %v6601_v61, %v5060_v37  ;;  %v1647_v7 = vld [vmem:[#allocation13 + $0xd8] sm:$0xff]  ;;  %1801 = vmatpush.msrb.mxu2 %v1796_v50 }
 0x49b   :  { %v1412_v15 = vsel %vm1409_vm14, %v1411_v17, %v1407_v54  ;;  %v1649_v17 = vld [vmem:[#allocation13 + $0xe8] sm:$0xff]  ;;  %v1638_v54 = vld [vmem:[#allocation13 + $0x90] sm:$0xff] }
 0x49c   :  { %v1422_v59 = vmul.f32 %v3928_v42, %v1421_v43  ;;  %v1435_v30 = vmul.f32 %v1434_v44, %v1412_v15  ;;  %1714 = vmatpush.msrb.mxu1 %v1649_v17  ;;  %v1644_v43 = vld [vmem:[#allocation13 + $0xc0] sm:$0xff]  ;;  %v1639_v44 = vld [vmem:[#allocation13 + $0x98] sm:$0xff] }
 0x49d   :  { %1697 = vmatpush.msrb.mxu0 %v1639_v44  ;;  %v1635_v15 = vld [vmem:[#allocation13 + $0x78] sm:$0xff]  ;;  %v1792_v44 = vld [vmem:[%s6555_s12 + $0x58] sm:$0xff] }
 0x49e   :  { %v1423_v52 = vadd.f32 %v3928_v42, %v1422_v59  ;;  %v1436_v46 = vadd.f32 %v1435_v30, %v5063_v38  ;;  %v1665_v38 = vld [vmem:[#allocation13 + $0x168] sm:$0xff]  ;;  %1715 = vmatpush.msrb.mxu1 %v5325_v31  ;;  %v1636_v59 = vld [vmem:[#allocation13 + $0x80] sm:$0xff] }
 0x49f   :  { %1668 = vmatpush.msra.mxu3 %v1665_v38  ;;  %1698 = vmatpush.msrb.mxu0 %v1636_v59  ;;  %v1632_v31 = vld [vmem:[#allocation13 + $0x60] sm:$0xff] }
 0x4a0   :  { %3929 = vtanh.f32 %v1436_v46  ;;  %v1427_v34 = vsel %vm1426_vm2, %v3928_v42, %v1423_v52  ;;  %v1650_v42 = vld [vmem:[#allocation13 + $0xf0] sm:$0xff]  ;;  %1716 = vmatpush.msrb.mxu1 %v5334_v22  ;;  %v1629_v22 = vld [vmem:[#allocation13 + $0x48] sm:$0xff]  ;;  %v1791_v59 = vld [vmem:[%s6555_s12 + $0x50] sm:$0xff] }
 0x4a1   :  { %v1432_v19 = vsel %vm1429_vm3, %v1431_v26, %v1427_v34  ;;  %1669 = vmatpush.msra.mxu3 %v1662_v60  ;;  %1699 = vmatpush.msrb.mxu0 %v1633_v55  ;;  %v1630_v46 = vld [vmem:[#allocation13 + $0x50] sm:$0xff]  ;;  %v1624_v34 = vld [vmem:[#allocation13 + $0x20] sm:$0xff] }
 0x4a2   :  { %v1438_v63 = vsub.f32 1.0, %v1432_v19  ;;  %1717 = vmatpush.msrb.mxu1 %v5340_v8  ;;  %v1626_v8 = vld [vmem:[#allocation13 + $0x30] sm:$0xff]  ;;  %v1620_v19 = vld [vmem:[#allocation13] sm:$0xff] }
 0x4a3   :  { %1700 = vmatpush.msrb.mxu0 %v1630_v46  ;;  %v1786_v46 = vld [vmem:[%s6555_s12 + $0x28] sm:$0xff] }
 0x4a4   :  { %1718 = vmatpush.msrb.mxu1 %v5347_v12  ;;  %v1623_v12 = vld [vmem:[#allocation13 + $0x18] sm:$0xff] }
 0x4a5   :  { %1701 = vmatpush.msrb.mxu0 %v1627_v24  ;;  %v1785_v24 = vld [vmem:[%s6555_s12 + $0x20] sm:$0xff] }
 0x4a6   :  { %v3930_v6 = vpop.eup %3929  ;;  %1719 = vmatpush.msrb.mxu1 %v5353_v5 }
 0x4a7   :  { %v1439_v27 = vsub.f32 %v3930_v6, %v1277_v57  ;;  %1702 = vmatpush.msrb.mxu0 %v1624_v34  ;;  %v1621_v6 = vld [vmem:[#allocation13 + $0x8] sm:$0xff] }
 0x4a8   :  { %1720 = vmatpush.msrb.mxu1 %v5355_v36  ;;  %v1784_v34 = vld [vmem:[%s6555_s12 + $0x18] sm:$0xff] }
 0x4a9   :  { %v1440_v4 = vmul.f32 %v1439_v27, %v1438_v63  ;;  %1703 = vmatpush.msrb.mxu0 %v1621_v6  ;;  %v1782_v6 = vld [vmem:[%s6555_s12 + $0x8] sm:$0xff] }
 0x4aa   :  { %1721 = vmatpush.msrb.mxu1 %v5361_v56 }
 0x4ab   :  { %v1441_v33 = vadd.f32 %v1440_v4, %v1277_v57 }
 0x4ac   :  { %1722 = vmatpush.msrb.mxu1 %v5369_v40 }
 0x4ad   :  { %v1442_v41 = vsub.f32 %v1441_v33, %v1277_v57 }
 0x4ae   :  { %1723 = vmatpush.msrb.mxu1 %v5375_v28 }
 0x4af   :  { %v1443_v13 = vmul.f32 %v1442_v41, %v1284_v35 }
 0x4b1   :  { %v5475_v0 = vadd.f32 %v1443_v13, %v1277_v57  ;;  %v1659_v57 = vld [vmem:[#allocation13 + $0x138] sm:$0xff] }
 0x4b2   :  { %1670 = vmatpush.msra.mxu3 %v1659_v57  ;;  %v6603_v57 = vld [vmem:[#allocation39_spill] sm:$0xff] }
 0x4b3   :  { %1517 = vmatmul.f32.vlgmr.msra.gmra.mxu0 %v5475_v0  ;;  %1537 = vmatmul.f32.vlgmr.msra.gmra.mxu1 %v5475_v0 }
 0x4b4   :  { %1557 = vmatmul.f32.vlgmr.msra.gmra.mxu2 %v5475_v0  ;;  %1671 = vmatpush.msra.mxu3 %v1656_v62 }
 0x4b6   :  { %1672 = vmatpush.msra.mxu3 %v1653_v45 }
 0x4b8   :  { %1673 = vmatpush.msra.mxu3 %v1650_v42 }
 0x4ba   :  { %1674 = vmatpush.msra.mxu3 %v1647_v7  ;;  %v1795_v7 = vld [vmem:[%s6555_s12 + $0x70] sm:$0xff] }
 0x4bb   :  { %1802 = vmatpush.msrb.mxu2 %v1795_v7  ;;  %v1851_v7 = vld [vmem:[#allocation20 + $0x68] sm:$0xff] }
 0x4bc   :  { %1675 = vmatpush.msra.mxu3 %v1644_v43  ;;  %v1794_v43 = vld [vmem:[%s6555_s12 + $0x68] sm:$0xff] }
 0x4bd   :  { %1803 = vmatpush.msrb.mxu2 %v1794_v43  ;;  %v3868_v43 = vld [vmem:[%s6556_s13] ss:$0 sm:$0xff]  ;;  %s4487_s13 = smov 96  }
 0x4be   :  { %1676 = vmatpush.msra.mxu3 %v1641_v48 }
 0x4bf   :  { %1804 = vmatpush.msrb.mxu2 %v1793_v47 }
 0x4c0   :  { %1677 = vmatpush.msra.mxu3 %v1638_v54 }
 0x4c1   :  { %1805 = vmatpush.msrb.mxu2 %v1792_v44 }
 0x4c2   :  { %1678 = vmatpush.msra.mxu3 %v1635_v15 }
 0x4c3   :  { %1806 = vmatpush.msrb.mxu2 %v1791_v59  ;;  %v1844_v59 = vld [vmem:[#allocation20 + $0x30] sm:$0xff] }
 0x4c4   :  { %1679 = vmatpush.msra.mxu3 %v1632_v31  ;;  %v1788_v31 = vld [vmem:[%s6555_s12 + $0x38] sm:$0xff] }
 0x4c6   :  { %1680 = vmatpush.msra.mxu3 %v1629_v22  ;;  %v1787_v22 = vld [vmem:[%s6555_s12 + $0x30] sm:$0xff] }
 0x4c8   :  { %1681 = vmatpush.msra.mxu3 %v1626_v8 }
 0x4ca   :  { %1682 = vmatpush.msra.mxu3 %v1623_v12 }
 0x4cc   :  { %1683 = vmatpush.msra.mxu3 %v1620_v19 }
 0x530   :  { %v1518_v3 = vpop.f32.mrf.mxu0  ;;  %v1538_v49 = vpop.f32.mrf.mxu1 }
 0x531   :  { %v1561_v32 = vadd.f32 %v1518_v3, %v330_v10  ;;  %v1581_v25 = vadd.f32 %v1538_v49, %v371_v16  ;;  %v1451_v49 = vld [vmem:[#allocation8 + $0x30] sm:$0xff] }
 0x533   :  { %v3791_v29 = vmul.f32 -1.442695, %v1561_v32  ;;  %v3792_v39 = vmul.f32 -1.442695, %v1581_v25 }
 0x535   :  { %3931 = vpow2.f32 %v3791_v29  ;;  %v6604_v29 = vld [vmem:[#allocation42_spill] sm:$0xff] }
 0x536   :  { %3933 = vpow2.f32 %v3792_v39  ;;  %v374_v39 = vadd.f32 %v6604_v29, %v5060_v37  ;;  %v6605_v37 = vld [vmem:[#allocation38_spill] sm:$0xff] }
 0x537   :  { %v1558_v41 = vpop.f32.mrf.mxu2  ;;  %v333_v54 = vadd.f32 %v6605_v37, %v5045_v23  ;;  %v1789_v23 = vld [vmem:[%s6555_s12 + $0x40] sm:$0xff]  ;;  %v1853_v29 = vld [vmem:[#allocation20 + $0x78] sm:$0xff] }
 0x538   :  { %v1601_v40 = vadd.f32 %v5471_v18, %v1558_v41  ;;  %1858 = vmatpush.msrb.mxu3 %v1853_v29  ;;  %v1847_v37 = vld [vmem:[#allocation20 + $0x48] sm:$0xff] }
 0x539   :  { %v5645_v29 = vld [vmem:[#allocation17 + $0xc8] sm:$0xff] }
 0x53b   :  { %v3932_v53 = vpop.eup %3931 }
 0x53c   :  { %v3934_v30 = vpop.eup %3933  ;;  %v1565_v52 = vadd.f32 1.0, %v3932_v53 }
 0x53d   :  { %v1585_v51 = vadd.f32 1.0, %v3934_v30 }
 0x53e   :  { %3935 = vrcp.f32 %v1565_v52  ;;  %v1577_v33 = vand.u32 2147483648, %v1565_v52  ;;  %v1575_v35 = vand.u32 2147483647, %v1565_v52  ;;  %vm1571_vm5 = vweird.f32 %v1565_v52 }
 0x53f   :  { %3937 = vrcp.f32 %v1585_v51  ;;  %v1597_v28 = vand.u32 2147483648, %v1585_v51  ;;  %vm1591_vm9 = vweird.f32 %v1585_v51  ;;  %v1595_v62 = vand.u32 2147483647, %v1585_v51 }
 0x540   :  { %v1578_v1 = vor.u32 1.1754944e-38, %v1577_v33  ;;  %vm1576_vm7 = vcmp.eq.f32.partialorder %v1575_v35, 8.507059e+37 }
 0x541   :  { %v1598_v11 = vor.u32 1.1754944e-38, %v1597_v28  ;;  %vm1596_vm11 = vcmp.eq.f32.partialorder %v1595_v62, 8.507059e+37 }
 0x544   :  { %v3936_v26 = vpop.eup %3935 }
 0x545   :  { %v3938_v5 = vpop.eup %3937  ;;  %v1567_v63 = vmul.f32 %v3936_v26, %v1565_v52  ;;  %vm1572_vm4 = vweird.f32 %v3936_v26  ;;  %v1790_v52 = vld [vmem:[%s6555_s12 + $0x48] sm:$0xff] }
 0x546   :  { %v1587_v27 = vmul.f32 %v3938_v5, %v1585_v51  ;;  %vm1573_vm6 = vmor %vm1571_vm5, %vm1572_vm4  ;;  %vm1592_vm8 = vweird.f32 %v3938_v5  ;;  %1807 = vmatpush.msrb.mxu2 %v1790_v52  ;;  %vm1836_vm5 = vcmask 261120  }
 0x547   :  { %v1568_v36 = vsub.f32 1.0, %v1567_v63  ;;  %vm1593_vm10 = vmor %vm1591_vm9, %vm1592_vm8 }
 0x548   :  { %v1588_v4 = vsub.f32 1.0, %v1587_v27  ;;  %1808 = vmatpush.msrb.mxu2 %v1789_v23  ;;  %v1831_v23 = vld [vmem:[#allocation10] sm:$0xff] }
 0x549   :  { %v1569_v56 = vmul.f32 %v3936_v26, %v1568_v36 }
 0x54a   :  { %v1589_v38 = vmul.f32 %v3938_v5, %v1588_v4  ;;  %1809 = vmatpush.msrb.mxu2 %v1788_v31  ;;  %v1841_v31 = vld [vmem:[#allocation20 + $0x18] sm:$0xff] }
 0x54b   :  { %v1570_v13 = vadd.f32 %v3936_v26, %v1569_v56 }
 0x54c   :  { %v1590_v14 = vadd.f32 %v3938_v5, %v1589_v38  ;;  %1810 = vmatpush.msrb.mxu2 %v1787_v22  ;;  %v1839_v22 = vld [vmem:[#allocation20 + $0x8] sm:$0xff] }
 0x54d   :  { %v1574_v9 = vsel %vm1573_vm6, %v3936_v26, %v1570_v13  ;;  %v1783_v26 = vld [vmem:[%s6555_s12 + $0x10] sm:$0xff] }
 0x54e   :  { %v1579_v60 = vsel %vm1576_vm7, %v1578_v1, %v1574_v9  ;;  %v1594_v2 = vsel %vm1593_vm10, %v3938_v5, %v1590_v14  ;;  %1811 = vmatpush.msrb.mxu2 %v1786_v46  ;;  %v1781_v5 = vld [vmem:[%s6555_s12] sm:$0xff]  ;;  %v1838_v46 = vld [vmem:[#allocation20] sm:$0xff]  ;;  %s6657_s12 = sld [smem:[#allocation67_spill]] }
 0x54f   :  { %v1602_v20 = vmul.f32 %v1601_v40, %v1579_v60  ;;  %v1599_v10 = vsel %vm1596_vm11, %v1598_v11, %v1594_v2 }
 0x550   :  { %v1605_v16 = vsub.f32 1.0, %v1599_v10  ;;  %1812 = vmatpush.msrb.mxu2 %v1785_v24  ;;  %v1907_v24 = vld [vmem:[#allocation16 + $0xb0] sm:$0xff] }
 0x551   :  { %v1603_v58 = vadd.f32 %v1602_v20, %v6603_v57  ;;  %1966 = vmatpush.msra.mxu1 %v1907_v24  ;;  %v5714_v24 = vld [vmem:[#allocation17 + $0x30] sm:$0xff] }
 0x552   :  { %1813 = vmatpush.msrb.mxu2 %v1784_v34  ;;  %v1904_v34 = vld [vmem:[#allocation16 + $0x98] sm:$0xff] }
 0x553   :  { %3939 = vtanh.f32 %v1603_v58  ;;  %v6606_v58 = vld [vmem:[#allocation40_spill] sm:$0xff]  ;;  %1967 = vmatpush.msra.mxu1 %v1904_v34  ;;  %v5719_v34 = vld [vmem:[#allocation17 + $0x38] sm:$0xff] }
 0x554   :  { %1814 = vmatpush.msrb.mxu2 %v1783_v26  ;;  %v1900_v26 = vld [vmem:[#allocation16 + $0x78] sm:$0xff]  ;;  %s3690_s22 = sshll.u32 %s6657_s12, 4  ;;  %s3691_s22 = int_to_ptr.hbm [resolvable:$true] %s3690_s22 }
 0x556   :  { %1815 = vmatpush.msrb.mxu2 %v1782_v6  ;;  %v1897_v6 = vld [vmem:[#allocation16 + $0x60] sm:$0xff] }
 0x558   :  { %1816 = vmatpush.msrb.mxu2 %v1781_v5  ;;  %v1898_v5 = vld [vmem:[#allocation16 + $0x68] sm:$0xff] }
 0x559   :  { %v3940_v61 = vpop.eup %3939 }
 0x55a   :  { %v1606_v45 = vsub.f32 %v3940_v61, %v5475_v0 }
 0x55c   :  { %v1607_v21 = vmul.f32 %v1606_v45, %v1605_v16 }
 0x55e   :  { %v1608_v3 = vadd.f32 %v1607_v21, %v5475_v0 }
 0x560   :  { %v1609_v32 = vsub.f32 %v1608_v3, %v5475_v0 }
 0x562   :  { %v1610_v25 = vmul.f32 %v1609_v32, %v1451_v49  ;;  %v1618_v49 = vld [vmem:[#allocation8 + $0x38] sm:$0xff] }
 0x564   :  { %v5505_v42 = vadd.f32 %v1610_v25, %v5475_v0 }
 0x566   :  { %1684 = vmatmul.f32.vlgmr.msra.gmra.mxu3 %v5505_v42  ;;  %1704 = vmatmul.f32.vlgmr.msrb.gmra.mxu0 %v5505_v42 }
 0x567   :  { %1724 = vmatmul.f32.vlgmr.msrb.gmra.mxu1 %v5505_v42 }
 0x5e3   :  { %v1705_v0 = vpop.f32.mrf.mxu0 }
 0x5e4   :  { %v1748_v17 = vadd.f32 %v1705_v0, %v374_v39  ;;  %v1725_v13 = vpop.f32.mrf.mxu1  ;;  %v1852_v39 = vld [vmem:[#allocation20 + $0x70] sm:$0xff]  ;;  %v1850_v0 = vld [vmem:[#allocation20 + $0x60] sm:$0xff] }
 0x5e5   :  { %v1768_v40 = vadd.f32 %v5471_v18, %v1725_v13  ;;  %1859 = vmatpush.msrb.mxu3 %v1852_v39  ;;  %v5577_v13 = vld [vmem:[#allocation17 + $0x170] sm:$0xff] }
 0x5e6   :  { %v3794_v48 = vmul.f32 -1.442695, %v1748_v17  ;;  %v1849_v17 = vld [vmem:[#allocation20 + $0x58] sm:$0xff] }
 0x5e7   :  { %1860 = vmatpush.msrb.mxu3 %v1851_v7 }
 0x5e8   :  { %3941 = vpow2.f32 %v3794_v48  ;;  %v1848_v48 = vld [vmem:[#allocation20 + $0x50] sm:$0xff] }
 0x5e9   :  { %v1685_v53 = vpop.f32.mrf.mxu3  ;;  %1861 = vmatpush.msrb.mxu3 %v1850_v0  ;;  %v5651_v0 = vld [vmem:[#allocation17 + $0xc0] sm:$0xff] }
 0x5ea   :  { %v1728_v15 = vadd.f32 %v1685_v53, %v333_v54  ;;  %v1846_v54 = vld [vmem:[#allocation20 + $0x40] sm:$0xff]  ;;  %v1845_v53 = vld [vmem:[#allocation20 + $0x38] sm:$0xff] }
 0x5eb   :  { %1862 = vmatpush.msrb.mxu3 %v1849_v17 }
 0x5ec   :  { %v3793_v30 = vmul.f32 -1.442695, %v1728_v15 }
 0x5ed   :  { %1863 = vmatpush.msrb.mxu3 %v1848_v48  ;;  %v5658_v48 = vld [vmem:[#allocation5 + $0x10] sm:$0xff] }
 0x5ee   :  { %v3942_v51 = vpop.eup %3941  ;;  %3943 = vpow2.f32 %v3793_v30  ;;  %v1843_v30 = vld [vmem:[#allocation20 + $0x28] sm:$0xff] }
 0x5ef   :  { %v1752_v55 = vadd.f32 1.0, %v3942_v51  ;;  %1864 = vmatpush.msrb.mxu3 %v1847_v37  ;;  %v1842_v51 = vld [vmem:[#allocation20 + $0x20] sm:$0xff] }
 0x5f0   :  { %v5667_v37 = vld [vmem:[#allocation17 + $0xa8] sm:$0xff] }
 0x5f1   :  { %3945 = vrcp.f32 %v1752_v55  ;;  %v1764_v57 = vand.u32 2147483648, %v1752_v55  ;;  %vm1758_vm2 = vweird.f32 %v1752_v55  ;;  %v1762_v2 = vand.u32 2147483647, %v1752_v55  ;;  %1865 = vmatpush.msrb.mxu3 %v1846_v54  ;;  %v5669_v54 = vld [vmem:[#allocation17 + $0xb0] sm:$0xff] }
 0x5f3   :  { %v1765_v10 = vor.u32 1.1754944e-38, %v1764_v57  ;;  %vm1763_vm4 = vcmp.eq.f32.partialorder %v1762_v2, 8.507059e+37  ;;  %1866 = vmatpush.msrb.mxu3 %v1845_v53  ;;  %v5603_v57 = vld [vmem:[#allocation17 + $0x148] sm:$0xff]  ;;  %v5675_v53 = vld [vmem:[#allocation17 + $0x98] sm:$0xff] }
 0x5f4   :  { %v3944_v8 = vpop.eup %3943 }
 0x5f5   :  { %v1732_v12 = vadd.f32 1.0, %v3944_v8  ;;  %1867 = vmatpush.msrb.mxu3 %v1844_v59  ;;  %v1906_v8 = vld [vmem:[#allocation16 + $0xa8] sm:$0xff]  ;;  %v5680_v59 = vld [vmem:[#allocation17 + $0x80] sm:$0xff] }
 0x5f6   :  { %1925 = vmatpush.msra.mxu0 %v1906_v8  ;;  %v5710_v8 = vld [vmem:[#allocation17 + $0x50] sm:$0xff] }
 0x5f7   :  { %3947 = vrcp.f32 %v1732_v12  ;;  %v3946_v19 = vpop.eup %3945  ;;  %v1744_v56 = vand.u32 2147483648, %v1732_v12  ;;  %v1742_v41 = vand.u32 2147483647, %v1732_v12  ;;  %vm1738_vm13 = vweird.f32 %v1732_v12  ;;  %1868 = vmatpush.msrb.mxu3 %v1843_v30  ;;  %v5684_v30 = vld [vmem:[#allocation17 + $0x78] sm:$0xff] }
 0x5f8   :  { %v1754_v27 = vmul.f32 %v3946_v19, %v1752_v55  ;;  %vm1759_vm1 = vweird.f32 %v3946_v19  ;;  %v1840_v55 = vld [vmem:[#allocation20 + $0x10] sm:$0xff] }
 0x5f9   :  { %v1745_v9 = vor.u32 1.1754944e-38, %v1744_v56  ;;  %vm1743_vm15 = vcmp.eq.f32.partialorder %v1742_v41, 8.507059e+37  ;;  %vm1760_vm3 = vmor %vm1758_vm2, %vm1759_vm1  ;;  %1869 = vmatpush.msrb.mxu3 %v1842_v51  ;;  %v1889_v56 = vld [vmem:[#allocation16 + $0x20] sm:$0xff]  ;;  %v1886_v41 = vld [vmem:[#allocation16 + $0x8] sm:$0xff] }
 0x5fa   :  { %v1755_v33 = vsub.f32 1.0, %v1754_v27  ;;  %v1895_v27 = vld [vmem:[#allocation16 + $0x50] sm:$0xff]  ;;  %v5694_v51 = vld [vmem:[#allocation17 + $0x88] sm:$0xff] }
 0x5fb   :  { %1870 = vmatpush.msrb.mxu3 %v1841_v31  ;;  %v5696_v31 = vld [vmem:[#allocation17 + $0x68] sm:$0xff] }
 0x5fc   :  { %v1756_v1 = vmul.f32 %v3946_v19, %v1755_v33  ;;  %v1888_v33 = vld [vmem:[#allocation16 + $0x18] sm:$0xff] }
 0x5fd   :  { %v3948_v63 = vpop.eup %3947  ;;  %1871 = vmatpush.msrb.mxu3 %v1840_v55  ;;  %v5698_v55 = vld [vmem:[#allocation5 + $0x18] sm:$0xff] }
 0x5fe   :  { %v1734_v36 = vmul.f32 %v3948_v63, %v1732_v12  ;;  %vm1739_vm12 = vweird.f32 %v3948_v63  ;;  %v1757_v28 = vadd.f32 %v3946_v19, %v1756_v1  ;;  %v1903_v12 = vld [vmem:[#allocation16 + $0x90] sm:$0xff]  ;;  %v5585_v1 = vld [vmem:[#allocation17 + $0x158] sm:$0xff] }
 0x5ff   :  { %vm1740_vm14 = vmor %vm1738_vm13, %vm1739_vm12  ;;  %1872 = vmatpush.msrb.mxu3 %v1839_v22  ;;  %1926 = vmatpush.msra.mxu0 %v1903_v12  ;;  %v5706_v22 = vld [vmem:[#allocation17 + $0x70] sm:$0xff]  ;;  %v5717_v12 = vld [vmem:[#allocation17 + $0x58] sm:$0xff] }
 0x600   :  { %v1735_v4 = vsub.f32 1.0, %v1734_v36  ;;  %v1761_v11 = vsel %vm1760_vm3, %v3946_v19, %v1757_v28  ;;  %v1901_v19 = vld [vmem:[#allocation16 + $0x80] sm:$0xff]  ;;  %v1891_v36 = vld [vmem:[#allocation16 + $0x30] sm:$0xff]  ;;  %v5601_v28 = vld [vmem:[#allocation17 + $0x138] sm:$0xff] }
 0x601   :  { %v1766_v61 = vsel %vm1763_vm4, %v1765_v10, %v1761_v11  ;;  %1873 = vmatpush.msrb.mxu3 %v1838_v46  ;;  %1927 = vmatpush.msra.mxu0 %v1900_v26  ;;  %v5610_v11 = vld [vmem:[#allocation17 + $0x110] sm:$0xff]  ;;  %v5614_v10 = vld [vmem:[#allocation17 + $0x120] sm:$0xff]  ;;  %v5708_v46 = vld [vmem:[#allocation17 + $0x48] sm:$0xff] }
 0x602   :  { %v1736_v35 = vmul.f32 %v3948_v63, %v1735_v4  ;;  %v1772_v45 = vsub.f32 1.0, %v1766_v61  ;;  %1968 = vmatpush.msra.mxu1 %v1901_v19  ;;  %v1892_v4 = vld [vmem:[#allocation16 + $0x38] sm:$0xff]  ;;  %v5617_v61 = vld [vmem:[#allocation17 + $0x130] sm:$0xff]  ;;  %v5724_v26 = vld [vmem:[#allocation17 + $0x40] sm:$0xff] }
 0x603   :  { %1928 = vmatpush.msra.mxu0 %v1897_v6  ;;  %v5728_v19 = vld [vmem:[#allocation5 + $0x20] sm:$0xff]  ;;  %v5735_v6 = vld [vmem:[#allocation5 + $0x28] sm:$0xff] }
 0x604   :  { %v1737_v38 = vadd.f32 %v3948_v63, %v1736_v35  ;;  %1969 = vmatpush.msra.mxu1 %v1898_v5  ;;  %v1885_v35 = vld [vmem:[#allocation16] sm:$0xff] }
 0x605   :  { %v5741_v5 = vld [vmem:[#allocation5 + $0x30] sm:$0xff] }
 0x606   :  { %v1741_v60 = vsel %vm1740_vm14, %v3948_v63, %v1737_v38  ;;  %v1894_v63 = vld [vmem:[#allocation16 + $0x48] sm:$0xff]  ;;  %1970 = vmatpush.msra.mxu1 %v1895_v27  ;;  %v5753_v27 = vld [vmem:[#allocation17 + $0x18] sm:$0xff] }
 0x607   :  { %v1746_v20 = vsel %vm1743_vm15, %v1745_v9, %v1741_v60  ;;  %1929 = vmatpush.msra.mxu0 %v1894_v63  ;;  %v5579_v38 = vld [vmem:[#allocation5] sm:$0xff]  ;;  %v5592_v60 = vld [vmem:[#allocation17 + $0x140] sm:$0xff] }
 0x608   :  { %v1769_v14 = vmul.f32 %v1768_v40, %v1746_v20  ;;  %1971 = vmatpush.msra.mxu1 %v1892_v4  ;;  %v5588_v9 = vld [vmem:[#allocation17 + $0x168] sm:$0xff]  ;;  %v5590_v40 = vld [vmem:[#allocation17 + $0x178] sm:$0xff]  ;;  %v5596_v20 = vld [vmem:[#allocation17 + $0x150] sm:$0xff] }
 0x609   :  { %1930 = vmatpush.msra.mxu0 %v1891_v36  ;;  %2122 = vmatpush.msra.mxu3 %v5588_v9  ;;  %v5747_v63 = vld [vmem:[#allocation5 + $0x38] sm:$0xff] }
 0x60a   :  { %v1770_v62 = vadd.f32 %v1769_v14, %v6606_v58  ;;  %1972 = vmatpush.msra.mxu1 %v1889_v56  ;;  %v5598_v14 = vld [vmem:[#allocation17 + $0x160] sm:$0xff]  ;;  %v5605_v58 = vld [vmem:[#allocation17 + $0x128] sm:$0xff] }
 0x60b   :  { %1931 = vmatpush.msra.mxu0 %v1888_v33  ;;  %2123 = vmatpush.msra.mxu3 %v5596_v20  ;;  %v5755_v36 = vld [vmem:[#allocation17 + $0x20] sm:$0xff]  ;;  %v5757_v4 = vld [vmem:[#allocation17 + $0x28] sm:$0xff] }
 0x60c   :  { %3949 = vtanh.f32 %v1770_v62  ;;  %1973 = vmatpush.msra.mxu1 %v1886_v41  ;;  %v1821_v62 = vld [vmem:[#allocation11] sm:$0xff]  ;;  %v5761_v33 = vld [vmem:[#allocation17] sm:$0xff]  ;;  %v5763_v56 = vld [vmem:[#allocation17 + $0x8] sm:$0xff] }
 0x60d   :  { %1932 = vmatpush.msra.mxu0 %v1885_v35  ;;  %3803 = vmatmul.msk.f32.vlgmr.msra.gmra.mxu1 %vm269_vm0, %v5579_v38  ;;  %v5765_v35 = vld [vmem:[#allocation17 + $0x10] sm:$0xff]  ;;  %v1908_v41 = vld [vmem:[#allocation16 + $0xb8] sm:$0xff] }
 0x60e   :  { %3795 = vmatmul.msk.f32.vlgmr.msra.gmra.mxu0 %vm269_vm0, %v5579_v38  ;;  %2162 = vmatpush.msrb.mxu1 %v5590_v40 }
 0x60f   :  { %2142 = vmatpush.msrb.mxu0 %v5577_v13  ;;  %2124 = vmatpush.msra.mxu3 %v5601_v28 }
 0x610   :  { %2163 = vmatpush.msrb.mxu1 %v5598_v14  ;;  %2007 = vmatpush.msra.mxu2 %v1908_v41  ;;  %v1893_v41 = vld [vmem:[#allocation16 + $0x40] sm:$0xff] }
 0x611   :  { %2143 = vmatpush.msrb.mxu0 %v5585_v1  ;;  %2125 = vmatpush.msra.mxu3 %v5614_v10 }
 0x612   :  { %v3950_v16 = vpop.eup %3949  ;;  %2164 = vmatpush.msrb.mxu1 %v5603_v57 }
 0x613   :  { %v1773_v18 = vsub.f32 %v3950_v16, %v5505_v42  ;;  %2144 = vmatpush.msrb.mxu0 %v5592_v60  ;;  %v5619_v16 = vld [vmem:[#allocation5 + $0x8] sm:$0xff] }
 0x614   :  { %2165 = vmatpush.msrb.mxu1 %v5617_v61 }
 0x615   :  { %v1774_v21 = vmul.f32 %v1773_v18, %v1772_v45  ;;  %2145 = vmatpush.msrb.mxu0 %v5605_v58  ;;  %3804 = vmatmul.msk.f32.gmra.mxu1 %vm269_vm0, %v5619_v16  ;;  %v5625_v45 = vld [vmem:[#allocation17 + $0xf8] sm:$0xff] }
 0x616   :  { %3796 = vmatmul.msk.f32.gmra.mxu0 %vm269_vm0, %v5619_v16 }
 0x617   :  { %v1775_v3 = vadd.f32 %v1774_v21, %v5505_v42  ;;  %2146 = vmatpush.msrb.mxu0 %v5610_v11  ;;  %v5629_v21 = vld [vmem:[#allocation17 + $0x108] sm:$0xff] }
 0x618   :  { %2126 = vmatpush.msra.mxu3 %v5629_v21 }
 0x619   :  { %v1776_v32 = vsub.f32 %v1775_v3, %v5505_v42  ;;  %v5631_v3 = vld [vmem:[#allocation17 + $0x118] sm:$0xff]  ;;  %2147 = vmatpush.msrb.mxu0 %v5625_v45 }
 0x61a   :  { %2166 = vmatpush.msrb.mxu1 %v5631_v3 }
 0x61b   :  { %v1777_v25 = vmul.f32 %v1776_v32, %v1618_v49  ;;  %v5634_v49 = vld [vmem:[#allocation17 + $0xe0] sm:$0xff]  ;;  %v5636_v32 = vld [vmem:[#allocation17 + $0xf0] sm:$0xff] }
 0x61c   :  { %2148 = vmatpush.msrb.mxu0 %v5634_v49  ;;  %2127 = vmatpush.msra.mxu3 %v5636_v32 }
 0x61d   :  { %v1778_v50 = vadd.f32 %v1777_v25, %v5505_v42  ;;  %v5640_v25 = vld [vmem:[#allocation17 + $0x100] sm:$0xff]  ;;  %3805 = vmatmul.msk.f32.gmra.mxu1 %vm269_vm0, %v5658_v48 }
 0x61e   :  { %2167 = vmatpush.msrb.mxu1 %v5640_v25  ;;  %2149 = vmatpush.msrb.mxu0 %v5645_v29 }
 0x61f   :  { %1817 = vmatmul.f32.vlgmr.msrb.gmra.mxu2 %v1778_v50  ;;  %v5643_v50 = vld [vmem:[#allocation17 + $0xd8] sm:$0xff]  ;;  %3797 = vmatmul.msk.f32.gmra.mxu0 %vm269_vm0, %v5658_v48 }
 0x620   :  { %2128 = vmatpush.msra.mxu3 %v5643_v50  ;;  %2150 = vmatpush.msrb.mxu0 %v5669_v54 }
 0x622   :  { %2129 = vmatpush.msra.mxu3 %v5651_v0  ;;  %2151 = vmatpush.msrb.mxu0 %v5675_v53 }
 0x624   :  { %2130 = vmatpush.msra.mxu3 %v5667_v37  ;;  %2152 = vmatpush.msrb.mxu0 %v5680_v59 }
 0x625   :  { %3806 = vmatmul.msk.f32.gmra.mxu1 %vm269_vm0, %v5698_v55 }
 0x626   :  { %2153 = vmatpush.msrb.mxu0 %v5696_v31 }
 0x627   :  { %3798 = vmatmul.msk.f32.gmra.mxu0 %vm269_vm0, %v5698_v55 }
 0x628   :  { %2154 = vmatpush.msrb.mxu0 %v5710_v8 }
 0x62a   :  { %2155 = vmatpush.msrb.mxu0 %v5719_v34 }
 0x62c   :  { %2156 = vmatpush.msrb.mxu0 %v5755_v36 }
 0x62d   :  { %3807 = vmatmul.msk.f32.gmra.mxu1 %vm269_vm0, %v5728_v19 }
 0x62e   :  { %2157 = vmatpush.msrb.mxu0 %v5763_v56 }
 0x62f   :  { %3799 = vmatmul.msk.f32.gmra.mxu0 %vm269_vm0, %v5728_v19 }
 0x630   :  { %2329 = vmatpush.msra.mxu0 %v5590_v40 }
 0x632   :  { %2330 = vmatpush.msra.mxu0 %v5598_v14 }
 0x634   :  { %2331 = vmatpush.msra.mxu0 %v5603_v57 }
 0x635   :  { %3808 = vmatmul.msk.f32.gmra.mxu1 %vm269_vm0, %v5735_v6 }
 0x636   :  { %2332 = vmatpush.msra.mxu0 %v5617_v61 }
 0x637   :  { %3800 = vmatmul.msk.f32.gmra.mxu0 %vm269_vm0, %v5735_v6 }
 0x638   :  { %2333 = vmatpush.msra.mxu0 %v5631_v3 }
 0x63a   :  { %2334 = vmatpush.msra.mxu0 %v5640_v25 }
 0x63d   :  { %3809 = vmatmul.msk.f32.gmra.mxu1 %vm269_vm0, %v5741_v5 }
 0x63f   :  { %3801 = vmatmul.msk.f32.gmra.mxu0 %vm269_vm0, %v5741_v5 }
 0x645   :  { %3810 = vmatmul.msk.f32.gmra.mxu1 %vm269_vm0, %v5747_v63 }
 0x647   :  { %3802 = vmatmul.msk.f32.gmra.mxu0 %vm269_vm0, %v5747_v63 }
 0x6a2   :  { %v1818_v47 = vpop.f32.mrf.mxu2 }
 0x6a3   :  { %v5571_v42 = vadd.f32 %v3868_v43, %v1818_v47  ;;  %v5656_v43 = vld [vmem:[#allocation17 + $0xe8] sm:$0xff]  ;;  %v5665_v47 = vld [vmem:[#allocation17 + $0xd0] sm:$0xff] }
 0x6a4   :  { %2168 = vmatpush.msrb.mxu1 %v5656_v43  ;;  %2335 = vmatpush.msra.mxu0 %v5656_v43 }
 0x6a5   :  { %6607 = vst [vmem:[#allocation41_spill] sm:$0xff] %v5571_v42  ;;  %v1822_v44 = vmul.f32 0.5, %v5571_v42 }
 0x6a6   :  { %1878 = vst.msk [vmem:[#allocation24] sm:$0xff] %vm1836_vm5, %v5571_v42  ;;  %2169 = vmatpush.msrb.mxu1 %v5665_v47  ;;  %2336 = vmatpush.msra.mxu0 %v5665_v47 }
 0x6a7   :  { %v1823_v15 = vmul.f32 1.442695, %v1822_v44  ;;  %v5673_v44 = vld [vmem:[#allocation17 + $0x90] sm:$0xff] }
 0x6a8   :  { %2131 = vmatpush.msra.mxu3 %v5673_v44 }
 0x6a9   :  { %3951 = vpow2.f32 %v1823_v15  ;;  %v5678_v15 = vld [vmem:[#allocation17 + $0xb8] sm:$0xff] }
 0x6aa   :  { %2170 = vmatpush.msrb.mxu1 %v5678_v15  ;;  %2132 = vmatpush.msra.mxu3 %v5684_v30 }
 0x6ab   :  { %2337 = vmatpush.msra.mxu0 %v5678_v15 }
 0x6af   :  { %v3952_v52 = vpop.eup %3951 }
 0x6b0   :  { %1826 = vrot.lane.b32.xlu0 %v3952_v52, %s4487_s13  ;;  %v5687_v52 = vld [vmem:[#allocation17 + $0xa0] sm:$0xff] }
 0x6b1   :  { %2171 = vmatpush.msrb.mxu1 %v5687_v52  ;;  %2338 = vmatpush.msra.mxu0 %v5687_v52 }
 0x6b3   :  { %2172 = vmatpush.msrb.mxu1 %v5694_v51  ;;  %2339 = vmatpush.msra.mxu0 %v5694_v51 }
 0x6b5   :  { %2173 = vmatpush.msrb.mxu1 %v5706_v22  ;;  %2340 = vmatpush.msra.mxu0 %v5706_v22 }
 0x6b7   :  { %2174 = vmatpush.msrb.mxu1 %v5717_v12  ;;  %2341 = vmatpush.msra.mxu0 %v5717_v12 }
 0x6b8   :  { %1833 = vrot.lane.b32.xlu0 %v1831_v23, %s4488_s26  ;;  %v5691_v23 = vld [vmem:[#allocation17 + $0x60] sm:$0xff] }
 0x6b9   :  { %2133 = vmatpush.msra.mxu3 %v5691_v23  ;;  %2175 = vmatpush.msrb.mxu1 %v5724_v26 }
 0x6ba   :  { %2342 = vmatpush.msra.mxu0 %v5724_v26 }
 0x6bb   :  { %2134 = vmatpush.msra.mxu3 %v5708_v46  ;;  %2176 = vmatpush.msrb.mxu1 %v5757_v4 }
 0x6bc   :  { %2343 = vmatpush.msra.mxu0 %v5757_v4 }
 0x6bd   :  { %2135 = vmatpush.msra.mxu3 %v5714_v24  ;;  %2177 = vmatpush.msrb.mxu1 %v5765_v35 }
 0x6be   :  { %2344 = vmatpush.msra.mxu0 %v5765_v35 }
 0x6bf   :  { %2136 = vmatpush.msra.mxu3 %v5753_v27  ;;  %2457 = vmatpush.msra.mxu1 %v5588_v9 }
 0x6c1   :  { %2137 = vmatpush.msra.mxu3 %v5761_v33  ;;  %2458 = vmatpush.msra.mxu1 %v5596_v20 }
 0x6c3   :  { %2459 = vmatpush.msra.mxu1 %v5601_v28 }
 0x6c5   :  { %2460 = vmatpush.msra.mxu1 %v5614_v10 }
 0x6c7   :  { %2461 = vmatpush.msra.mxu1 %v5629_v21 }
 0x6c9   :  { %2462 = vmatpush.msra.mxu1 %v5636_v32 }
 0x6cb   :  { %2463 = vmatpush.msra.mxu1 %v5643_v50 }
 0x6cd   :  { %2464 = vmatpush.msra.mxu1 %v5651_v0 }
 0x6cf   :  { %2465 = vmatpush.msra.mxu1 %v5667_v37 }
 0x6d1   :  { %2466 = vmatpush.msra.mxu1 %v5673_v44 }
 0x6d3   :  { %2467 = vmatpush.msra.mxu1 %v5684_v30 }
 0x6d5   :  { %2468 = vmatpush.msra.mxu1 %v5691_v23 }
 0x6d7   :  { %2469 = vmatpush.msra.mxu1 %v5708_v46 }
 0x6d9   :  { %2470 = vmatpush.msra.mxu1 %v5714_v24 }
 0x6db   :  { %2471 = vmatpush.msra.mxu1 %v5753_v27 }
 0x6dd   :  { %2472 = vmatpush.msra.mxu1 %v5761_v33 }
 0x722   :  { %v1827_v2 = vpop.permute.xlu0 %1826 }
 0x723   :  { %v1829_v18 = vmul.f32 %v1827_v2, %v1821_v62  ;;  %v1905_v62 = vld [vmem:[#allocation16 + $0xa0] sm:$0xff]  ;;  %v1902_v2 = vld [vmem:[#allocation16 + $0x88] sm:$0xff] }
 0x724   :  { %2008 = vmatpush.msra.mxu2 %v1905_v62  ;;  %v1890_v62 = vld [vmem:[#allocation16 + $0x28] sm:$0xff] }
 0x725   :  { %v1830_v39 = vadd.f32 %v1829_v18, %v5571_v42  ;;  %v1899_v18 = vld [vmem:[#allocation16 + $0x70] sm:$0xff] }
 0x726   :  { %2009 = vmatpush.msra.mxu2 %v1902_v2  ;;  %v5792_v2 = vld [vmem:[%s6553_s10] sm:$0x7] }
 0x727   :  { %v5803_v42 = vperm.slane %v5792_v2, 1 }
 0x728   :  { %2010 = vmatpush.msra.mxu2 %v1899_v18  ;;  %v1887_v18 = vld [vmem:[#allocation16 + $0x10] sm:$0xff] }
 0x729   :  { %6611 = vst [vmem:[#allocation38_spill] sm:$0xff] %v5803_v42 }
 0x72a   :  { %v1834_v7 = vpop.permute.xlu0 %1833 }
 0x72b   :  { %v1837_v17 = vsel %vm1836_vm5, %v1830_v39, %v1834_v7  ;;  %v1896_v39 = vld [vmem:[#allocation16 + $0x58] sm:$0xff]  ;;  %v5779_v7 = vpop.f32.mrf.mxu0 }
 0x72c   :  { %1884 = vst [vmem:[#allocation27] sm:$0xff] %v1837_v17  ;;  %1874 = vmatmul.f32.vlgmr.msrb.gmra.mxu3 %v1837_v17  ;;  %v5781_v17 = vpop.f32.mrf.mxu1  ;;  %2011 = vmatpush.msra.mxu2 %v1896_v39  ;;  %v5800_v39 = vperm.slane %v5792_v2, 0 }
 0x72d   :  { %2309 = vmatpush.msrb.mxu3 %v5577_v13  ;;  %6608 = vst [vmem:[#allocation43_spill] sm:$0xff] %v5779_v7  ;;  %3729 = dma.vmem_to_hbm [thread:$0]  %s3725_s2, 128, %s3727_s30, [#allocation28]  }
 0x72e   :  { %6609 = vst [vmem:[#allocation39_spill] sm:$0xff] %v5781_v17  ;;  %2012 = vmatpush.msra.mxu2 %v1893_v41 }
 0x72f   :  { %2310 = vmatpush.msrb.mxu3 %v5585_v1  ;;  %6610 = vst [vmem:[#allocation42_spill] sm:$0xff] %v5800_v39 }
 0x730   :  { %2013 = vmatpush.msra.mxu2 %v1890_v62 }
 0x731   :  { %2311 = vmatpush.msrb.mxu3 %v5592_v60 }
 0x732   :  { %2014 = vmatpush.msra.mxu2 %v1887_v18 }
 0x733   :  { %2312 = vmatpush.msrb.mxu3 %v5605_v58  ;;  %v1937_v7 = vpop.f32.mrf.mxu0  ;;  %3811 = vmatmul.msk.f32.vlgmr.msra.gmra.mxu2 %vm269_vm0, %v5579_v38 }
 0x734   :  { %v1978_v17 = vpop.f32.mrf.mxu1  ;;  %v5809_v41 = vadd.f32 %v1937_v7, %v5800_v39  ;;  %2289 = vmatpush.msrb.mxu2 %v5588_v9 }
 0x735   :  { %2313 = vmatpush.msrb.mxu3 %v5610_v11  ;;  %v5812_v62 = vadd.f32 %v1978_v17, %v5803_v42 }
 0x736   :  { %2290 = vmatpush.msrb.mxu2 %v5596_v20 }
 0x737   :  { %2314 = vmatpush.msrb.mxu3 %v5625_v45 }
 0x738   :  { %2291 = vmatpush.msrb.mxu2 %v5601_v28  ;;  %v3869_v28 = vld [vmem:[%s6558_s15] ss:$0 sm:$0xff] }
 0x739   :  { %2315 = vmatpush.msrb.mxu3 %v5634_v49 }
 0x73a   :  { %2292 = vmatpush.msrb.mxu2 %v5614_v10 }
 0x73b   :  { %2316 = vmatpush.msrb.mxu3 %v5645_v29  ;;  %v1940_v38 = vpop.f32.mrf.mxu0  ;;  %3812 = vmatmul.msk.f32.gmra.mxu2 %vm269_vm0, %v5619_v16 }
 0x73c   :  { %v5831_v9 = vadd.f32 %v1940_v38, %v5800_v39  ;;  %v1981_v7 = vpop.f32.mrf.mxu1  ;;  %2293 = vmatpush.msrb.mxu2 %v5629_v21 }
 0x73d   :  { %2317 = vmatpush.msrb.mxu3 %v5669_v54  ;;  %v5836_v20 = vadd.f32 %v1981_v7, %v5803_v42 }
 0x73e   :  { %2294 = vmatpush.msrb.mxu2 %v5636_v32 }
 0x73f   :  { %2318 = vmatpush.msrb.mxu3 %v5675_v53 }
 0x740   :  { %2295 = vmatpush.msrb.mxu2 %v5643_v50 }
 0x741   :  { %2319 = vmatpush.msrb.mxu3 %v5680_v59 }
 0x742   :  { %2296 = vmatpush.msrb.mxu2 %v5651_v0 }
 0x743   :  { %2320 = vmatpush.msrb.mxu3 %v5696_v31  ;;  %v1943_v21 = vpop.f32.mrf.mxu0  ;;  %3813 = vmatmul.msk.f32.gmra.mxu2 %vm269_vm0, %v5658_v48 }
 0x744   :  { %v5861_v32 = vadd.f32 %v1943_v21, %v5800_v39  ;;  %v1984_v17 = vpop.f32.mrf.mxu1  ;;  %2297 = vmatpush.msrb.mxu2 %v5667_v37 }
 0x745   :  { %2321 = vmatpush.msrb.mxu3 %v5710_v8  ;;  %v5865_v18 = vadd.f32 %v1984_v17, %v5803_v42 }
 0x746   :  { %6612 = vst [vmem:[#allocation40_spill] sm:$0xff] %v5861_v32  ;;  %2298 = vmatpush.msrb.mxu2 %v5673_v44 }
 0x747   :  { %2322 = vmatpush.msrb.mxu3 %v5719_v34  ;;  %6613 = vst [vmem:[#allocation44_spill] sm:$0xff] %v5865_v18 }
 0x748   :  { %2299 = vmatpush.msrb.mxu2 %v5684_v30 }
 0x749   :  { %2323 = vmatpush.msrb.mxu3 %v5755_v36 }
 0x74a   :  { %2300 = vmatpush.msrb.mxu2 %v5691_v23 }
 0x74b   :  { %2324 = vmatpush.msrb.mxu3 %v5763_v56  ;;  %v1946_v50 = vpop.f32.mrf.mxu0  ;;  %3814 = vmatmul.msk.f32.gmra.mxu2 %vm269_vm0, %v5698_v55 }
 0x74c   :  { %v5880_v0 = vadd.f32 %v1946_v50, %v5800_v39  ;;  %v1987_v48 = vpop.f32.mrf.mxu1  ;;  %2301 = vmatpush.msrb.mxu2 %v5708_v46 }
 0x74e   :  { %6614 = vst [vmem:[#allocation45_spill] sm:$0xff] %v5880_v0  ;;  %2302 = vmatpush.msrb.mxu2 %v5714_v24 }
 0x750   :  { %2303 = vmatpush.msrb.mxu2 %v5753_v27 }
 0x752   :  { %2304 = vmatpush.msrb.mxu2 %v5761_v33 }
 0x753   :  { %3815 = vmatmul.msk.f32.gmra.mxu2 %vm269_vm0, %v5728_v19 }
 0x754   :  { %v1990_v37 = vpop.f32.mrf.mxu1  ;;  %2477 = vmatpush.msra.mxu2 %v5577_v13 }
 0x756   :  { %2478 = vmatpush.msra.mxu2 %v5585_v1  ;;  %v6621_v1 = vld [vmem:[#allocation39_spill] sm:$0xff] }
 0x758   :  { %2479 = vmatpush.msra.mxu2 %v5592_v60  ;;  %v1976_v60 = vadd.f32 %v6621_v1, %v5803_v42 }
 0x75a   :  { %2480 = vmatpush.msra.mxu2 %v5605_v58 }
 0x75b   :  { %3816 = vmatmul.msk.f32.gmra.mxu2 %vm269_vm0, %v5735_v6 }
 0x75c   :  { %2481 = vmatpush.msra.mxu2 %v5610_v11 }
 0x75e   :  { %2482 = vmatpush.msra.mxu2 %v5625_v45 }
 0x760   :  { %2483 = vmatpush.msra.mxu2 %v5634_v49  ;;  %v6622_v49 = vld [vmem:[#allocation43_spill] sm:$0xff] }
 0x762   :  { %2484 = vmatpush.msra.mxu2 %v5645_v29  ;;  %v1935_v29 = vadd.f32 %v6622_v49, %v5800_v39 }
 0x763   :  { %3817 = vmatmul.msk.f32.gmra.mxu2 %vm269_vm0, %v5741_v5 }
 0x764   :  { %2485 = vmatpush.msra.mxu2 %v5669_v54 }
 0x766   :  { %2486 = vmatpush.msra.mxu2 %v5675_v53 }
 0x768   :  { %2487 = vmatpush.msra.mxu2 %v5680_v59 }
 0x76a   :  { %2488 = vmatpush.msra.mxu2 %v5696_v31 }
 0x76b   :  { %3818 = vmatmul.msk.f32.gmra.mxu2 %vm269_vm0, %v5747_v63 }
 0x76c   :  { %2489 = vmatpush.msra.mxu2 %v5710_v8 }
 0x76e   :  { %2490 = vmatpush.msra.mxu2 %v5719_v34  ;;  %v5953_v34 = vperm.slane %v5792_v2, 2 }
 0x770   :  { %2491 = vmatpush.msra.mxu2 %v5755_v36 }
 0x772   :  { %2492 = vmatpush.msra.mxu2 %v5763_v56 }
 0x7af   :  { %v1875_v10 = vpop.f32.mrf.mxu3 }
 0x7b0   :  { %v5852_v16 = vadd.f32 %v3869_v28, %v1875_v10 }
 0x7b2   :  { %2138 = vmatmul.f32.vlgmr.msra.gmra.mxu3 %v5852_v16  ;;  %2158 = vmatmul.f32.vlgmr.msrb.gmra.mxu0 %v5852_v16 }
 0x7b3   :  { %2178 = vmatmul.f32.vlgmr.msrb.gmra.mxu1 %v5852_v16  ;;  %2497 = vmatpush.msra.mxu3 %v5590_v40  ;;  %v5884_v40 = vadd.f32 %v1987_v48, %v5803_v42 }
 0x7b5   :  { %2498 = vmatpush.msra.mxu3 %v5598_v14  ;;  %6615 = vst [vmem:[#allocation46_spill] sm:$0xff] %v5884_v40  ;;  %v1949_v14 = vpop.f32.mrf.mxu0 }
 0x7b6   :  { %v2016_v5 = vpop.f32.mrf.mxu2 }
 0x7b7   :  { %2499 = vmatpush.msra.mxu3 %v5603_v57  ;;  %v5896_v57 = vadd.f32 %v1949_v14, %v5800_v39  ;;  %v2017_v33 = vadd.f32 %v2016_v5, %v5953_v34 }
 0x7b9   :  { %2500 = vmatpush.msra.mxu3 %v5617_v61  ;;  %6616 = vst [vmem:[#allocation47_spill] sm:$0xff] %v5896_v57  ;;  %v5900_v61 = vadd.f32 %v1990_v37, %v5803_v42 }
 0x7bb   :  { %2501 = vmatpush.msra.mxu3 %v5631_v3  ;;  %6617 = vst [vmem:[#allocation48_spill] sm:$0xff] %v5900_v61 }
 0x7bd   :  { %2502 = vmatpush.msra.mxu3 %v5640_v25  ;;  %v1952_v3 = vpop.f32.mrf.mxu0 }
 0x7be   :  { %v5913_v25 = vadd.f32 %v1952_v3, %v5800_v39  ;;  %v2019_v49 = vpop.f32.mrf.mxu2  ;;  %v6141_v39 = vld [vmem:[#allocation17 + $0x18] sm:$0xff] }
 0x7bf   :  { %2503 = vmatpush.msra.mxu3 %v5656_v43  ;;  %v1993_v43 = vpop.f32.mrf.mxu1 }
 0x7c0   :  { %6618 = vst [vmem:[#allocation49_spill] sm:$0xff] %v5913_v25 }
 0x7c1   :  { %2504 = vmatpush.msra.mxu3 %v5665_v47  ;;  %v5916_v47 = vadd.f32 %v1993_v43, %v5803_v42  ;;  %v2072_v43 = vld [vmem:[#allocation8] sm:$0xff]  ;;  %v6133_v42 = vld [vmem:[#allocation17 + $0x40] sm:$0xff] }
 0x7c3   :  { %2505 = vmatpush.msra.mxu3 %v5678_v15  ;;  %6619 = vst [vmem:[#allocation50_spill] sm:$0xff] %v5916_v47  ;;  %v6145_v47 = vld [vmem:[#allocation17 + $0x28] sm:$0xff] }
 0x7c5   :  { %2506 = vmatpush.msra.mxu3 %v5687_v52  ;;  %v5942_v13 = vpop.f32.mrf.mxu0 }
 0x7c6   :  { %6620 = vst [vmem:[#allocation51_spill] sm:$0xff] %v5942_v13 }
 0x7c7   :  { %2507 = vmatpush.msra.mxu3 %v5694_v51  ;;  %v5948_v23 = vpop.f32.mrf.mxu1 }
 0x7c8   :  { %6623 = vst [vmem:[#allocation39_spill] sm:$0xff] %v5948_v23  ;;  %v6131_v23 = vld [vmem:[#allocation17 + $0x38] sm:$0xff] }
 0x7c9   :  { %2508 = vmatpush.msra.mxu3 %v5706_v22 }
 0x7cb   :  { %2509 = vmatpush.msra.mxu3 %v5717_v12  ;;  %v5950_v12 = vld [vmem:[#allocation19] ss:$0 sm:$0xff] }
 0x7cd   :  { %2510 = vmatpush.msra.mxu3 %v5724_v26 }
 0x7cf   :  { %2511 = vmatpush.msra.mxu3 %v5757_v4 }
 0x7d1   :  { %2512 = vmatpush.msra.mxu3 %v5765_v35 }
 0x82f   :  { %v2159_v58 = vpop.f32.mrf.mxu0 }
 0x830   :  { %v2202_v11 = vadd.f32 %v2159_v58, %v1976_v60  ;;  %v2179_v6 = vpop.f32.mrf.mxu1 }
 0x831   :  { %v2222_v4 = vadd.f32 %v5950_v12, %v2179_v6 }
 0x832   :  { %v3820_v45 = vmul.f32 -1.442695, %v2202_v11 }
 0x834   :  { %3953 = vpow2.f32 %v3820_v45 }
 0x835   :  { %v2139_v54 = vpop.f32.mrf.mxu3 }
 0x836   :  { %v2182_v44 = vadd.f32 %v2139_v54, %v1935_v29  ;;  %v5968_v29 = vpop.f32.mrf.mxu2 }
 0x838   :  { %v3819_v53 = vmul.f32 -1.442695, %v2182_v44 }
 0x83a   :  { %v3954_v15 = vpop.eup %3953  ;;  %3955 = vpow2.f32 %v3819_v53 }
 0x83b   :  { %v2206_v59 = vadd.f32 1.0, %v3954_v15 }
 0x83d   :  { %3957 = vrcp.f32 %v2206_v59  ;;  %v2218_v7 = vand.u32 2147483648, %v2206_v59  ;;  %vm2212_vm10 = vweird.f32 %v2206_v59  ;;  %v2216_v10 = vand.u32 2147483647, %v2206_v59 }
 0x83e   :  { %v5970_v54 = vpop.f32.mrf.mxu2 }
 0x83f   :  { %v2219_v17 = vor.u32 1.1754944e-38, %v2218_v7  ;;  %vm2217_vm12 = vcmp.eq.f32.partialorder %v2216_v10, 8.507059e+37  ;;  %6625 = vst [vmem:[#allocation52_spill] sm:$0xff] %v5970_v54 }
 0x840   :  { %v3956_v30 = vpop.eup %3955 }
 0x841   :  { %v2186_v52 = vadd.f32 1.0, %v3956_v30 }
 0x843   :  { %3959 = vrcp.f32 %v2186_v52  ;;  %v3958_v51 = vpop.eup %3957  ;;  %v2198_v24 = vand.u32 2147483648, %v2186_v52  ;;  %v2196_v19 = vand.u32 2147483647, %v2186_v52  ;;  %vm2192_vm6 = vweird.f32 %v2186_v52 }
 0x844   :  { %v2208_v55 = vmul.f32 %v3958_v51, %v2206_v59  ;;  %vm2213_vm9 = vweird.f32 %v3958_v51 }
 0x845   :  { %v2199_v36 = vor.u32 1.1754944e-38, %v2198_v24  ;;  %vm2197_vm8 = vcmp.eq.f32.partialorder %v2196_v19, 8.507059e+37  ;;  %vm2214_vm11 = vmor %vm2212_vm10, %vm2213_vm9 }
 0x846   :  { %v2209_v8 = vsub.f32 1.0, %v2208_v55  ;;  %v5972_v44 = vpop.f32.mrf.mxu2 }
 0x847   :  { %6626 = vst [vmem:[#allocation53_spill] sm:$0xff] %v5972_v44 }
 0x848   :  { %v2210_v27 = vmul.f32 %v3958_v51, %v2209_v8 }
 0x849   :  { %v3960_v31 = vpop.eup %3959 }
 0x84a   :  { %v2188_v22 = vmul.f32 %v3960_v31, %v2186_v52  ;;  %vm2193_vm0 = vweird.f32 %v3960_v31  ;;  %v2211_v2 = vadd.f32 %v3958_v51, %v2210_v27 }
 0x84b   :  { %vm2194_vm7 = vmor %vm2192_vm6, %vm2193_vm0 }
 0x84c   :  { %v2189_v46 = vsub.f32 1.0, %v2188_v22  ;;  %v2215_v21 = vsel %vm2214_vm11, %v3958_v51, %v2211_v2 }
 0x84d   :  { %v2220_v50 = vsel %vm2217_vm12, %v2219_v17, %v2215_v21 }
 0x84e   :  { %v2190_v26 = vmul.f32 %v3960_v31, %v2189_v46  ;;  %v2226_v14 = vsub.f32 1.0, %v2220_v50  ;;  %v5974_v53 = vpop.f32.mrf.mxu2 }
 0x84f   :  { %6627 = vst [vmem:[#allocation54_spill] sm:$0xff] %v5974_v53 }
 0x850   :  { %v2191_v63 = vadd.f32 %v3960_v31, %v2190_v26 }
 0x852   :  { %v2195_v56 = vsel %vm2194_vm7, %v3960_v31, %v2191_v63 }
 0x853   :  { %v2200_v35 = vsel %vm2197_vm8, %v2199_v36, %v2195_v56 }
 0x854   :  { %v2223_v38 = vmul.f32 %v2222_v4, %v2200_v35 }
 0x856   :  { %v2224_v28 = vadd.f32 %v2223_v38, %v2017_v33  ;;  %v5976_v15 = vpop.f32.mrf.mxu2 }
 0x857   :  { %6628 = vst [vmem:[#allocation55_spill] sm:$0xff] %v5976_v15  ;;  %v6143_v15 = vld [vmem:[#allocation17 + $0x20] sm:$0xff] }
 0x858   :  { %3961 = vtanh.f32 %v2224_v28  ;;  %v2020_v28 = vadd.f32 %v2019_v49, %v5953_v34 }
 0x85e   :  { %v3962_v48 = vpop.eup %3961  ;;  %v5978_v59 = vpop.f32.mrf.mxu2 }
 0x85f   :  { %v2227_v37 = vsub.f32 %v3962_v48, %v5852_v16  ;;  %6629 = vst [vmem:[#allocation56_spill] sm:$0xff] %v5978_v59  ;;  %v6129_v59 = vld [vmem:[#allocation17 + $0x30] sm:$0xff] }
 0x861   :  { %v2228_v3 = vmul.f32 %v2227_v37, %v2226_v14 }
 0x863   :  { %v2229_v1 = vadd.f32 %v2228_v3, %v5852_v16 }
 0x865   :  { %v2230_v60 = vsub.f32 %v2229_v1, %v5852_v16  ;;  %v5960_v58 = vmul.f32 %v2229_v1, %v2072_v43 }
 0x867   :  { %6624 = vst [vmem:[#allocation43_spill] sm:$0xff] %v5960_v58  ;;  %v2231_v11 = vmul.f32 %v2230_v60, %v2072_v43  ;;  %v6155_v58 = vld [vmem:[#allocation17 + $0x10] sm:$0xff] }
 0x869   :  { %v5963_v45 = vadd.f32 %v2231_v11, %v5852_v16 }
 0x86b   :  { %2305 = vmatmul.f32.vlgmr.msrb.gmra.mxu2 %v5963_v45  ;;  %2325 = vmatmul.f32.vlgmr.msrb.gmra.mxu3 %v5963_v45 }
 0x86c   :  { %2345 = vmatmul.f32.vlgmr.msra.gmra.mxu0 %v5963_v45 }
 0x8e9   :  { %v2346_v4 = vpop.f32.mrf.mxu0 }
 0x8ea   :  { %v2389_v38 = vadd.f32 %v5950_v12, %v2346_v4 }
 0x8ee   :  { %v2306_v16 = vpop.f32.mrf.mxu2  ;;  %v2326_v30 = vpop.f32.mrf.mxu3 }
 0x8ef   :  { %v2349_v52 = vadd.f32 %v2306_v16, %v5809_v41  ;;  %v2369_v51 = vadd.f32 %v2326_v30, %v5812_v62  ;;  %v2239_v16 = vld [vmem:[#allocation8 + $0x8] sm:$0xff] }
 0x8f1   :  { %v3821_v31 = vmul.f32 -1.442695, %v2349_v52  ;;  %v3822_v55 = vmul.f32 -1.442695, %v2369_v51 }
 0x8f3   :  { %3963 = vpow2.f32 %v3821_v31 }
 0x8f4   :  { %3965 = vpow2.f32 %v3822_v55  ;;  %v5995_v55 = vld [vmem:[#allocation17 + $0x168] sm:$0xff] }
 0x8f5   :  { %6631 = vst [vmem:[#allocation58_spill] sm:$0xff] %v5995_v55  ;;  %2625 = vmatpush.msrb.mxu0 %v5995_v55  ;;  %2793 = vmatpush.msrb.mxu3 %v5995_v55 }
 0x8f9   :  { %v3964_v22 = vpop.eup %3963 }
 0x8fa   :  { %v3966_v46 = vpop.eup %3965  ;;  %v2353_v8 = vadd.f32 1.0, %v3964_v22  ;;  %v5997_v22 = vld [vmem:[#allocation17 + $0x170] sm:$0xff] }
 0x8fb   :  { %v2373_v24 = vadd.f32 1.0, %v3966_v46  ;;  %6632 = vst [vmem:[#allocation59_spill] sm:$0xff] %v5997_v22  ;;  %v5999_v46 = vld [vmem:[#allocation17 + $0x178] sm:$0xff]  ;;  %2645 = vmatpush.msrb.mxu1 %v5997_v22 }
 0x8fc   :  { %3967 = vrcp.f32 %v2353_v8  ;;  %v2365_v27 = vand.u32 2147483648, %v2353_v8  ;;  %v2363_v62 = vand.u32 2147483647, %v2353_v8  ;;  %vm2359_vm14 = vweird.f32 %v2353_v8  ;;  %2665 = vmatpush.msrb.mxu2 %v5999_v46 }
 0x8fd   :  { %3969 = vrcp.f32 %v2373_v24  ;;  %v2385_v50 = vand.u32 2147483648, %v2373_v24  ;;  %vm2379_vm3 = vweird.f32 %v2373_v24  ;;  %v2383_v48 = vand.u32 2147483647, %v2373_v24 }
 0x8fe   :  { %v2366_v56 = vor.u32 1.1754944e-38, %v2365_v27  ;;  %vm2364_vm1 = vcmp.eq.f32.partialorder %v2363_v62, 8.507059e+37  ;;  %v6028_v27 = vld [vmem:[#allocation17 + $0x130] sm:$0xff]  ;;  %v6038_v62 = vld [vmem:[#allocation17 + $0x118] sm:$0xff] }
 0x8ff   :  { %v2386_v37 = vor.u32 1.1754944e-38, %v2385_v50  ;;  %vm2384_vm0 = vcmp.eq.f32.partialorder %v2383_v48, 8.507059e+37 }
 0x902   :  { %v3968_v26 = vpop.eup %3967 }
 0x903   :  { %v3970_v19 = vpop.eup %3969  ;;  %v2355_v6 = vmul.f32 %v3968_v26, %v2353_v8  ;;  %vm2360_vm13 = vweird.f32 %v3968_v26  ;;  %v6006_v8 = vld [vmem:[#allocation17 + $0x158] sm:$0xff] }
 0x904   :  { %v2375_v5 = vmul.f32 %v3970_v19, %v2373_v24  ;;  %vm2361_vm15 = vmor %vm2359_vm14, %vm2360_vm13  ;;  %vm2380_vm2 = vweird.f32 %v3970_v19  ;;  %v6008_v24 = vld [vmem:[#allocation17 + $0x160] sm:$0xff]  ;;  %2646 = vmatpush.msrb.mxu1 %v6006_v8 }
 0x905   :  { %v2356_v63 = vsub.f32 1.0, %v2355_v6  ;;  %vm2381_vm4 = vmor %vm2379_vm3, %vm2380_vm2  ;;  %2666 = vmatpush.msrb.mxu2 %v6008_v24  ;;  %v6018_v6 = vld [vmem:[#allocation17 + $0x148] sm:$0xff] }
 0x906   :  { %v2376_v36 = vsub.f32 1.0, %v2375_v5  ;;  %6633 = vst [vmem:[#allocation60_spill] sm:$0xff] %v6018_v6  ;;  %v6024_v5 = vld [vmem:[#allocation17 + $0x120] sm:$0xff] }
 0x907   :  { %v2357_v41 = vmul.f32 %v3968_v26, %v2356_v63  ;;  %2667 = vmatpush.msrb.mxu2 %v6018_v6  ;;  %v6026_v63 = vld [vmem:[#allocation17 + $0x128] sm:$0xff] }
 0x908   :  { %v2377_v35 = vmul.f32 %v3970_v19, %v2376_v36  ;;  %v6034_v36 = vld [vmem:[#allocation17 + $0x108] sm:$0xff] }
 0x909   :  { %v2358_v33 = vadd.f32 %v3968_v26, %v2357_v41  ;;  %2668 = vmatpush.msrb.mxu2 %v6028_v27  ;;  %v6036_v41 = vld [vmem:[#allocation17 + $0x110] sm:$0xff] }
 0x90a   :  { %v2378_v21 = vadd.f32 %v3970_v19, %v2377_v35  ;;  %v6047_v35 = vld [vmem:[#allocation17 + $0xf8] sm:$0xff] }
 0x90b   :  { %v2362_v2 = vsel %vm2361_vm15, %v3968_v26, %v2358_v33  ;;  %v6014_v26 = vld [vmem:[#allocation17 + $0x138] sm:$0xff]  ;;  %2669 = vmatpush.msrb.mxu2 %v6038_v62 }
 0x90c   :  { %v2367_v7 = vsel %vm2364_vm1, %v2366_v56, %v2362_v2  ;;  %v2382_v14 = vsel %vm2381_vm4, %v3970_v19, %v2378_v21  ;;  %v6016_v19 = vld [vmem:[#allocation17 + $0x140] sm:$0xff]  ;;  %v6045_v56 = vld [vmem:[#allocation17 + $0xf0] sm:$0xff]  ;;  %v6067_v21 = vld [vmem:[#allocation17 + $0xc8] sm:$0xff] }
 0x90d   :  { %v2390_v10 = vmul.f32 %v2389_v38, %v2367_v7  ;;  %v2387_v3 = vsel %vm2384_vm0, %v2386_v37, %v2382_v14  ;;  %2647 = vmatpush.msrb.mxu1 %v6016_v19  ;;  %v6052_v38 = vld [vmem:[#allocation17 + $0x100] sm:$0xff]  ;;  %v6055_v7 = vld [vmem:[#allocation17 + $0xd8] sm:$0xff]  ;;  %v6076_v14 = vld [vmem:[#allocation17 + $0xa8] sm:$0xff] }
 0x90e   :  { %v2393_v1 = vsub.f32 1.0, %v2387_v3  ;;  %2670 = vmatpush.msrb.mxu2 %v6052_v38  ;;  %v6078_v37 = vld [vmem:[#allocation17 + $0xb0] sm:$0xff]  ;;  %v6080_v3 = vld [vmem:[#allocation17 + $0xb8] sm:$0xff] }
 0x90f   :  { %v2391_v17 = vadd.f32 %v2390_v10, %v2020_v28  ;;  %2648 = vmatpush.msrb.mxu1 %v6026_v63  ;;  %v6059_v28 = vld [vmem:[#allocation17 + $0xe8] sm:$0xff]  ;;  %v6065_v10 = vld [vmem:[#allocation17 + $0xc0] sm:$0xff] }
 0x910   :  { %2671 = vmatpush.msrb.mxu2 %v6059_v28 }
 0x911   :  { %3971 = vtanh.f32 %v2391_v17  ;;  %2649 = vmatpush.msrb.mxu1 %v6036_v41  ;;  %v6069_v17 = vld [vmem:[#allocation17 + $0xd0] sm:$0xff] }
 0x912   :  { %2672 = vmatpush.msrb.mxu2 %v6069_v17 }
 0x913   :  { %2650 = vmatpush.msrb.mxu1 %v6047_v35 }
 0x914   :  { %2673 = vmatpush.msrb.mxu2 %v6080_v3 }
 0x917   :  { %v3972_v43 = vpop.eup %3971 }
 0x918   :  { %v2394_v60 = vsub.f32 %v3972_v43, %v5963_v45 }
 0x91a   :  { %v2395_v11 = vmul.f32 %v2394_v60, %v2393_v1  ;;  %v6086_v1 = vld [vmem:[#allocation17 + $0x90] sm:$0xff]  ;;  %v6090_v60 = vld [vmem:[#allocation17 + $0xa0] sm:$0xff] }
 0x91b   :  { %2674 = vmatpush.msrb.mxu2 %v6090_v60 }
 0x91c   :  { %v2396_v49 = vadd.f32 %v2395_v11, %v5963_v45 }
 0x91e   :  { %v2397_v30 = vsub.f32 %v2396_v49, %v5963_v45  ;;  %v5987_v52 = vmul.f32 %v2396_v49, %v2239_v16  ;;  %v6098_v49 = vld [vmem:[#allocation17 + $0x80] sm:$0xff] }
 0x920   :  { %6630 = vst [vmem:[#allocation57_spill] sm:$0xff] %v5987_v52  ;;  %v2398_v51 = vmul.f32 %v2397_v30, %v2239_v16  ;;  %v6096_v16 = vld [vmem:[#allocation17 + $0x78] sm:$0xff]  ;;  %v6100_v30 = vld [vmem:[#allocation17 + $0x88] sm:$0xff] }
 0x921   :  { %2675 = vmatpush.msrb.mxu2 %v6100_v30  ;;  %v6153_v52 = vld [vmem:[#allocation17 + $0x8] sm:$0xff] }
 0x922   :  { %v5990_v31 = vadd.f32 %v2398_v51, %v5963_v45  ;;  %v6004_v45 = vld [vmem:[#allocation17 + $0x150] sm:$0xff] }
 0x923   :  { %2626 = vmatpush.msrb.mxu0 %v6004_v45  ;;  %2794 = vmatpush.msrb.mxu3 %v6004_v45 }
 0x924   :  { %2473 = vmatmul.f32.vlgmr.msra.gmra.mxu1 %v5990_v31  ;;  %2493 = vmatmul.f32.vlgmr.msra.gmra.mxu2 %v5990_v31 }
 0x925   :  { %2513 = vmatmul.f32.vlgmr.msra.gmra.mxu3 %v5990_v31  ;;  %2627 = vmatpush.msrb.mxu0 %v6014_v26 }
 0x926   :  { %2795 = vmatpush.msrb.mxu3 %v6014_v26 }
 0x927   :  { %2628 = vmatpush.msrb.mxu0 %v6024_v5 }
 0x928   :  { %2796 = vmatpush.msrb.mxu3 %v6024_v5 }
 0x929   :  { %2629 = vmatpush.msrb.mxu0 %v6034_v36 }
 0x92a   :  { %2797 = vmatpush.msrb.mxu3 %v6034_v36 }
 0x92b   :  { %2630 = vmatpush.msrb.mxu0 %v6045_v56 }
 0x92c   :  { %2798 = vmatpush.msrb.mxu3 %v6045_v56 }
 0x92d   :  { %2631 = vmatpush.msrb.mxu0 %v6055_v7 }
 0x92e   :  { %2799 = vmatpush.msrb.mxu3 %v6055_v7 }
 0x92f   :  { %2632 = vmatpush.msrb.mxu0 %v6065_v10 }
 0x930   :  { %2800 = vmatpush.msrb.mxu3 %v6065_v10 }
 0x931   :  { %2633 = vmatpush.msrb.mxu0 %v6076_v14 }
 0x932   :  { %2801 = vmatpush.msrb.mxu3 %v6076_v14 }
 0x933   :  { %2634 = vmatpush.msrb.mxu0 %v6086_v1 }
 0x934   :  { %2802 = vmatpush.msrb.mxu3 %v6086_v1 }
 0x935   :  { %2635 = vmatpush.msrb.mxu0 %v6096_v16 }
 0x936   :  { %2803 = vmatpush.msrb.mxu3 %v6096_v16 }
 0x9a1   :  { %v2474_v4 = vpop.f32.mrf.mxu1 }
 0x9a2   :  { %v2517_v33 = vadd.f32 %v2474_v4, %v5831_v9  ;;  %v6057_v9 = vld [vmem:[#allocation17 + $0xe0] sm:$0xff] }
 0x9a3   :  { %2651 = vmatpush.msrb.mxu1 %v6057_v9  ;;  %v6108_v4 = vld [vmem:[#allocation17 + $0x60] sm:$0xff] }
 0x9a4   :  { %v3823_v2 = vmul.f32 -1.442695, %v2517_v33  ;;  %v6110_v33 = vld [vmem:[#allocation17 + $0x68] sm:$0xff]  ;;  %2636 = vmatpush.msrb.mxu0 %v6108_v4  ;;  %2804 = vmatpush.msrb.mxu3 %v6108_v4 }
 0x9a5   :  { %2652 = vmatpush.msrb.mxu1 %v6067_v21 }
 0x9a6   :  { %3973 = vpow2.f32 %v3823_v2  ;;  %v6112_v2 = vld [vmem:[#allocation17 + $0x70] sm:$0xff] }
 0x9a7   :  { %v2494_v50 = vpop.f32.mrf.mxu2  ;;  %2653 = vmatpush.msrb.mxu1 %v6078_v37  ;;  %2676 = vmatpush.msrb.mxu2 %v6112_v2 }
 0x9a8   :  { %v2537_v48 = vadd.f32 %v2494_v50, %v5836_v20  ;;  %v6088_v20 = vld [vmem:[#allocation17 + $0x98] sm:$0xff]  ;;  %v6119_v50 = vld [vmem:[#allocation17 + $0x48] sm:$0xff] }
 0x9a9   :  { %2654 = vmatpush.msrb.mxu1 %v6088_v20  ;;  %2637 = vmatpush.msrb.mxu0 %v6119_v50 }
 0x9aa   :  { %v3824_v43 = vmul.f32 -1.442695, %v2537_v48  ;;  %v6121_v48 = vld [vmem:[#allocation17 + $0x50] sm:$0xff]  ;;  %2805 = vmatpush.msrb.mxu3 %v6119_v50 }
 0x9ab   :  { %2655 = vmatpush.msrb.mxu1 %v6098_v49  ;;  %2638 = vmatpush.msrb.mxu0 %v6129_v59 }
 0x9ac   :  { %v3974_v11 = vpop.eup %3973  ;;  %3975 = vpow2.f32 %v3824_v43  ;;  %v6123_v43 = vld [vmem:[#allocation17 + $0x58] sm:$0xff]  ;;  %2806 = vmatpush.msrb.mxu3 %v6129_v59 }
 0x9ad   :  { %v6103_v51 = vadd.f32 1.0, %v3974_v11  ;;  %2656 = vmatpush.msrb.mxu1 %v6110_v33  ;;  %2677 = vmatpush.msrb.mxu2 %v6123_v43 }
 0x9ae   :  { %2639 = vmatpush.msrb.mxu0 %v6141_v39  ;;  %2807 = vmatpush.msrb.mxu3 %v6141_v39 }
 0x9af   :  { %3977 = vrcp.f32 %v6103_v51  ;;  %2657 = vmatpush.msrb.mxu1 %v6121_v48  ;;  %2678 = vmatpush.msrb.mxu2 %v6133_v42  ;;  %v2533_v57 = vand.u32 2147483648, %v6103_v51  ;;  %v2531_v0 = vand.u32 2147483647, %v6103_v51  ;;  %vm2527_vm7 = vweird.f32 %v6103_v51 }
 0x9b1   :  { %2658 = vmatpush.msrb.mxu1 %v6131_v23  ;;  %2679 = vmatpush.msrb.mxu2 %v6145_v47  ;;  %vm2532_vm9 = vcmp.eq.f32.partialorder %v2531_v0, 8.507059e+37 }
 0x9b2   :  { %v3976_v11 = vpop.eup %3975 }
 0x9b3   :  { %v6136_v13 = vadd.f32 1.0, %v3976_v11  ;;  %2659 = vmatpush.msrb.mxu1 %v6143_v15  ;;  %v6151_v11 = vld [vmem:[#allocation17] sm:$0xff]  ;;  %2680 = vmatpush.msrb.mxu2 %v6155_v58 }
 0x9b4   :  { %2640 = vmatpush.msrb.mxu0 %v6151_v11  ;;  %2808 = vmatpush.msrb.mxu3 %v6151_v11 }
 0x9b5   :  { %v3978_v25 = vpop.eup %3977  ;;  %3979 = vrcp.f32 %v6136_v13  ;;  %2660 = vmatpush.msrb.mxu1 %v6153_v52  ;;  %2961 = vmatpush.msra.mxu2 %v5995_v55  ;;  %v2553_v0 = vand.u32 2147483648, %v6136_v13  ;;  %vm2547_vm11 = vweird.f32 %v6136_v13 }
 0x9b6   :  { %v2523_v53 = vmul.f32 %v3978_v25, %v6103_v51  ;;  %2813 = vmatpush.msra.mxu0 %v5997_v22  ;;  %vm2528_vm6 = vweird.f32 %v3978_v25  ;;  %2981 = vmatpush.msra.mxu3 %v5997_v22 }
 0x9b7   :  { %2833 = vmatpush.msra.mxu1 %v5999_v46  ;;  %2962 = vmatpush.msra.mxu2 %v6004_v45  ;;  %vm2529_vm8 = vmor %vm2527_vm7, %vm2528_vm6 }
 0x9b8   :  { %v2524_v61 = vsub.f32 1.0, %v2523_v53  ;;  %2814 = vmatpush.msra.mxu0 %v6006_v8  ;;  %v2514_v53 = vpop.f32.mrf.mxu3  ;;  %2982 = vmatpush.msra.mxu3 %v6006_v8 }
 0x9b9   :  { %2834 = vmatpush.msra.mxu1 %v6008_v24  ;;  %v2557_v22 = vadd.f32 %v5950_v12, %v2514_v53  ;;  %2963 = vmatpush.msra.mxu2 %v6014_v26  ;;  %v2407_v53 = vld [vmem:[#allocation8 + $0x10] sm:$0xff] }
 0x9ba   :  { %v2525_v44 = vmul.f32 %v3978_v25, %v2524_v61  ;;  %2815 = vmatpush.msra.mxu0 %v6016_v19  ;;  %v2534_v61 = vor.u32 1.1754944e-38, %v2533_v57  ;;  %2983 = vmatpush.msra.mxu3 %v6016_v19  ;;  %v2023_v57 = vadd.f32 %v5968_v29, %v5953_v34 }
 0x9bb   :  { %v3980_v40 = vpop.eup %3979  ;;  %2835 = vmatpush.msra.mxu1 %v6018_v6  ;;  %2964 = vmatpush.msra.mxu2 %v6024_v5 }
 0x9bc   :  { %v2543_v54 = vmul.f32 %v3980_v40, %v6136_v13  ;;  %v2526_v18 = vadd.f32 %v3978_v25, %v2525_v44  ;;  %2816 = vmatpush.msra.mxu0 %v6026_v63  ;;  %vm2548_vm10 = vweird.f32 %v3980_v40  ;;  %2984 = vmatpush.msra.mxu3 %v6026_v63 }
 0x9bd   :  { %2836 = vmatpush.msra.mxu1 %v6028_v27  ;;  %2965 = vmatpush.msra.mxu2 %v6034_v36  ;;  %vm2549_vm12 = vmor %vm2547_vm11, %vm2548_vm10 }
 0x9be   :  { %v2544_v32 = vsub.f32 1.0, %v2543_v54  ;;  %v2530_v55 = vsel %vm2529_vm8, %v3978_v25, %v2526_v18  ;;  %2817 = vmatpush.msra.mxu0 %v6036_v41  ;;  %2985 = vmatpush.msra.mxu3 %v6036_v41  ;;  %v2554_v54 = vor.u32 1.1754944e-38, %v2553_v0  ;;  %v6635_v0 = vld [vmem:[#allocation59_spill] sm:$0xff] }
 0x9bf   :  { %v2535_v44 = vsel %vm2532_vm9, %v2534_v61, %v2530_v55  ;;  %2837 = vmatpush.msra.mxu1 %v6038_v62  ;;  %2966 = vmatpush.msra.mxu2 %v6045_v56 }
 0x9c0   :  { %v2545_v51 = vmul.f32 %v3980_v40, %v2544_v32  ;;  %v2558_v6 = vmul.f32 %v2557_v22, %v2535_v44  ;;  %2818 = vmatpush.msra.mxu0 %v6047_v35  ;;  %v2551_v32 = vand.u32 2147483647, %v6136_v13  ;;  %2986 = vmatpush.msra.mxu3 %v6047_v35 }
 0x9c1   :  { %2838 = vmatpush.msra.mxu1 %v6052_v38  ;;  %2967 = vmatpush.msra.mxu2 %v6055_v7 }
 0x9c2   :  { %v2546_v18 = vadd.f32 %v3980_v40, %v2545_v51  ;;  %v2559_v25 = vadd.f32 %v2558_v6, %v2023_v57  ;;  %2819 = vmatpush.msra.mxu0 %v6057_v9  ;;  %vm2552_vm13 = vcmp.eq.f32.partialorder %v2551_v32, 8.507059e+37  ;;  %2987 = vmatpush.msra.mxu3 %v6057_v9 }
 0x9c3   :  { %2839 = vmatpush.msra.mxu1 %v6059_v28  ;;  %2968 = vmatpush.msra.mxu2 %v6065_v10 }
 0x9c4   :  { %3981 = vtanh.f32 %v2559_v25  ;;  %v2550_v29 = vsel %vm2549_vm12, %v3980_v40, %v2546_v18  ;;  %2820 = vmatpush.msra.mxu0 %v6067_v21  ;;  %2988 = vmatpush.msra.mxu3 %v6067_v21  ;;  %v6636_v25 = vld [vmem:[#allocation60_spill] sm:$0xff] }
 0x9c5   :  { %2840 = vmatpush.msra.mxu1 %v6069_v17  ;;  %v2555_v13 = vsel %vm2552_vm13, %v2554_v54, %v2550_v29  ;;  %2969 = vmatpush.msra.mxu2 %v6076_v14 }
 0x9c6   :  { %2821 = vmatpush.msra.mxu0 %v6078_v37  ;;  %v2561_v55 = vsub.f32 1.0, %v2555_v13  ;;  %2989 = vmatpush.msra.mxu3 %v6078_v37 }
 0x9c7   :  { %2841 = vmatpush.msra.mxu1 %v6080_v3  ;;  %2970 = vmatpush.msra.mxu2 %v6086_v1 }
 0x9c8   :  { %2822 = vmatpush.msra.mxu0 %v6088_v20  ;;  %2990 = vmatpush.msra.mxu3 %v6088_v20 }
 0x9c9   :  { %2842 = vmatpush.msra.mxu1 %v6090_v60  ;;  %2971 = vmatpush.msra.mxu2 %v6096_v16 }
 0x9ca   :  { %v3982_v40 = vpop.eup %3981  ;;  %2823 = vmatpush.msra.mxu0 %v6098_v49  ;;  %2991 = vmatpush.msra.mxu3 %v6098_v49 }
 0x9cb   :  { %v2562_v22 = vsub.f32 %v3982_v40, %v5990_v31  ;;  %2843 = vmatpush.msra.mxu1 %v6100_v30  ;;  %2972 = vmatpush.msra.mxu2 %v6108_v4 }
 0x9cc   :  { %2824 = vmatpush.msra.mxu0 %v6110_v33  ;;  %2992 = vmatpush.msra.mxu3 %v6110_v33 }
 0x9cd   :  { %v2563_v6 = vmul.f32 %v2562_v22, %v2561_v55  ;;  %2844 = vmatpush.msra.mxu1 %v6112_v2  ;;  %2973 = vmatpush.msra.mxu2 %v6119_v50 }
 0x9ce   :  { %2825 = vmatpush.msra.mxu0 %v6121_v48  ;;  %2993 = vmatpush.msra.mxu3 %v6121_v48 }
 0x9cf   :  { %v2564_v61 = vadd.f32 %v2563_v6, %v5990_v31  ;;  %2845 = vmatpush.msra.mxu1 %v6123_v43  ;;  %2974 = vmatpush.msra.mxu2 %v6129_v59 }
 0x9d0   :  { %2826 = vmatpush.msra.mxu0 %v6131_v23  ;;  %2994 = vmatpush.msra.mxu3 %v6131_v23 }
 0x9d1   :  { %v2565_v44 = vsub.f32 %v2564_v61, %v5990_v31  ;;  %v6227_v57 = vmul.f32 %v2564_v61, %v2407_v53  ;;  %2846 = vmatpush.msra.mxu1 %v6133_v42  ;;  %2975 = vmatpush.msra.mxu2 %v6141_v39 }
 0x9d2   :  { %2827 = vmatpush.msra.mxu0 %v6143_v15  ;;  %2995 = vmatpush.msra.mxu3 %v6143_v15 }
 0x9d3   :  { %v2566_v51 = vmul.f32 %v2565_v44, %v2407_v53  ;;  %2847 = vmatpush.msra.mxu1 %v6145_v47  ;;  %2976 = vmatpush.msra.mxu2 %v6151_v11 }
 0x9d4   :  { %2828 = vmatpush.msra.mxu0 %v6153_v52  ;;  %2996 = vmatpush.msra.mxu3 %v6153_v52 }
 0x9d5   :  { %v6236_v18 = vadd.f32 %v2566_v51, %v5990_v31  ;;  %2848 = vmatpush.msra.mxu1 %v6155_v58  ;;  %v6634_v31 = vld [vmem:[#allocation58_spill] sm:$0xff] }
 0x9d7   :  { %2641 = vmatmul.f32.vlgmr.msrb.gmra.mxu0 %v6236_v18  ;;  %2661 = vmatmul.f32.vlgmr.msrb.gmra.mxu1 %v6236_v18 }
 0x9d8   :  { %2681 = vmatmul.f32.vlgmr.msrb.gmra.mxu2 %v6236_v18  ;;  %3001 = vmatpush.msrb.mxu0 %v5999_v46 }
 0x9d9   :  { %3129 = vmatpush.msrb.mxu1 %v6634_v31  ;;  %3149 = vmatpush.msrb.mxu2 %v6635_v0  ;;  %v2575_v31 = vld [vmem:[#allocation8 + $0x18] sm:$0xff] }
 0x9da   :  { %3002 = vmatpush.msrb.mxu0 %v6008_v24 }
 0x9db   :  { %3130 = vmatpush.msrb.mxu1 %v6004_v45  ;;  %3150 = vmatpush.msrb.mxu2 %v6006_v8 }
 0x9dc   :  { %3003 = vmatpush.msrb.mxu0 %v6636_v25 }
 0x9dd   :  { %3131 = vmatpush.msrb.mxu1 %v6014_v26  ;;  %3151 = vmatpush.msrb.mxu2 %v6016_v19  ;;  %v6637_v26 = vld [vmem:[#allocation40_spill] sm:$0xff] }
 0x9de   :  { %3004 = vmatpush.msrb.mxu0 %v6028_v27 }
 0x9df   :  { %3132 = vmatpush.msrb.mxu1 %v6024_v5  ;;  %3152 = vmatpush.msrb.mxu2 %v6026_v63  ;;  %v6638_v5 = vld [vmem:[#allocation44_spill] sm:$0xff] }
 0x9e0   :  { %3005 = vmatpush.msrb.mxu0 %v6038_v62 }
 0x9e1   :  { %3133 = vmatpush.msrb.mxu1 %v6034_v36  ;;  %3153 = vmatpush.msrb.mxu2 %v6036_v41 }
 0x9e2   :  { %3006 = vmatpush.msrb.mxu0 %v6052_v38 }
 0x9e3   :  { %3134 = vmatpush.msrb.mxu1 %v6045_v56  ;;  %3154 = vmatpush.msrb.mxu2 %v6047_v35 }
 0x9e4   :  { %3007 = vmatpush.msrb.mxu0 %v6059_v28 }
 0x9e5   :  { %3135 = vmatpush.msrb.mxu1 %v6055_v7  ;;  %3155 = vmatpush.msrb.mxu2 %v6057_v9 }
 0x9e6   :  { %3008 = vmatpush.msrb.mxu0 %v6069_v17 }
 0x9e7   :  { %3136 = vmatpush.msrb.mxu1 %v6065_v10  ;;  %3156 = vmatpush.msrb.mxu2 %v6067_v21 }
 0x9e8   :  { %3009 = vmatpush.msrb.mxu0 %v6080_v3 }
 0x9e9   :  { %3137 = vmatpush.msrb.mxu1 %v6076_v14  ;;  %3157 = vmatpush.msrb.mxu2 %v6078_v37 }
 0x9ea   :  { %3010 = vmatpush.msrb.mxu0 %v6090_v60 }
 0x9eb   :  { %3138 = vmatpush.msrb.mxu1 %v6086_v1  ;;  %3158 = vmatpush.msrb.mxu2 %v6088_v20 }
 0x9ec   :  { %3011 = vmatpush.msrb.mxu0 %v6100_v30 }
 0x9ed   :  { %3139 = vmatpush.msrb.mxu1 %v6096_v16  ;;  %3159 = vmatpush.msrb.mxu2 %v6098_v49 }
 0x9ee   :  { %3012 = vmatpush.msrb.mxu0 %v6112_v2 }
 0x9ef   :  { %3140 = vmatpush.msrb.mxu1 %v6108_v4  ;;  %3160 = vmatpush.msrb.mxu2 %v6110_v33 }
 0x9f0   :  { %3013 = vmatpush.msrb.mxu0 %v6123_v43 }
 0x9f1   :  { %3141 = vmatpush.msrb.mxu1 %v6119_v50  ;;  %3161 = vmatpush.msrb.mxu2 %v6121_v48  ;;  %v6639_v48 = vld [vmem:[#allocation52_spill] sm:$0xff] }
 0x9f2   :  { %3014 = vmatpush.msrb.mxu0 %v6133_v42 }
 0x9f3   :  { %3142 = vmatpush.msrb.mxu1 %v6129_v59  ;;  %3162 = vmatpush.msrb.mxu2 %v6131_v23 }
 0x9f4   :  { %3015 = vmatpush.msrb.mxu0 %v6145_v47 }
 0x9f5   :  { %3143 = vmatpush.msrb.mxu1 %v6141_v39  ;;  %3163 = vmatpush.msrb.mxu2 %v6143_v15 }
 0x9f6   :  { %3016 = vmatpush.msrb.mxu0 %v6155_v58 }
 0x9f7   :  { %3144 = vmatpush.msrb.mxu1 %v6151_v11  ;;  %3164 = vmatpush.msrb.mxu2 %v6153_v52  ;;  %v2026_v11 = vadd.f32 %v6639_v48, %v5953_v34  ;;  %v2743_v48 = vld [vmem:[#allocation8 + $0x20] sm:$0xff] }
 0xa54   :  { %v2642_v45 = vpop.f32.mrf.mxu0  ;;  %v2662_v8 = vpop.f32.mrf.mxu1 }
 0xa55   :  { %v2685_v19 = vadd.f32 %v2642_v45, %v6637_v26  ;;  %v2705_v59 = vadd.f32 %v2662_v8, %v6638_v5 }
 0xa57   :  { %v3825_v63 = vmul.f32 -1.442695, %v2685_v19  ;;  %v3826_v36 = vmul.f32 -1.442695, %v2705_v59 }
 0xa59   :  { %3983 = vpow2.f32 %v3825_v63 }
 0xa5a   :  { %3985 = vpow2.f32 %v3826_v36 }
 0xa5b   :  { %v2682_v1 = vpop.f32.mrf.mxu2 }
 0xa5c   :  { %v2725_v33 = vadd.f32 %v5950_v12, %v2682_v1 }
 0xa5f   :  { %v3984_v23 = vpop.eup %3983 }
 0xa60   :  { %v3986_v39 = vpop.eup %3985  ;;  %v2689_v41 = vadd.f32 1.0, %v3984_v23 }
 0xa61   :  { %v2709_v56 = vadd.f32 1.0, %v3986_v39 }
 0xa62   :  { %3987 = vrcp.f32 %v2689_v41  ;;  %v2701_v21 = vand.u32 2147483648, %v2689_v41  ;;  %v2699_v37 = vand.u32 2147483647, %v2689_v41  ;;  %vm2695_vm15 = vweird.f32 %v2689_v41 }
 0xa63   :  { %3989 = vrcp.f32 %v2709_v56  ;;  %v2721_v54 = vand.u32 2147483648, %v2709_v56  ;;  %vm2715_vm4 = vweird.f32 %v2709_v56  ;;  %v2719_v40 = vand.u32 2147483647, %v2709_v56 }
 0xa64   :  { %v2702_v49 = vor.u32 1.1754944e-38, %v2701_v21  ;;  %vm2700_vm2 = vcmp.eq.f32.partialorder %v2699_v37, 8.507059e+37 }
 0xa65   :  { %v2722_v22 = vor.u32 1.1754944e-38, %v2721_v54  ;;  %vm2720_vm6 = vcmp.eq.f32.partialorder %v2719_v40, 8.507059e+37  ;;  %v3450_v40 = vld [vmem:[#allocation22 + $0xf0] sm:$0xff] }
 0xa68   :  { %v3988_v15 = vpop.eup %3987 }
 0xa69   :  { %v3990_v35 = vpop.eup %3989  ;;  %v2691_v7 = vmul.f32 %v3988_v15, %v2689_v41  ;;  %vm2696_vm14 = vweird.f32 %v3988_v15 }
 0xa6a   :  { %v2711_v52 = vmul.f32 %v3990_v35, %v2709_v56  ;;  %vm2697_vm1 = vmor %vm2695_vm15, %vm2696_vm14  ;;  %vm2716_vm3 = vweird.f32 %v3990_v35 }
 0xa6b   :  { %v2692_v9 = vsub.f32 1.0, %v2691_v7  ;;  %vm2717_vm0 = vmor %vm2715_vm4, %vm2716_vm3 }
 0xa6c   :  { %v2712_v10 = vsub.f32 1.0, %v2711_v52  ;;  %v6642_v52 = vld [vmem:[#allocation53_spill] sm:$0xff] }
 0xa6d   :  { %v2693_v14 = vmul.f32 %v3988_v15, %v2692_v9  ;;  %v2029_v9 = vadd.f32 %v6642_v52, %v5953_v34  ;;  %v6347_v52 = vld [vmem:[#allocation19] ss:$0 sm:$0xff] }
 0xa6e   :  { %v2713_v16 = vmul.f32 %v3990_v35, %v2712_v10 }
 0xa6f   :  { %v2694_v20 = vadd.f32 %v3988_v15, %v2693_v14 }
 0xa70   :  { %v2714_v29 = vadd.f32 %v3990_v35, %v2713_v16 }
 0xa71   :  { %v2698_v4 = vsel %vm2697_vm1, %v3988_v15, %v2694_v20 }
 0xa72   :  { %v2703_v50 = vsel %vm2700_vm2, %v2702_v49, %v2698_v4  ;;  %v2718_v55 = vsel %vm2717_vm0, %v3990_v35, %v2714_v29 }
 0xa73   :  { %v2726_v32 = vmul.f32 %v2725_v33, %v2703_v50  ;;  %v2723_v6 = vsel %vm2720_vm6, %v2722_v22, %v2718_v55 }
 0xa74   :  { %v2729_v61 = vsub.f32 1.0, %v2723_v6  ;;  %v6643_v6 = vld [vmem:[#allocation47_spill] sm:$0xff] }
 0xa75   :  { %v2727_v13 = vadd.f32 %v2726_v32, %v2026_v11 }
 0xa77   :  { %3991 = vtanh.f32 %v2727_v13 }
 0xa7d   :  { %v3992_v53 = vpop.eup %3991 }
 0xa7e   :  { %v2730_v44 = vsub.f32 %v3992_v53, %v6236_v18 }
 0xa80   :  { %v2731_v51 = vmul.f32 %v2730_v44, %v2729_v61  ;;  %v6644_v61 = vld [vmem:[#allocation48_spill] sm:$0xff] }
 0xa82   :  { %v2732_v0 = vadd.f32 %v2731_v51, %v6236_v18  ;;  %v3448_v51 = vld [vmem:[#allocation22 + $0xe0] sm:$0xff] }
 0xa84   :  { %v2733_v45 = vsub.f32 %v2732_v0, %v6236_v18  ;;  %v6305_v8 = vmul.f32 %v2732_v0, %v2575_v31 }
 0xa86   :  { %v2734_v26 = vmul.f32 %v2733_v45, %v2575_v31  ;;  %v3446_v45 = vld [vmem:[#allocation22 + $0xd0] sm:$0xff] }
 0xa88   :  { %v6308_v19 = vadd.f32 %v2734_v26, %v6236_v18  ;;  %v3444_v26 = vld [vmem:[#allocation22 + $0xc0] sm:$0xff] }
 0xa8a   :  { %2809 = vmatmul.f32.vlgmr.msrb.gmra.mxu3 %v6308_v19  ;;  %2829 = vmatmul.f32.vlgmr.msra.gmra.mxu0 %v6308_v19 }
 0xa8b   :  { %2849 = vmatmul.f32.vlgmr.msra.gmra.mxu1 %v6308_v19  ;;  %3169 = vmatpush.msrb.mxu3 %v5999_v46 }
 0xa8d   :  { %3170 = vmatpush.msrb.mxu3 %v6008_v24  ;;  %v6640_v24 = vld [vmem:[#allocation46_spill] sm:$0xff] }
 0xa8f   :  { %3171 = vmatpush.msrb.mxu3 %v6636_v25 }
 0xa91   :  { %3172 = vmatpush.msrb.mxu3 %v6028_v27 }
 0xa93   :  { %3173 = vmatpush.msrb.mxu3 %v6038_v62 }
 0xa95   :  { %3174 = vmatpush.msrb.mxu3 %v6052_v38 }
 0xa97   :  { %3175 = vmatpush.msrb.mxu3 %v6059_v28  ;;  %v6641_v28 = vld [vmem:[#allocation45_spill] sm:$0xff] }
 0xa99   :  { %3176 = vmatpush.msrb.mxu3 %v6069_v17 }
 0xa9b   :  { %3177 = vmatpush.msrb.mxu3 %v6080_v3 }
 0xa9d   :  { %3178 = vmatpush.msrb.mxu3 %v6090_v60 }
 0xa9f   :  { %3179 = vmatpush.msrb.mxu3 %v6100_v30 }
 0xaa1   :  { %3180 = vmatpush.msrb.mxu3 %v6112_v2 }
 0xaa3   :  { %3181 = vmatpush.msrb.mxu3 %v6123_v43 }
 0xaa5   :  { %3182 = vmatpush.msrb.mxu3 %v6133_v42 }
 0xaa7   :  { %3183 = vmatpush.msrb.mxu3 %v6145_v47 }
 0xaa9   :  { %3184 = vmatpush.msrb.mxu3 %v6155_v58 }
 0xb07   :  { %v2830_v46 = vpop.f32.mrf.mxu0 }
 0xb08   :  { %v2873_v27 = vadd.f32 %v2830_v46, %v6640_v24  ;;  %v2850_v23 = vpop.f32.mrf.mxu1  ;;  %v3440_v46 = vld [vmem:[#allocation22 + $0xa0] sm:$0xff] }
 0xb09   :  { %v2893_v15 = vadd.f32 %v5950_v12, %v2850_v23 }
 0xb0a   :  { %v3828_v62 = vmul.f32 -1.442695, %v2873_v27  ;;  %v3438_v27 = vld [vmem:[#allocation22 + $0x90] sm:$0xff] }
 0xb0c   :  { %3993 = vpow2.f32 %v3828_v62 }
 0xb0d   :  { %v2810_v38 = vpop.f32.mrf.mxu3 }
 0xb0e   :  { %v2853_v17 = vadd.f32 %v2810_v38, %v6641_v28 }
 0xb10   :  { %v3827_v3 = vmul.f32 -1.442695, %v2853_v17  ;;  %v3436_v17 = vld [vmem:[#allocation22 + $0x80] sm:$0xff] }
 0xb12   :  { %v3994_v60 = vpop.eup %3993  ;;  %3995 = vpow2.f32 %v3827_v3  ;;  %v3434_v3 = vld [vmem:[#allocation22 + $0x70] sm:$0xff] }
 0xb13   :  { %v2877_v30 = vadd.f32 1.0, %v3994_v60  ;;  %v3432_v60 = vld [vmem:[#allocation22 + $0x60] sm:$0xff] }
 0xb15   :  { %3997 = vrcp.f32 %v2877_v30  ;;  %v2889_v14 = vand.u32 2147483648, %v2877_v30  ;;  %vm2883_vm12 = vweird.f32 %v2877_v30  ;;  %v2887_v1 = vand.u32 2147483647, %v2877_v30 }
 0xb17   :  { %v2890_v16 = vor.u32 1.1754944e-38, %v2889_v14  ;;  %vm2888_vm14 = vcmp.eq.f32.partialorder %v2887_v1, 8.507059e+37  ;;  %v6645_v14 = vld [vmem:[#allocation54_spill] sm:$0xff] }
 0xb18   :  { %v3996_v2 = vpop.eup %3995 }
 0xb19   :  { %v2857_v43 = vadd.f32 1.0, %v3996_v2  ;;  %v3428_v2 = vld [vmem:[#allocation22 + $0x40] sm:$0xff] }
 0xb1b   :  { %3999 = vrcp.f32 %v2857_v43  ;;  %v3998_v42 = vpop.eup %3997  ;;  %v2869_v59 = vand.u32 2147483648, %v2857_v43  ;;  %v2867_v36 = vand.u32 2147483647, %v2857_v43  ;;  %vm2863_vm8 = vweird.f32 %v2857_v43 }
 0xb1c   :  { %v2879_v18 = vmul.f32 %v3998_v42, %v2877_v30  ;;  %vm2884_vm11 = vweird.f32 %v3998_v42  ;;  %v3430_v30 = vld [vmem:[#allocation22 + $0x50] sm:$0xff] }
 0xb1d   :  { %v2870_v56 = vor.u32 1.1754944e-38, %v2869_v59  ;;  %vm2868_vm10 = vcmp.eq.f32.partialorder %v2867_v36, 8.507059e+37  ;;  %vm2885_vm13 = vmor %vm2883_vm12, %vm2884_vm11 }
 0xb1e   :  { %v2880_v5 = vsub.f32 1.0, %v2879_v18 }
 0xb20   :  { %v2881_v41 = vmul.f32 %v3998_v42, %v2880_v5  ;;  %v3424_v5 = vld [vmem:[#allocation22 + $0x20] sm:$0xff] }
 0xb21   :  { %v4000_v47 = vpop.eup %3999 }
 0xb22   :  { %v2859_v58 = vmul.f32 %v4000_v47, %v2857_v43  ;;  %vm2864_vm7 = vweird.f32 %v4000_v47  ;;  %v2882_v21 = vadd.f32 %v3998_v42, %v2881_v41 }
 0xb23   :  { %vm2865_vm9 = vmor %vm2863_vm8, %vm2864_vm7 }
 0xb24   :  { %v2860_v25 = vsub.f32 1.0, %v2859_v58  ;;  %v2886_v20 = vsel %vm2885_vm13, %v3998_v42, %v2882_v21 }
 0xb25   :  { %v2891_v49 = vsel %vm2888_vm14, %v2890_v16, %v2886_v20 }
 0xb26   :  { %v2861_v63 = vmul.f32 %v4000_v47, %v2860_v25  ;;  %v2897_v4 = vsub.f32 1.0, %v2891_v49  ;;  %v3426_v25 = vld [vmem:[#allocation22 + $0x30] sm:$0xff] }
 0xb28   :  { %v2862_v39 = vadd.f32 %v4000_v47, %v2861_v63 }
 0xb2a   :  { %v2866_v35 = vsel %vm2865_vm9, %v4000_v47, %v2862_v39  ;;  %v3422_v39 = vld [vmem:[#allocation22 + $0x10] sm:$0xff] }
 0xb2b   :  { %v2871_v7 = vsel %vm2868_vm10, %v2870_v56, %v2866_v35 }
 0xb2c   :  { %v2894_v10 = vmul.f32 %v2893_v15, %v2871_v7  ;;  %v3420_v15 = vld [vmem:[#allocation22] sm:$0xff] }
 0xb2e   :  { %v2895_v37 = vadd.f32 %v2894_v10, %v2029_v9 }
 0xb30   :  { %4001 = vtanh.f32 %v2895_v37  ;;  %v2032_v37 = vadd.f32 %v6645_v14, %v5953_v34  ;;  %v3274_v14 = vld [vmem:[#allocation17 + $0xc8] sm:$0xff] }
 0xb36   :  { %v4002_v12 = vpop.eup %4001 }
 0xb37   :  { %v2898_v33 = vsub.f32 %v4002_v12, %v6308_v19 }
 0xb39   :  { %v2899_v50 = vmul.f32 %v2898_v33, %v2897_v4 }
 0xb3b   :  { %v2900_v11 = vadd.f32 %v2899_v50, %v6308_v19 }
 0xb3d   :  { %v2901_v32 = vsub.f32 %v2900_v11, %v6308_v19  ;;  %v6337_v29 = vmul.f32 %v2900_v11, %v2743_v48 }
 0xb3f   :  { %v2902_v54 = vmul.f32 %v2901_v32, %v2743_v48 }
 0xb41   :  { %v6340_v13 = vadd.f32 %v2902_v54, %v6308_v19  ;;  %v3442_v19 = vld [vmem:[#allocation22 + $0xb0] sm:$0xff] }
 0xb43   :  { %2977 = vmatmul.f32.vlgmr.msra.gmra.mxu2 %v6340_v13  ;;  %2997 = vmatmul.f32.vlgmr.msra.gmra.mxu3 %v6340_v13 }
 0xb44   :  { %3017 = vmatmul.f32.vlgmr.msrb.gmra.mxu0 %v6340_v13  ;;  %3458 = vmatpush.msra.mxu3 %v3450_v40 }
 0xb46   :  { %3459 = vmatpush.msra.mxu3 %v3448_v51 }
 0xb48   :  { %3460 = vmatpush.msra.mxu3 %v3446_v45  ;;  %v3285_v45 = vld [vmem:[#allocation17 + $0x120] sm:$0xff] }
 0xb4a   :  { %3461 = vmatpush.msra.mxu3 %v3444_v26  ;;  %v3282_v26 = vld [vmem:[#allocation17 + $0x108] sm:$0xff] }
 0xb4c   :  { %3462 = vmatpush.msra.mxu3 %v3442_v19  ;;  %v3279_v19 = vld [vmem:[#allocation17 + $0xf0] sm:$0xff] }
 0xb4e   :  { %3463 = vmatpush.msra.mxu3 %v3440_v46  ;;  %v3276_v46 = vld [vmem:[#allocation17 + $0xd8] sm:$0xff] }
 0xb50   :  { %3464 = vmatpush.msra.mxu3 %v3438_v27  ;;  %v3270_v27 = vld [vmem:[#allocation17 + $0xa8] sm:$0xff] }
 0xb52   :  { %3465 = vmatpush.msra.mxu3 %v3436_v17  ;;  %v3295_v17 = vld [vmem:[#allocation17 + $0x170] sm:$0xff] }
 0xb53   :  { %3317 = vmatpush.msra.mxu1 %v3295_v17  ;;  %v3254_v17 = vld [vmem:[#allocation17 + $0x28] sm:$0xff] }
 0xb54   :  { %3466 = vmatpush.msra.mxu3 %v3434_v3  ;;  %v3296_v3 = vld [vmem:[#allocation17 + $0x178] sm:$0xff] }
 0xb55   :  { %3337 = vmatpush.msra.mxu2 %v3296_v3  ;;  %v3431_v3 = vld [vmem:[#allocation22 + $0x58] sm:$0xff] }
 0xb56   :  { %3467 = vmatpush.msra.mxu3 %v3432_v60  ;;  %v3258_v60 = vld [vmem:[#allocation17 + $0x48] sm:$0xff] }
 0xb58   :  { %3468 = vmatpush.msra.mxu3 %v3430_v30  ;;  %v3292_v30 = vld [vmem:[#allocation17 + $0x158] sm:$0xff] }
 0xb59   :  { %3318 = vmatpush.msra.mxu1 %v3292_v30  ;;  %v3250_v30 = vld [vmem:[#allocation17 + $0x8] sm:$0xff] }
 0xb5a   :  { %3469 = vmatpush.msra.mxu3 %v3428_v2  ;;  %v3293_v2 = vld [vmem:[#allocation17 + $0x160] sm:$0xff] }
 0xb5b   :  { %3338 = vmatpush.msra.mxu2 %v3293_v2  ;;  %v3251_v2 = vld [vmem:[#allocation17 + $0x10] sm:$0xff] }
 0xb5c   :  { %3470 = vmatpush.msra.mxu3 %v3426_v25  ;;  %v3287_v25 = vld [vmem:[#allocation17 + $0x130] sm:$0xff] }
 0xb5e   :  { %3471 = vmatpush.msra.mxu3 %v3424_v5  ;;  %v3249_v5 = vld [vmem:[#allocation17] sm:$0xff] }
 0xb60   :  { %3472 = vmatpush.msra.mxu3 %v3422_v39  ;;  %v6648_v39 = vld [vmem:[#allocation49_spill] sm:$0xff] }
 0xb62   :  { %3473 = vmatpush.msra.mxu3 %v3420_v15  ;;  %v3281_v15 = vld [vmem:[#allocation17 + $0x100] sm:$0xff] }
 0xbc1   :  { %v3018_v41 = vpop.f32.mrf.mxu0 }
 0xbc2   :  { %v3061_v9 = vadd.f32 %v6347_v52, %v3018_v41 }
 0xbc6   :  { %v2978_v55 = vpop.f32.mrf.mxu2  ;;  %v2998_v22 = vpop.f32.mrf.mxu3 }
 0xbc7   :  { %v3021_v53 = vadd.f32 %v2978_v55, %v6643_v6  ;;  %v3041_v44 = vadd.f32 %v2998_v22, %v6644_v61  ;;  %v2911_v22 = vld [vmem:[#allocation8 + $0x28] sm:$0xff]  ;;  %v6646_v61 = vld [vmem:[#allocation43_spill] sm:$0xff] }
 0xbc9   :  { %v3829_v31 = vmul.f32 -1.442695, %v3021_v53  ;;  %v3830_v0 = vmul.f32 -1.442695, %v3041_v44  ;;  %v6647_v44 = vld [vmem:[#allocation57_spill] sm:$0xff] }
 0xbcb   :  { %4003 = vpow2.f32 %v3829_v31  ;;  %v3291_v31 = vld [vmem:[#allocation17 + $0x150] sm:$0xff] }
 0xbcc   :  { %4005 = vpow2.f32 %v3830_v0  ;;  %v3288_v0 = vld [vmem:[#allocation17 + $0x138] sm:$0xff] }
 0xbd1   :  { %v4004_v24 = vpop.eup %4003 }
 0xbd2   :  { %v4006_v62 = vpop.eup %4005  ;;  %v3025_v38 = vadd.f32 1.0, %v4004_v24  ;;  %v3273_v24 = vld [vmem:[#allocation17 + $0xc0] sm:$0xff] }
 0xbd3   :  { %v3045_v28 = vadd.f32 1.0, %v4006_v62  ;;  %v3267_v62 = vld [vmem:[#allocation17 + $0x90] sm:$0xff] }
 0xbd4   :  { %4007 = vrcp.f32 %v3025_v38  ;;  %v3037_v59 = vand.u32 2147483648, %v3025_v38  ;;  %v3035_v23 = vand.u32 2147483647, %v3025_v38  ;;  %vm3031_vm1 = vweird.f32 %v3025_v38 }
 0xbd5   :  { %4009 = vrcp.f32 %v3045_v28  ;;  %v3057_v49 = vand.u32 2147483648, %v3045_v28  ;;  %vm3051_vm0 = vweird.f32 %v3045_v28  ;;  %v3055_v12 = vand.u32 2147483647, %v3045_v28 }
 0xbd6   :  { %v3038_v35 = vor.u32 1.1754944e-38, %v3037_v59  ;;  %vm3036_vm3 = vcmp.eq.f32.partialorder %v3035_v23, 8.507059e+37  ;;  %v3283_v59 = vld [vmem:[#allocation17 + $0x110] sm:$0xff] }
 0xbd7   :  { %v3058_v33 = vor.u32 1.1754944e-38, %v3057_v49  ;;  %vm3056_vm7 = vcmp.eq.f32.partialorder %v3055_v12, 8.507059e+37  ;;  %v3271_v12 = vld [vmem:[#allocation17 + $0xb0] sm:$0xff] }
 0xbda   :  { %v4008_v43 = vpop.eup %4007 }
 0xbdb   :  { %v4010_v42 = vpop.eup %4009  ;;  %v3027_v47 = vmul.f32 %v4008_v43, %v3025_v38  ;;  %vm3032_vm15 = vweird.f32 %v4008_v43  ;;  %v3264_v38 = vld [vmem:[#allocation17 + $0x78] sm:$0xff] }
 0xbdc   :  { %v3047_v18 = vmul.f32 %v4010_v42, %v3045_v28  ;;  %vm3033_vm2 = vmor %vm3031_vm1, %vm3032_vm15  ;;  %vm3052_vm4 = vweird.f32 %v4010_v42  ;;  %v3261_v28 = vld [vmem:[#allocation17 + $0x60] sm:$0xff] }
 0xbdd   :  { %v3028_v58 = vsub.f32 1.0, %v3027_v47  ;;  %vm3053_vm6 = vmor %vm3051_vm0, %vm3052_vm4  ;;  %v3290_v47 = vld [vmem:[#allocation17 + $0x148] sm:$0xff] }
 0xbde   :  { %v3048_v63 = vsub.f32 1.0, %v3047_v18  ;;  %3339 = vmatpush.msra.mxu2 %v3290_v47  ;;  %v3252_v18 = vld [vmem:[#allocation17 + $0x18] sm:$0xff] }
 0xbdf   :  { %v3029_v36 = vmul.f32 %v4008_v43, %v3028_v58  ;;  %v3286_v58 = vld [vmem:[#allocation17 + $0x128] sm:$0xff] }
 0xbe0   :  { %v3049_v7 = vmul.f32 %v4010_v42, %v3048_v63  ;;  %3340 = vmatpush.msra.mxu2 %v3287_v25  ;;  %v3284_v63 = vld [vmem:[#allocation17 + $0x118] sm:$0xff]  ;;  %v3425_v25 = vld [vmem:[#allocation22 + $0x28] sm:$0xff] }
 0xbe1   :  { %v3030_v56 = vadd.f32 %v4008_v43, %v3029_v36  ;;  %v3451_v36 = vld [vmem:[#allocation22 + $0xf8] sm:$0xff] }
 0xbe2   :  { %v3050_v20 = vadd.f32 %v4010_v42, %v3049_v7  ;;  %3341 = vmatpush.msra.mxu2 %v3284_v63 }
 0xbe3   :  { %v3034_v10 = vsel %vm3033_vm2, %v4008_v43, %v3030_v56  ;;  %v3255_v43 = vld [vmem:[#allocation17 + $0x30] sm:$0xff]  ;;  %v3280_v56 = vld [vmem:[#allocation17 + $0xf8] sm:$0xff] }
 0xbe4   :  { %v3039_v21 = vsel %vm3036_vm3, %v3038_v35, %v3034_v10  ;;  %v3054_v4 = vsel %vm3053_vm6, %v4010_v42, %v3050_v20  ;;  %v3289_v42 = vld [vmem:[#allocation17 + $0x140] sm:$0xff]  ;;  %v3449_v35 = vld [vmem:[#allocation22 + $0xe8] sm:$0xff]  ;;  %3342 = vmatpush.msra.mxu2 %v3281_v15 }
 0xbe5   :  { %v3062_v1 = vmul.f32 %v3061_v9, %v3039_v21  ;;  %v3059_v50 = vsel %vm3056_vm7, %v3058_v33, %v3054_v4  ;;  %3319 = vmatpush.msra.mxu1 %v3289_v42  ;;  %v3277_v9 = vld [vmem:[#allocation17 + $0xe0] sm:$0xff]  ;;  %v3278_v10 = vld [vmem:[#allocation17 + $0xe8] sm:$0xff]  ;;  %v3272_v4 = vld [vmem:[#allocation17 + $0xb8] sm:$0xff] }
 0xbe6   :  { %v3065_v11 = vsub.f32 1.0, %v3059_v50  ;;  %v3447_v21 = vld [vmem:[#allocation22 + $0xd8] sm:$0xff]  ;;  %3343 = vmatpush.msra.mxu2 %v3278_v10  ;;  %v3421_v15 = vld [vmem:[#allocation22 + $0x8] sm:$0xff] }
 0xbe7   :  { %v3063_v16 = vadd.f32 %v3062_v1, %v2032_v37  ;;  %3320 = vmatpush.msra.mxu1 %v3286_v58  ;;  %v3275_v37 = vld [vmem:[#allocation17 + $0xd0] sm:$0xff]  ;;  %v3443_v33 = vld [vmem:[#allocation22 + $0xb8] sm:$0xff] }
 0xbe8   :  { %v3445_v1 = vld [vmem:[#allocation22 + $0xc8] sm:$0xff]  ;;  %3344 = vmatpush.msra.mxu2 %v3275_v37  ;;  %v3268_v50 = vld [vmem:[#allocation17 + $0x98] sm:$0xff] }
 0xbe9   :  { %4011 = vtanh.f32 %v3063_v16  ;;  %3321 = vmatpush.msra.mxu1 %v3283_v59  ;;  %v6649_v16 = vld [vmem:[#allocation50_spill] sm:$0xff] }
 0xbea   :  { %3345 = vmatpush.msra.mxu2 %v3272_v4 }
 0xbeb   :  { %3322 = vmatpush.msra.mxu1 %v3280_v56 }
 0xbed   :  { %3323 = vmatpush.msra.mxu1 %v3277_v9 }
 0xbef   :  { %v4012_v48 = vpop.eup %4011  ;;  %3324 = vmatpush.msra.mxu1 %v3274_v14 }
 0xbf0   :  { %v3066_v32 = vsub.f32 %v4012_v48, %v6340_v13  ;;  %v3269_v48 = vld [vmem:[#allocation17 + $0xa0] sm:$0xff] }
 0xbf1   :  { %3325 = vmatpush.msra.mxu1 %v3271_v12  ;;  %3346 = vmatpush.msra.mxu2 %v3269_v48 }
 0xbf2   :  { %v3067_v54 = vmul.f32 %v3066_v32, %v3065_v11  ;;  %v3441_v11 = vld [vmem:[#allocation22 + $0xa8] sm:$0xff] }
 0xbf3   :  { %3326 = vmatpush.msra.mxu1 %v3268_v50 }
 0xbf4   :  { %v3068_v40 = vadd.f32 %v3067_v54, %v6340_v13  ;;  %v3265_v54 = vld [vmem:[#allocation17 + $0x80] sm:$0xff] }
 0xbf5   :  { %3327 = vmatpush.msra.mxu1 %v3265_v54 }
 0xbf6   :  { %v3069_v55 = vsub.f32 %v3068_v40, %v6340_v13  ;;  %v6366_v51 = vmul.f32 %v3068_v40, %v2911_v22  ;;  %v3266_v40 = vld [vmem:[#allocation17 + $0x88] sm:$0xff] }
 0xbf7   :  { %3347 = vmatpush.msra.mxu2 %v3266_v40  ;;  %v3079_v40 = vld [vmem:[#allocation8 + $0x30] sm:$0xff] }
 0xbf8   :  { %v3070_v6 = vmul.f32 %v3069_v55, %v2911_v22  ;;  %v3439_v55 = vld [vmem:[#allocation22 + $0x98] sm:$0xff] }
 0xbfa   :  { %v6356_v53 = vadd.f32 %v3070_v6, %v6340_v13  ;;  %v3294_v13 = vld [vmem:[#allocation17 + $0x168] sm:$0xff] }
 0xbfb   :  { %3297 = vmatpush.msra.mxu0 %v3294_v13  ;;  %v3262_v6 = vld [vmem:[#allocation17 + $0x68] sm:$0xff]  ;;  %v3263_v13 = vld [vmem:[#allocation17 + $0x70] sm:$0xff] }
 0xbfc   :  { %3145 = vmatmul.f32.vlgmr.msrb.gmra.mxu1 %v6356_v53  ;;  %3165 = vmatmul.f32.vlgmr.msrb.gmra.mxu2 %v6356_v53 }
 0xbfd   :  { %3185 = vmatmul.f32.vlgmr.msrb.gmra.mxu3 %v6356_v53  ;;  %3298 = vmatpush.msra.mxu0 %v3291_v31 }
 0xbfe   :  { %3328 = vmatpush.msra.mxu1 %v3262_v6  ;;  %3348 = vmatpush.msra.mxu2 %v3263_v13 }
 0xbff   :  { %3299 = vmatpush.msra.mxu0 %v3288_v0  ;;  %v3437_v0 = vld [vmem:[#allocation22 + $0x88] sm:$0xff] }
 0xc01   :  { %3300 = vmatpush.msra.mxu0 %v3285_v45  ;;  %v3259_v45 = vld [vmem:[#allocation17 + $0x50] sm:$0xff] }
 0xc02   :  { %3329 = vmatpush.msra.mxu1 %v3259_v45  ;;  %v6652_v45 = vld [vmem:[#allocation51_spill] sm:$0xff] }
 0xc03   :  { %3301 = vmatpush.msra.mxu0 %v3282_v26  ;;  %v3260_v26 = vld [vmem:[#allocation17 + $0x58] sm:$0xff] }
 0xc04   :  { %3349 = vmatpush.msra.mxu2 %v3260_v26 }
 0xc05   :  { %3474 = vmatmul.f32.vlgmr.msra.gmra.mxu3 %v6646_v61  ;;  %3302 = vmatpush.msra.mxu0 %v3279_v19  ;;  %v3435_v19 = vld [vmem:[#allocation22 + $0x78] sm:$0xff] }
 0xc07   :  { %3303 = vmatpush.msra.mxu0 %v3276_v46  ;;  %v3256_v46 = vld [vmem:[#allocation17 + $0x38] sm:$0xff] }
 0xc08   :  { %3330 = vmatpush.msra.mxu1 %v3256_v46  ;;  %v6654_v46 = vld [vmem:[#allocation39_spill] sm:$0xff] }
 0xc09   :  { %3304 = vmatpush.msra.mxu0 %v3273_v24  ;;  %v3257_v24 = vld [vmem:[#allocation17 + $0x40] sm:$0xff] }
 0xc0a   :  { %3350 = vmatpush.msra.mxu2 %v3257_v24 }
 0xc0b   :  { %3305 = vmatpush.msra.mxu0 %v3270_v27  ;;  %v3433_v27 = vld [vmem:[#allocation22 + $0x68] sm:$0xff] }
 0xc0c   :  { %3351 = vmatpush.msra.mxu2 %v3254_v17 }
 0xc0d   :  { %3477 = vmatmul.f32.gmra.mxu3 %v6647_v44  ;;  %3306 = vmatpush.msra.mxu0 %v3267_v62 }
 0xc0e   :  { %3352 = vmatpush.msra.mxu2 %v3251_v2 }
 0xc0f   :  { %3307 = vmatpush.msra.mxu0 %v3264_v38 }
 0xc11   :  { %3308 = vmatpush.msra.mxu0 %v3261_v28  ;;  %v3253_v28 = vld [vmem:[#allocation17 + $0x20] sm:$0xff] }
 0xc12   :  { %3331 = vmatpush.msra.mxu1 %v3253_v28 }
 0xc13   :  { %3309 = vmatpush.msra.mxu0 %v3258_v60 }
 0xc14   :  { %3332 = vmatpush.msra.mxu1 %v3250_v30 }
 0xc15   :  { %3480 = vmatmul.f32.gmra.mxu3 %v6227_v57  ;;  %3310 = vmatpush.msra.mxu0 %v3255_v43  ;;  %v3429_v43 = vld [vmem:[#allocation22 + $0x48] sm:$0xff] }
 0xc17   :  { %3311 = vmatpush.msra.mxu0 %v3252_v18  ;;  %v3427_v18 = vld [vmem:[#allocation22 + $0x38] sm:$0xff] }
 0xc19   :  { %3312 = vmatpush.msra.mxu0 %v3249_v5 }
 0xc1b   :  { %3499 = vmatpush.msrb.mxu0 %v3451_v36 }
 0xc1d   :  { %3483 = vmatmul.f32.gmra.mxu3 %v6305_v8  ;;  %3500 = vmatpush.msrb.mxu0 %v3449_v35 }
 0xc1f   :  { %3501 = vmatpush.msrb.mxu0 %v3447_v21  ;;  %v6650_v21 = vld [vmem:[#allocation55_spill] sm:$0xff] }
 0xc20   :  { %v2035_v14 = vadd.f32 %v6650_v21, %v5953_v34 }
 0xc21   :  { %3502 = vmatpush.msrb.mxu0 %v3445_v1 }
 0xc23   :  { %3503 = vmatpush.msrb.mxu0 %v3443_v33 }
 0xc25   :  { %3486 = vmatmul.f32.gmra.mxu3 %v6337_v29  ;;  %3504 = vmatpush.msrb.mxu0 %v3441_v11 }
 0xc27   :  { %3505 = vmatpush.msrb.mxu0 %v3439_v55 }
 0xc29   :  { %3506 = vmatpush.msrb.mxu0 %v3437_v0  ;;  %v6651_v0 = vld [vmem:[#allocation42_spill] sm:$0xff] }
 0xc2a   :  { %v1956_v26 = vadd.f32 %v6652_v45, %v6651_v0 }
 0xc2b   :  { %3507 = vmatpush.msrb.mxu0 %v3435_v19  ;;  %v6653_v19 = vld [vmem:[#allocation38_spill] sm:$0xff] }
 0xc2c   :  { %v1997_v24 = vadd.f32 %v6654_v46, %v6653_v19 }
 0xc2d   :  { %3489 = vmatmul.f32.gmra.mxu3 %v6366_v51  ;;  %3508 = vmatpush.msrb.mxu0 %v3433_v27 }
 0xc2f   :  { %3509 = vmatpush.msrb.mxu0 %v3431_v3 }
 0xc31   :  { %3510 = vmatpush.msrb.mxu0 %v3429_v43 }
 0xc33   :  { %3511 = vmatpush.msrb.mxu0 %v3427_v18 }
 0xc35   :  { %3512 = vmatpush.msrb.mxu0 %v3425_v25 }
 0xc79   :  { %v3146_v23 = vpop.f32.mrf.mxu1 }
 0xc7a   :  { %v3189_v41 = vadd.f32 %v3146_v23, %v6648_v39  ;;  %v3423_v23 = vld [vmem:[#allocation22 + $0x18] sm:$0xff] }
 0xc7b   :  { %3513 = vmatpush.msrb.mxu0 %v3423_v23 }
 0xc7c   :  { %v3831_v7 = vmul.f32 -1.442695, %v3189_v41 }
 0xc7d   :  { %3514 = vmatpush.msrb.mxu0 %v3421_v15 }
 0xc7e   :  { %4013 = vpow2.f32 %v3831_v7 }
 0xc7f   :  { %v3166_v20 = vpop.f32.mrf.mxu2 }
 0xc80   :  { %v3209_v49 = vadd.f32 %v3166_v20, %v6649_v16  ;;  %v3186_v36 = vpop.f32.mrf.mxu3 }
 0xc81   :  { %v3229_v9 = vadd.f32 %v6347_v52, %v3186_v36 }
 0xc82   :  { %v3832_v32 = vmul.f32 -1.442695, %v3209_v49 }
 0xc84   :  { %v4014_v22 = vpop.eup %4013  ;;  %4015 = vpow2.f32 %v3832_v32 }
 0xc85   :  { %v3193_v31 = vadd.f32 1.0, %v4014_v22 }
 0xc87   :  { %4017 = vrcp.f32 %v3193_v31  ;;  %v3205_v58 = vand.u32 2147483648, %v3193_v31  ;;  %v3203_v59 = vand.u32 2147483647, %v3193_v31  ;;  %vm3199_vm9 = vweird.f32 %v3193_v31 }
 0xc89   :  { %v3206_v56 = vor.u32 1.1754944e-38, %v3205_v58  ;;  %vm3204_vm11 = vcmp.eq.f32.partialorder %v3203_v59, 8.507059e+37 }
 0xc8a   :  { %v4016_v62 = vpop.eup %4015 }
 0xc8b   :  { %v3213_v38 = vadd.f32 1.0, %v4016_v62 }
 0xc8d   :  { %v4018_v60 = vpop.eup %4017  ;;  %4019 = vrcp.f32 %v3213_v38  ;;  %v3225_v49 = vand.u32 2147483648, %v3213_v38  ;;  %vm3219_vm13 = vweird.f32 %v3213_v38  ;;  %v3223_v12 = vand.u32 2147483647, %v3213_v38 }
 0xc8e   :  { %v3195_v42 = vmul.f32 %v4018_v60, %v3193_v31  ;;  %vm3200_vm8 = vweird.f32 %v4018_v60 }
 0xc8f   :  { %vm3201_vm10 = vmor %vm3199_vm9, %vm3200_vm8  ;;  %v3226_v33 = vor.u32 1.1754944e-38, %v3225_v49  ;;  %vm3224_vm15 = vcmp.eq.f32.partialorder %v3223_v12, 8.507059e+37 }
 0xc90   :  { %v3196_v47 = vsub.f32 1.0, %v3195_v42 }
 0xc92   :  { %v3197_v5 = vmul.f32 %v4018_v60, %v3196_v47 }
 0xc93   :  { %v4020_v63 = vpop.eup %4019 }
 0xc94   :  { %v3215_v39 = vmul.f32 %v4020_v63, %v3213_v38  ;;  %v3198_v41 = vadd.f32 %v4018_v60, %v3197_v5  ;;  %vm3220_vm12 = vweird.f32 %v4020_v63 }
 0xc95   :  { %vm3221_vm14 = vmor %vm3219_vm13, %vm3220_vm12 }
 0xc96   :  { %v3216_v35 = vsub.f32 1.0, %v3215_v39  ;;  %v3202_v7 = vsel %vm3201_vm10, %v4018_v60, %v3198_v41 }
 0xc97   :  { %v3207_v10 = vsel %vm3204_vm11, %v3206_v56, %v3202_v7 }
 0xc98   :  { %v3230_v37 = vmul.f32 %v3229_v9, %v3207_v10  ;;  %v3217_v1 = vmul.f32 %v4020_v63, %v3216_v35 }
 0xc9a   :  { %v3231_v20 = vadd.f32 %v3230_v37, %v2035_v14  ;;  %v3218_v16 = vadd.f32 %v4020_v63, %v3217_v1 }
 0xc9c   :  { %4021 = vtanh.f32 %v3231_v20  ;;  %v3222_v4 = vsel %vm3221_vm14, %v4020_v63, %v3218_v16 }
 0xc9d   :  { %v3227_v50 = vsel %vm3224_vm15, %v3226_v33, %v3222_v4 }
 0xc9e   :  { %v3233_v11 = vsub.f32 1.0, %v3227_v50  ;;  %v6655_v50 = vld [vmem:[#allocation56_spill] sm:$0xff] }
 0xca2   :  { %v4022_v48 = vpop.eup %4021 }
 0xca3   :  { %v3234_v32 = vsub.f32 %v4022_v48, %v6356_v53  ;;  %v2038_v48 = vadd.f32 %v6655_v50, %v5953_v34 }
 0xca5   :  { %v3235_v54 = vmul.f32 %v3234_v32, %v3233_v11 }
 0xca7   :  { %v3236_v55 = vadd.f32 %v3235_v54, %v6356_v53 }
 0xca9   :  { %v3237_v22 = vsub.f32 %v3236_v55, %v6356_v53  ;;  %v3241_v6 = vmul.f32 %v3236_v55, %v3079_v40 }
 0xcab   :  { %v3238_v13 = vmul.f32 %v3237_v22, %v3079_v40  ;;  %3492 = vmatmul.f32.gmra.mxu3 %v3241_v6 }
 0xcad   :  { %v6378_v31 = vadd.f32 %v3238_v13, %v6356_v53  ;;  %v3475_v53 = vpop.f32.mrf.mxu3 }
 0xcaf   :  { %3313 = vmatmul.f32.vlgmr.msra.gmra.mxu0 %v6378_v31  ;;  %3333 = vmatmul.f32.vlgmr.msra.gmra.mxu1 %v6378_v31 }
 0xcb0   :  { %3353 = vmatmul.f32.vlgmr.msra.gmra.mxu2 %v6378_v31 }
 0xcb5   :  { %v3478_v28 = vpop.f32.mrf.mxu3 }
 0xcb7   :  { %3515 = vmatmul.f32.vlgmr.msrb.gmra.mxu0 %v6646_v61 }
 0xcbd   :  { %v3481_v18 = vpop.f32.mrf.mxu3 }
 0xcbf   :  { %3518 = vmatmul.f32.gmra.mxu0 %v6647_v44 }
 0xcc5   :  { %v3484_v14 = vpop.f32.mrf.mxu3 }
 0xcc7   :  { %3521 = vmatmul.f32.gmra.mxu0 %v6227_v57  ;;  %v3452_v57 = vld [vmem:[%s6560_s17] sm:$0x3]  ;;  %s4489_s17 = smov [#allocation24]  }
 0xcc8   :  { %v6396_v38 = vperm.slane %v3452_v57, 0  ;;  %s3702_s3 = sshll.u32 %s4489_s17, 4  ;;  %s3703_s3 = int_to_ptr.vmem [resolvable:$true] %s3702_s3 }
 0xcc9   :  { %3707 = dma.vmem_to_hbm [thread:$0]  %s3703_s3, 128, %s3705_s5, [#allocation25]  }
 0xcca   :  { %v6401_v3 = vadd.f32 %v3475_v53, %v6396_v38  ;;  %v6409_v25 = vadd.f32 %v3478_v28, %v6396_v38  ;;  %v6417_v56 = vadd.f32 %v3481_v18, %v6396_v38  ;;  %v6428_v40 = vadd.f32 %v3484_v14, %v6396_v38 }
 0xccd   :  { %v3487_v34 = vpop.f32.mrf.mxu3 }
 0xcce   :  { %v3488_v46 = vadd.f32 %v3487_v34, %v6396_v38 }
 0xccf   :  { %3524 = vmatmul.f32.gmra.mxu0 %v6305_v8 }
 0xcd7   :  { %3527 = vmatmul.f32.gmra.mxu0 %v6337_v29 }
 0xcdf   :  { %3530 = vmatmul.f32.gmra.mxu0 %v6366_v51  ;;  %v6398_v51 = vperm.slane %v3452_v57, 1  ;;  %v3247_v57 = vld [vmem:[#allocation8 + $0x38] sm:$0xff] }
 0xce7   :  { %3533 = vmatmul.f32.gmra.mxu0 %v3241_v6 }
 0xd2c   :  { %v3314_v27 = vpop.f32.mrf.mxu0  ;;  %v3334_v61 = vpop.f32.mrf.mxu1 }
 0xd2d   :  { %v3357_v62 = vadd.f32 %v3314_v27, %v1956_v26  ;;  %v3377_v44 = vadd.f32 %v3334_v61, %v1997_v24 }
 0xd2f   :  { %v3833_v8 = vmul.f32 -1.442695, %v3357_v62  ;;  %v3834_v29 = vmul.f32 -1.442695, %v3377_v44 }
 0xd31   :  { %4023 = vpow2.f32 %v3833_v8  ;;  %v3490_v8 = vpop.f32.mrf.mxu3 }
 0xd32   :  { %4025 = vpow2.f32 %v3834_v29 }
 0xd33   :  { %v3354_v37 = vpop.f32.mrf.mxu2 }
 0xd34   :  { %v3516_v17 = vpop.f32.mrf.mxu0  ;;  %v3397_v4 = vadd.f32 %v6347_v52, %v3354_v37 }
 0xd35   :  { %v6404_v60 = vadd.f32 %v3516_v17, %v6398_v51 }
 0xd37   :  { %v4024_v30 = vpop.eup %4023  ;;  %v3540_v2 = vmax.f32 %v6401_v3, %v6404_v60 }
 0xd38   :  { %v4026_v43 = vpop.eup %4025  ;;  %v3361_v42 = vadd.f32 1.0, %v4024_v30  ;;  %v6440_v30 = vadd.f32 %v3490_v8, %v6396_v38 }
 0xd39   :  { %v3381_v47 = vadd.f32 1.0, %v4026_v43  ;;  %3541 = vmax.xlane.f32.xlu1 %v3540_v2 }
 0xd3a   :  { %4027 = vrcp.f32 %v3361_v42  ;;  %v3373_v35 = vand.u32 2147483648, %v3361_v42  ;;  %v3371_v10 = vand.u32 2147483647, %v3361_v42  ;;  %vm3367_vm2 = vweird.f32 %v3361_v42 }
 0xd3b   :  { %4029 = vrcp.f32 %v3381_v47  ;;  %v3393_v6 = vand.u32 2147483648, %v3381_v47  ;;  %vm3387_vm6 = vweird.f32 %v3381_v47  ;;  %v3391_v13 = vand.u32 2147483647, %v3381_v47 }
 0xd3c   :  { %v3519_v58 = vpop.f32.mrf.mxu0  ;;  %v3374_v16 = vor.u32 1.1754944e-38, %v3373_v35  ;;  %vm3372_vm4 = vcmp.eq.f32.partialorder %v3371_v10, 8.507059e+37 }
 0xd3d   :  { %v6412_v5 = vadd.f32 %v3519_v58, %v6398_v51  ;;  %v3394_v0 = vor.u32 1.1754944e-38, %v3393_v6  ;;  %vm3392_vm8 = vcmp.eq.f32.partialorder %v3391_v13, 8.507059e+37 }
 0xd3f   :  { %v3543_v59 = vmax.f32 %v6409_v25, %v6412_v5 }
 0xd40   :  { %v4028_v63 = vpop.eup %4027 }
 0xd41   :  { %v4030_v36 = vpop.eup %4029  ;;  %v3363_v23 = vmul.f32 %v4028_v63, %v3361_v42  ;;  %3544 = vmax.xlane.f32.xlu1 %v3543_v59  ;;  %vm3368_vm1 = vweird.f32 %v4028_v63  ;;  %v3493_v42 = vpop.f32.mrf.mxu3 }
 0xd42   :  { %v3383_v39 = vmul.f32 %v4030_v36, %v3381_v47  ;;  %vm3369_vm3 = vmor %vm3367_vm2, %vm3368_vm1  ;;  %vm3388_vm0 = vweird.f32 %v4030_v36  ;;  %v3494_v18 = vadd.f32 %v3493_v42, %v6396_v38 }
 0xd43   :  { %v3364_v41 = vsub.f32 1.0, %v3363_v23  ;;  %vm3389_vm7 = vmor %vm3387_vm6, %vm3388_vm0 }
 0xd44   :  { %v3384_v15 = vsub.f32 1.0, %v3383_v39  ;;  %v3522_v7 = vpop.f32.mrf.mxu0 }
 0xd45   :  { %v3365_v9 = vmul.f32 %v4028_v63, %v3364_v41  ;;  %v6420_v21 = vadd.f32 %v3522_v7, %v6398_v51 }
 0xd46   :  { %v3385_v49 = vmul.f32 %v4030_v36, %v3384_v15 }
 0xd47   :  { %v3366_v1 = vadd.f32 %v4028_v63, %v3365_v9  ;;  %v3546_v20 = vmax.f32 %v6417_v56, %v6420_v21 }
 0xd48   :  { %v3386_v54 = vadd.f32 %v4030_v36, %v3385_v49 }
 0xd49   :  { %v3370_v12 = vsel %vm3369_vm3, %v4028_v63, %v3366_v1  ;;  %3547 = vmax.xlane.f32.xlu2 %v3546_v20 }
 0xd4a   :  { %v3375_v33 = vsel %vm3372_vm4, %v3374_v16, %v3370_v12  ;;  %v3390_v53 = vsel %vm3389_vm7, %v4030_v36, %v3386_v54 }
 0xd4b   :  { %v3398_v11 = vmul.f32 %v3397_v4, %v3375_v33  ;;  %v3395_v45 = vsel %vm3392_vm8, %v3394_v0, %v3390_v53 }
 0xd4c   :  { %v3525_v32 = vpop.f32.mrf.mxu0  ;;  %v3401_v27 = vsub.f32 1.0, %v3395_v45 }
 0xd4d   :  { %v3399_v55 = vadd.f32 %v3398_v11, %v2038_v48  ;;  %v6431_v22 = vadd.f32 %v3525_v32, %v6398_v51 }
 0xd4f   :  { %4031 = vtanh.f32 %v3399_v55  ;;  %v3549_v52 = vmax.f32 %v6428_v40, %v6431_v22 }
 0xd51   :  { %3550 = vmax.xlane.f32.xlu2 %v3549_v52 }
 0xd54   :  { %v3528_v26 = vpop.f32.mrf.mxu0 }
 0xd55   :  { %v4032_v19 = vpop.eup %4031  ;;  %v3529_v24 = vadd.f32 %v3528_v26, %v6398_v51 }
 0xd56   :  { %v3402_v61 = vsub.f32 %v4032_v19, %v6378_v31 }
 0xd57   :  { %v3552_v62 = vmax.f32 %v3488_v46, %v3529_v24 }
 0xd58   :  { %v3403_v44 = vmul.f32 %v3402_v61, %v3401_v27 }
 0xd59   :  { %3553 = vmax.xlane.f32.xlu0 %v3552_v62 }
 0xd5a   :  { %v3404_v29 = vadd.f32 %v3403_v44, %v6378_v31 }
 0xd5c   :  { %v3531_v28 = vpop.f32.mrf.mxu0  ;;  %v3409_v17 = vmul.f32 %v3404_v29, %v3247_v57 }
 0xd5d   :  { %v6443_v2 = vadd.f32 %v3531_v28, %v6398_v51 }
 0xd5e   :  { %3495 = vmatmul.f32.gmra.mxu3 %v3409_v17  ;;  %3536 = vmatmul.f32.gmra.mxu0 %v3409_v17 }
 0xd5f   :  { %v3555_v43 = vmax.f32 %v6440_v30, %v6443_v2 }
 0xd61   :  { %3556 = vmax.xlane.f32.xlu1 %v3555_v43 }
 0xd64   :  { %v3534_v47 = vpop.f32.mrf.mxu0 }
 0xd65   :  { %v3535_v31 = vadd.f32 %v3534_v47, %v6398_v51 }
 0xd67   :  { %v3558_v58 = vmax.f32 %v3494_v18, %v3535_v31 }
 0xd69   :  { %3559 = vmax.xlane.f32.xlu2 %v3558_v58 }
 0xdac   :  { %v3542_v59 = vpop.xlane.xlu1 %3541 }
 0xdad   :  { %v6450_v63 = vsub.f32 %v6401_v3, %v3542_v59  ;;  %v6453_v36 = vsub.f32 %v6404_v60, %v3542_v59 }
 0xdaf   :  { %v3580_v23 = vmul.f32 1.442695, %v6450_v63  ;;  %v3582_v39 = vmul.f32 1.442695, %v6453_v36 }
 0xdb1   :  { %4033 = vpow2.f32 %v3580_v23 }
 0xdb2   :  { %4035 = vpow2.f32 %v3582_v39 }
 0xdb4   :  { %v3545_v4 = vpop.xlane.xlu1 %3544 }
 0xdb5   :  { %v6472_v48 = vsub.f32 %v6409_v25, %v3545_v4  ;;  %v6475_v32 = vsub.f32 %v6412_v5, %v3545_v4 }
 0xdb7   :  { %v4034_v41 = vpop.eup %4033  ;;  %v3584_v54 = vmul.f32 1.442695, %v6472_v48  ;;  %v3586_v52 = vmul.f32 1.442695, %v6475_v32 }
 0xdb8   :  { %v4036_v15 = vpop.eup %4035 }
 0xdb9   :  { %v3612_v35 = vadd.f32 %v4036_v15, %v4034_v41 }
 0xdbb   :  { %3613 = vadd.xlane.f32.xlu2 %v3612_v35 }
 0xdbc   :  { %v3548_v7 = vpop.xlane.xlu2 %3547 }
 0xdbd   :  { %v6458_v9 = vsub.f32 %v6417_v56, %v3548_v7  ;;  %v6461_v3 = vsub.f32 %v6420_v21, %v3548_v7 }
 0xdbf   :  { %v3588_v60 = vmul.f32 1.442695, %v6458_v9  ;;  %v3590_v10 = vmul.f32 1.442695, %v6461_v3 }
 0xdc1   :  { %4037 = vpow2.f32 %v3588_v60 }
 0xdc2   :  { %4039 = vpow2.f32 %v3590_v10 }
 0xdc4   :  { %v3551_v12 = vpop.xlane.xlu2 %3550 }
 0xdc5   :  { %v6486_v5 = vsub.f32 %v6428_v40, %v3551_v12  ;;  %v6491_v19 = vsub.f32 %v6431_v22, %v3551_v12 }
 0xdc7   :  { %v4038_v14 = vpop.eup %4037  ;;  %v3592_v27 = vmul.f32 1.442695, %v6486_v5  ;;  %v3594_v62 = vmul.f32 1.442695, %v6491_v19 }
 0xdc8   :  { %v4040_v37 = vpop.eup %4039 }
 0xdc9   :  { %v3618_v1 = vadd.f32 %v4040_v37, %v4038_v14 }
 0xdcb   :  { %3619 = vadd.xlane.f32.xlu2 %v3618_v1 }
 0xdcc   :  { %v3554_v20 = vpop.xlane.xlu0 %3553 }
 0xdcd   :  { %v6465_v16 = vsub.f32 %v3488_v46, %v3554_v20  ;;  %v6467_v49 = vsub.f32 %v3529_v24, %v3554_v20 }
 0xdcf   :  { %v3596_v56 = vmul.f32 1.442695, %v6465_v16  ;;  %v3598_v21 = vmul.f32 1.442695, %v6467_v49 }
 0xdd1   :  { %4041 = vpow2.f32 %v3596_v56 }
 0xdd2   :  { %4043 = vpow2.f32 %v3598_v21 }
 0xdd3   :  { %4045 = vpow2.f32 %v3584_v54 }
 0xdd4   :  { %v3557_v44 = vpop.xlane.xlu1 %3556 }
 0xdd7   :  { %v4042_v33 = vpop.eup %4041 }
 0xdd8   :  { %v4044_v50 = vpop.eup %4043 }
 0xdd9   :  { %v3624_v11 = vadd.f32 %v4044_v50, %v4042_v33  ;;  %v4046_v24 = vpop.eup %4045 }
 0xddb   :  { %3625 = vadd.xlane.f32.xlu2 %v3624_v11  ;;  %v3537_v34 = vpop.f32.mrf.mxu0 }
 0xddc   :  { %v3560_v55 = vpop.xlane.xlu2 %3559  ;;  %v3538_v45 = vadd.f32 %v3537_v34, %v6398_v51  ;;  %v6496_v51 = vsub.f32 %v6440_v30, %v3557_v44 }
 0xddd   :  { %v6478_v6 = vsub.f32 %v3494_v18, %v3560_v55  ;;  %v6480_v13 = vsub.f32 %v3535_v31, %v3560_v55 }
 0xdde   :  { %v3600_v29 = vmul.f32 1.442695, %v6496_v51 }
 0xddf   :  { %v3604_v53 = vmul.f32 1.442695, %v6478_v6  ;;  %v3606_v25 = vmul.f32 1.442695, %v6480_v13 }
 0xde1   :  { %4047 = vpow2.f32 %v3604_v53  ;;  %v3496_v0 = vpop.f32.mrf.mxu3 }
 0xde2   :  { %4049 = vpow2.f32 %v3606_v25  ;;  %v3497_v26 = vadd.f32 %v3496_v0, %v6396_v38  ;;  %v6499_v38 = vsub.f32 %v6443_v2, %v3557_v44  ;;  %v6656_v2 = vld [vmem:[#allocation41_spill] sm:$0xff] }
 0xde3   :  { %4051 = vpow2.f32 %v3586_v52 }
 0xde4   :  { %v3561_v46 = vmax.f32 %v3497_v26, %v3538_v45  ;;  %4053 = vpow2.f32 %v3592_v27  ;;  %v3602_v28 = vmul.f32 1.442695, %v6499_v38 }
 0xde5   :  { %4055 = vpow2.f32 %v3594_v62 }
 0xde6   :  { %3562 = vmax.xlane.f32.xlu1 %v3561_v46  ;;  %4057 = vpow2.f32 %v3600_v29 }
 0xde7   :  { %v4048_v61 = vpop.eup %4047  ;;  %4059 = vpow2.f32 %v3602_v28 }
 0xde8   :  { %v4050_v40 = vpop.eup %4049 }
 0xde9   :  { %v4052_v57 = vpop.eup %4051  ;;  %v3630_v8 = vadd.f32 %v4050_v40, %v4048_v61 }
 0xdea   :  { %v3615_v22 = vadd.f32 %v4052_v57, %v4046_v24  ;;  %v4054_v17 = vpop.eup %4053 }
 0xdeb   :  { %3631 = vadd.xlane.f32.xlu2 %v3630_v8  ;;  %v4056_v43 = vpop.eup %4055 }
 0xdec   :  { %v3621_v42 = vadd.f32 %v4056_v43, %v4054_v17  ;;  %v4058_v47 = vpop.eup %4057 }
 0xded   :  { %v4060_v30 = vpop.eup %4059 }
 0xdee   :  { %3616 = vadd.xlane.f32.xlu1 %v3615_v22  ;;  %v3627_v18 = vadd.f32 %v4060_v30, %v4058_v47 }
 0xdf6   :  { %3622 = vadd.xlane.f32.xlu1 %v3621_v42 }
 0xdfe   :  { %3628 = vadd.xlane.f32.xlu1 %v3627_v18 }
 0xe03   :  { %1880 = vrot.lane.b32.xlu2 %v6656_v2, %s4487_s13 }
 0xe2e   :  { %v3614_v31 = vpop.xlane.xlu2 %3613 }
 0xe2f   :  { %4061 = vlog2.f32 %v3614_v31 }
 0xe35   :  { %v4062_v58 = vpop.eup %4061 }
 0xe36   :  { %v3637_v59 = vmul.f32 0.6931472, %v4062_v58 }
 0xe38   :  { %v3652_v23 = vsub.f32 %v6450_v63, %v3637_v59  ;;  %v3653_v39 = vsub.f32 %v6453_v36, %v3637_v59 }
 0xe3a   :  { %3668 = vst [vmem:[#allocation23] sm:$0xff] %v3652_v23 }
 0xe3b   :  { %3669 = vst [vmem:[#allocation23 + $0x8] sm:$0xff] %v3653_v39 }
 0xe3e   :  { %v3620_v41 = vpop.xlane.xlu2 %3619 }
 0xe3f   :  { %4063 = vlog2.f32 %v3620_v41 }
 0xe45   :  { %v4064_v15 = vpop.eup %4063 }
 0xe46   :  { %v3641_v35 = vmul.f32 0.6931472, %v4064_v15 }
 0xe48   :  { %v3656_v7 = vsub.f32 %v6458_v9, %v3641_v35  ;;  %v3657_v60 = vsub.f32 %v6461_v3, %v3641_v35 }
 0xe4a   :  { %3672 = vst [vmem:[#allocation23 + $0x20] sm:$0xff] %v3656_v7 }
 0xe4b   :  { %3673 = vst [vmem:[#allocation23 + $0x28] sm:$0xff] %v3657_v60 }
 0xe4e   :  { %v3626_v10 = vpop.xlane.xlu2 %3625 }
 0xe4f   :  { %4065 = vlog2.f32 %v3626_v10 }
 0xe55   :  { %v4066_v14 = vpop.eup %4065 }
 0xe56   :  { %v3645_v37 = vmul.f32 0.6931472, %v4066_v14 }
 0xe58   :  { %v3660_v63 = vsub.f32 %v6465_v16, %v3645_v37  ;;  %v3661_v36 = vsub.f32 %v6467_v49, %v3645_v37 }
 0xe59   :  { %v3563_v1 = vpop.xlane.xlu1 %3562 }
 0xe5a   :  { %3676 = vst [vmem:[#allocation23 + $0x40] sm:$0xff] %v3660_v63  ;;  %v6511_v20 = vsub.f32 %v3497_v26, %v3563_v1  ;;  %v6513_v56 = vsub.f32 %v3538_v45, %v3563_v1 }
 0xe5b   :  { %3677 = vst [vmem:[#allocation23 + $0x48] sm:$0xff] %v3661_v36 }
 0xe5c   :  { %v3608_v9 = vmul.f32 1.442695, %v6511_v20  ;;  %v3610_v3 = vmul.f32 1.442695, %v6513_v56 }
 0xe5e   :  { %4067 = vpow2.f32 %v3608_v9  ;;  %v3632_v21 = vpop.xlane.xlu2 %3631 }
 0xe5f   :  { %4069 = vpow2.f32 %v3610_v3 }
 0xe60   :  { %4071 = vlog2.f32 %v3632_v21 }
 0xe61   :  { %v3617_v12 = vpop.xlane.xlu1 %3616 }
 0xe62   :  { %4073 = vlog2.f32 %v3617_v12 }
 0xe64   :  { %v4068_v16 = vpop.eup %4067 }
 0xe65   :  { %v4070_v4 = vpop.eup %4069 }
 0xe66   :  { %v4072_v49 = vpop.eup %4071  ;;  %v1881_v33 = vpop.permute.xlu2 %1880  ;;  %v3633_v50 = vadd.f32 %v4070_v4, %v4068_v16 }
 0xe67   :  { %v3649_v11 = vmul.f32 0.6931472, %v4072_v49  ;;  %1883 = vst.msk [vmem:[#allocation26] sm:$0xff] %vm1836_vm5, %v1881_v33 }
 0xe68   :  { %v4074_v54 = vpop.eup %4073  ;;  %3634 = vadd.xlane.f32.xlu1 %v3633_v50  ;;  %3718 = dma.vmem_to_hbm [thread:$0]  %s3714_s6, 128, %s3716_s8, [#allocation25]  }
 0xe69   :  { %v3664_v55 = vsub.f32 %v6478_v6, %v3649_v11  ;;  %v3665_v52 = vsub.f32 %v6480_v13, %v3649_v11  ;;  %v3639_v34 = vmul.f32 0.6931472, %v4074_v54  ;;  %v3623_v53 = vpop.xlane.xlu1 %3622 }
 0xe6a   :  { %4075 = vlog2.f32 %v3623_v53 }
 0xe6b   :  { %3680 = vst [vmem:[#allocation23 + $0x60] sm:$0xff] %v3664_v55  ;;  %v3654_v25 = vsub.f32 %v6472_v48, %v3639_v34  ;;  %v3655_v0 = vsub.f32 %v6475_v32, %v3639_v34 }
 0xe6c   :  { %3681 = vst [vmem:[#allocation23 + $0x68] sm:$0xff] %v3665_v52 }
 0xe6d   :  { %3670 = vst [vmem:[#allocation23 + $0x10] sm:$0xff] %v3654_v25 }
 0xe6e   :  { %3671 = vst [vmem:[#allocation23 + $0x18] sm:$0xff] %v3655_v0 }
 0xe70   :  { %v4076_v6 = vpop.eup %4075 }
 0xe71   :  { %v3643_v48 = vmul.f32 0.6931472, %v4076_v6  ;;  %v3629_v13 = vpop.xlane.xlu1 %3628 }
 0xe72   :  { %4077 = vlog2.f32 %v3629_v13 }
 0xe73   :  { %v3658_v32 = vsub.f32 %v6486_v5, %v3643_v48  ;;  %v3659_v45 = vsub.f32 %v6491_v19, %v3643_v48 }
 0xe75   :  { %3674 = vst [vmem:[#allocation23 + $0x30] sm:$0xff] %v3658_v32 }
 0xe76   :  { %3675 = vst [vmem:[#allocation23 + $0x38] sm:$0xff] %v3659_v45 }
 0xe78   :  { %v4078_v26 = vpop.eup %4077 }
 0xe79   :  { %v3647_v46 = vmul.f32 0.6931472, %v4078_v26 }
 0xe7b   :  { %v3662_v24 = vsub.f32 %v6496_v51, %v3647_v46  ;;  %v3663_v27 = vsub.f32 %v6499_v38, %v3647_v46 }
 0xe7d   :  { %3678 = vst [vmem:[#allocation23 + $0x50] sm:$0xff] %v3662_v24 }
 0xe7e   :  { %3679 = vst [vmem:[#allocation23 + $0x58] sm:$0xff] %v3663_v27 }
 0xedb   :  { %v3635_v61 = vpop.xlane.xlu1 %3634 }
 0xedc   :  { %4079 = vlog2.f32 %v3635_v61 }
 0xee2   :  { %v4080_v62 = vpop.eup %4079 }
 0xee3   :  { %v3651_v44 = vmul.f32 0.6931472, %v4080_v62 }
 0xee5   :  { %v3666_v5 = vsub.f32 %v6511_v20, %v3651_v44  ;;  %v3667_v19 = vsub.f32 %v6513_v56, %v3651_v44 }
 0xee7   :  { %3682 = vst [vmem:[#allocation23 + $0x70] sm:$0xff] %v3666_v5 }
 0xee8   :  { %3683 = vst [vmem:[#allocation23 + $0x78] sm:$0xff] %v3667_v19 }
 0xee9   :  { %3696 = dma.vmem_to_hbm [thread:$0]  %s3689_s21, 2048, %s3691_s22, [#allocation7], %s4484_s11, %s4484_s11, %s4485_s25  }
 0xeea   :  { %4463 = dma.done.wait [#allocation7], 2048  }
 0xeeb   :  { %4464 = vsyncadd [#allocation7], 4294965248 }
 0xeec   :  { %4465 = dma.done.wait [#allocation25], 256  }
 0xeed   :  { %4466 = vsyncadd [#allocation25], 4294967040 }
 0xeee   :  { %4467 = dma.done.wait [#allocation28], 128  }
 0xeef   :  { %4468 = vsyncadd [#allocation28], 4294967168 }
 0xef0   :  { %3746 = vsyncpa [#allocation6], 1 }
 0xef1   :  { %3747 = vsyncpa [#allocation9], 1 }
 0xef2   :  { %3748 = vsyncpa [#allocation12], 1 }
 0xef3   :  { %3749 = vsyncpa [#allocation15], 1 }
 0xef4   :  { %3750 = vsyncpa [#allocation18], 1 }
 0xef5   :  { %3751 = vsyncpa [#allocation21], 1 }
 0xef6   :  { %3752 = vsyncpa [#allocation7], 1 }
 0xef7   :  { %3753 = vsyncpa [#allocation25], 1 }
 0xef8   :  { %3754 = vsyncpa [#allocation28], 1 }

</bundles_post_ra>
